<compile_context>
chip_gen: v6e
topology: v6e:2x2x1
jax: 0.10.0
libtpu: 0.0.40
codegen_flags: <defaults>
</compile_context>

<pallas_src>
import math

import numpy as np
import jax
import jax.numpy as jnp
from jax.experimental import pallas as pl
from jax.experimental.pallas import tpu as pltpu

MXU_DTYPE = jnp.bfloat16      # matmul operand dtype (accumulation is float32)


# ----------------------------------------------------------------------------
# Host-side weight folding: fold kw taps, W stride and the circular W padding
# of each conv into a K-stacked block-Toeplitz matrix so the kernel does ONE
# plain 2-D MXU dot per conv (kh taps stacked along K).
# ----------------------------------------------------------------------------
def _conv_tap_matrix(w, wp, sw, wo):
    """w: (KH, KW, Cin, Cout) -> (KH*wp*Cin, wo*Cout).

    Row index (kh, p, ci): weight applied to the circularly-W-padded input at
    padded W position p, channel ci, for kernel row kh. Column index (wo, co)."""
    kh_, kw_, cin, cout = w.shape
    sel = np.zeros((kw_, wp, wo), np.float32)
    for kw in range(kw_):
        for j in range(wo):
            sel[kw, sw * j + kw, j] = 1.0
    t = jnp.einsum('kpj,hkio->hpijo', jnp.asarray(sel), w.astype(jnp.float32))
    return t.reshape(kh_ * wp * cin, wo * cout).astype(MXU_DTYPE)


def _down_tap_matrix(wd, w_in, sw, wo):
    """1x1 downsample conv: wd (Cin, Cout) -> (w_in*Cin, wo*Cout), W-stride folded."""
    cin, cout = wd.shape
    sel = np.zeros((w_in, wo), np.float32)
    for j in range(wo):
        sel[sw * j, j] = 1.0
    t = jnp.einsum('pj,io->pijo', jnp.asarray(sel), wd.astype(jnp.float32))
    return t.reshape(w_in * cin, wo * cout).astype(MXU_DTYPE)


# ----------------------------------------------------------------------------
# In-kernel building blocks (all traced into the single kernel body; every
# Python loop below is a tiny static trip count and fully unrolled).
# Activations are carried as lane-dense (B*H, W*C) float32 slabs.
# ----------------------------------------------------------------------------
def _circ_pad_w(a, c):
    # lanes are (w, c) ordered -> circular W pad = wrap the edge channel blocks.
    return jnp.concatenate([a[:, -c:], a, a[:, :c]], axis=1)


def _pad_rows(a, batch, h):
    """(batch*h, L) -> list of `batch` arrays (h+2, L) with one zero row on top
    and bottom (only the 2 pad rows are materialized)."""
    z = jnp.zeros((1, a.shape[1]), a.dtype)
    return [jnp.concatenate([z, a[b * h:(b + 1) * h, :], z], axis=0)
            for b in range(batch)]


def _tap_rows(p, sh, kh, ho):
    """Rows of padded sample p ((h+2, L)) feeding kernel row kh of a stride-sh
    conv: padded row sh*o + kh for output row o."""
    if sh == 1:
        return p[kh:kh + ho, :]
    return jnp.concatenate(
        [p[sh * o + kh:sh * o + kh + 1, :] for o in range(ho)], axis=0)


def _conv3x3(a16, batch, h, c, t, sh, ho):
    """3x3 conv (zero H pad 1, circular W pad 1, strides (sh, sw)) as ONE MXU dot.

    a16: (batch*h, w*c) bf16; t: (3*(w+2)*c, wo*cout) K-stacked tap matrix.
    Returns (batch*ho, wo*cout) float32."""
    ap = _circ_pad_w(a16, c)                            # (batch*h, (w+2)*c)
    padded = _pad_rows(ap, batch, h)
    lhs = jnp.concatenate(
        [jnp.concatenate([_tap_rows(p, sh, kh, ho) for kh in range(3)], axis=1)
         for p in padded], axis=0)                      # (batch*ho, 3*(w+2)*c)
    return jnp.dot(lhs, t, preferred_element_type=jnp.float32)


def _identity_path(a, batch, h, sh, ho, td):
    """Residual identity, derived in-kernel from the live activation value.
    td: (w*cin, wo*cout) 1x1-downsample matrix (W-stride folded) or None."""
    if td is None:
        return a
    if sh == 1:
        sel = a
    else:
        sel = jnp.concatenate(
            [jnp.concatenate([a[b * h + sh * o:b * h + sh * o + 1, :]
                              for o in range(ho)], axis=0)
             for b in range(batch)], axis=0)
    return jnp.dot(sel.astype(MXU_DTYPE), td, preferred_element_type=jnp.float32)


def _stem(x, batch, m, t):
    """conv1 (3x3, stride (1,2)) + ReLU + MaxPool2d(3, stride (1,2)), fused."""
    h, c, c1, wpool = m['H'], m['C'], m['C1'], m['Wpool']
    y = jnp.maximum(_conv3x3(x.astype(MXU_DTYPE), batch, h, c, t, 1, h), 0.0)
    # MaxPool: circular W pad; the two zero H-pad rows are equivalent to the
    # implicit -inf padding because the pool input is post-ReLU (>= 0).
    yp = _circ_pad_w(y, c1)                              # (batch*h, (w1+2)*c1)
    padded = _pad_rows(yp, batch, h)
    rowmax = jnp.concatenate(
        [jnp.maximum(jnp.maximum(p[0:h, :], p[1:1 + h, :]), p[2:2 + h, :])
         for p in padded], axis=0)                       # (batch*h, (w1+2)*c1)
    cols = []
    for wo in range(wpool):                              # W stride 2, kernel 3
        v = jnp.maximum(rowmax[:, (2 * wo) * c1:(2 * wo + 1) * c1],
                        rowmax[:, (2 * wo + 1) * c1:(2 * wo + 2) * c1])
        cols.append(jnp.maximum(v, rowmax[:, (2 * wo + 2) * c1:(2 * wo + 3) * c1]))
    return jnp.concatenate(cols, axis=1)                 # (batch*h, wpool*c1)


def _basic_block(a, batch, m, t1, t2, td):
    """conv3x3 -> ReLU -> conv3x3 -> (+ identity / 1x1 downsample) -> ReLU."""
    h, c, ho, sh = m['H'], m['C'], m['Ho'], m['sh']
    h1 = jnp.maximum(_conv3x3(a.astype(MXU_DTYPE), batch, h, c, t1, sh, ho), 0.0)
    out = _conv3x3(h1.astype(MXU_DTYPE), batch, ho, m['planes'], t2, 1, ho)
    out = out + _identity_path(a, batch, h, sh, ho, td)
    return jnp.maximum(out, 0.0)


def _head(a, batch, m, wfc, bfc):
    """AdaptiveAvgPool2d((1,1)) + fc4 (output_layer == 4)."""
    h, w, c = m['H'], m['W'], m['C']
    s = a[:, 0:c]
    for j in range(1, w):
        s = s + a[:, j * c:(j + 1) * c]
    pooled = jnp.concatenate(
        [jnp.sum(s[b * h:(b + 1) * h, :], axis=0, keepdims=True)
         for b in range(batch)], axis=0) * (1.0 / (h * w))     # (batch, c)
    return jnp.dot(pooled, wfc, preferred_element_type=jnp.float32) + bfc


def _make_kernel(batch, metas):
    def kernel(*refs):
        it = iter(refs)
        a = next(it)[...]                                # (batch*H, W*Cin) f32
        for m in metas:
            if m['kind'] == 'stem':
                a = _stem(a, batch, m, next(it)[...])
            elif m['kind'] == 'block':
                t1 = next(it)[...]
                t2 = next(it)[...]
                td = next(it)[...] if m['has_down'] else None
                a = _basic_block(a, batch, m, t1, t2, td)
            else:                                        # fused avgpool + fc4
                wfc = next(it)[...]
                bfc = next(it)[...]
                o_ref = next(it)
                o_ref[...] = _head(a, batch, m, wfc, bfc).astype(o_ref.dtype)
    return kernel


# ----------------------------------------------------------------------------
# Model build: static geometry + folded weight matrices for a fixed input shape.
# ----------------------------------------------------------------------------
def build_model(params, in_shape):
    _, cin, h, w = in_shape
    metas, weights = [], []

    w1 = params['conv1']                                 # (3, 3, Cin, C1)
    c1 = w1.shape[3]
    w_conv1 = (w + 2 - 3) // 2 + 1                       # conv1: W stride 2
    wpool = (w_conv1 + 2 - 3) // 2 + 1                   # maxpool: W stride 2
    metas.append(dict(kind='stem', H=h, C=cin, C1=c1, W1=w_conv1, Wpool=wpool))
    weights.append(_conv_tap_matrix(w1, wp=w + 2, sw=2, wo=w_conv1))
    cur_h, cur_w, cur_c = h, wpool, c1

    layer_strides = [(1, 1), (1, 2), (1, 2), (2, 2)]
    for li in range(4):
        for bi, blk in enumerate(params[f'layer{li + 1}']):
            sh, sw = layer_strides[li] if bi == 0 else (1, 1)
            planes = blk['conv1'].shape[3]
            ho = (cur_h + 2 - 3) // sh + 1
            wo = (cur_w + 2 - 3) // sw + 1
            weights.append(_conv_tap_matrix(blk['conv1'], wp=cur_w + 2, sw=sw, wo=wo))
            weights.append(_conv_tap_matrix(blk['conv2'], wp=wo + 2, sw=1, wo=wo))
            has_down = blk['down'] is not None
            if has_down:
                weights.append(_down_tap_matrix(blk['down'][0, 0], w_in=cur_w,
                                                sw=sw, wo=wo))
            metas.append(dict(kind='block', H=cur_h, C=cur_c, planes=planes,
                              Ho=ho, Wo=wo, sh=sh, has_down=has_down))
            cur_h, cur_w, cur_c = ho, wo, planes

    metas.append(dict(kind='head', H=cur_h, W=cur_w, C=cur_c))
    weights.append(params['fc4_w'].astype(jnp.float32))
    weights.append(params['fc4_b'].astype(jnp.float32))
    return metas, weights


def _cost_estimate(batch, x2d, weights, metas, num_outputs):
    flops, wi = 0, 0
    for m in metas:
        if m['kind'] == 'stem':
            t = weights[wi]; wi += 1
            flops += 2 * batch * m['H'] * t.shape[0] * t.shape[1]
        elif m['kind'] == 'block':
            t1, t2 = weights[wi], weights[wi + 1]; wi += 2
            flops += 2 * batch * m['Ho'] * (t1.shape[0] * t1.shape[1] +
                                            t2.shape[0] * t2.shape[1])
            if m['has_down']:
                td = weights[wi]; wi += 1
                flops += 2 * batch * m['Ho'] * td.shape[0] * td.shape[1]
        else:
            wfc = weights[wi]; wi += 2
            flops += 2 * batch * wfc.shape[0] * wfc.shape[1]
    nbytes = int(np.prod(x2d.shape)) * 4 + batch * num_outputs * 4
    for arr in weights:
        nbytes += int(np.prod(arr.shape)) * np.dtype(arr.dtype).itemsize
    return pl.CostEstimate(flops=int(flops), transcendentals=0,
                           bytes_accessed=int(nbytes))


def resnet_modified_forward(x_nchw, weights, metas, num_outputs):
    b, cin, h, w = x_nchw.shape
    # NCHW -> lane-dense (B*H, W*C) slab (single cheap host-side layout op).
    x2d = jnp.transpose(x_nchw, (0, 2, 3, 1)).reshape(b * h, w * cin)
    x2d = x2d.astype(jnp.float32)
    return pl.pallas_call(
        _make_kernel(b, metas),
        out_shape=jax.ShapeDtypeStruct((b, num_outputs), jnp.float32),
        # No grid: every operand is a whole-array VMEM block; total working set
        # (weights + activations) is well under 1 MiB -> modest VMEM limit.
        compiler_params=pltpu.CompilerParams(vmem_limit_bytes=8 * 1024 * 1024),
        cost_estimate=_cost_estimate(b, x2d, weights, metas, num_outputs),
    )(x2d, *weights)


# ----------------------------------------------------------------------------
# Deterministic parameter init (shapes follow ResNetModified.__init__).
# ----------------------------------------------------------------------------
def _kaiming(key, kh, kw, cin, cout):
    std = math.sqrt(2.0 / (cout * kh * kw))              # fan_out, relu
    return jax.random.normal(key, (kh, kw, cin, cout), jnp.float32) * std


def init_params(key, in_channels, num_outputs, factor=8):
    inplanes = int(64 / factor)
    plan = [int(64 / factor), int(128 / factor),
            int(256 / factor), int(512 / factor)]
    keys = iter(jax.random.split(key, 64))
    params = {'conv1': _kaiming(next(keys), 3, 3, in_channels, inplanes)}
    cur = inplanes
    strides = [(1, 1), (1, 2), (1, 2), (2, 2)]
    for li, (planes, st) in enumerate(zip(plan, strides), start=1):
        blocks = []
        b0 = {'conv1': _kaiming(next(keys), 3, 3, cur, planes),
              'conv2': _kaiming(next(keys), 3, 3, planes, planes),
              'down': None}
        if st != (1, 1) or cur != planes:
            b0['down'] = _kaiming(next(keys), 1, 1, cur, planes)
        blocks.append(b0)
        cur = planes
        blocks.append({'conv1': _kaiming(next(keys), 3, 3, cur, planes),
                       'conv2': _kaiming(next(keys), 3, 3, planes, planes),
                       'down': None})
        params[f'layer{li}'] = blocks
    bound = 1.0 / math.sqrt(cur)
    params['fc4_w'] = jax.random.uniform(next(keys), (cur, num_outputs),
                                         jnp.float32, -bound, bound)
    params['fc4_b'] = jax.random.uniform(next(keys), (1, num_outputs),
                                         jnp.float32, -bound, bound)
    return params


# ----------------------------------------------------------------------------
if __name__ == "__main__":
    key = jax.random.PRNGKey(0)
    k_x, k_p = jax.random.split(key)

    B, Cin, H, W = 2, 4, 8, 32            # small NCHW input
    num_outputs = 3
    factor = 8                             # factor_fewer_resnet_channels

    x = jax.random.normal(k_x, (B, Cin, H, W), jnp.float32)
    params = init_params(k_p, Cin, num_outputs, factor=factor)
    metas, weights = build_model(params, (B, Cin, H, W))

    fwd = jax.jit(lambda xx, ww: resnet_modified_forward(xx, ww, metas, num_outputs))
    out = jax.block_until_ready(fwd(x, weights))
    assert out.shape == (B, num_outputs), out.shape
    assert bool(jnp.all(jnp.isfinite(out)))
    print("KERNEL_OK")
</pallas_src>

<mosaic_0001>
module attributes {stable_mosaic.version = 11 : i64} {
  func.func @kernel(%arg0: memref<16x128xf32, #tpu.memory_space<vmem>>, %arg1: memref<408x128xbf16, #tpu.memory_space<vmem>>, %arg2: memref<240x64xbf16, #tpu.memory_space<vmem>>, %arg3: memref<240x64xbf16, #tpu.memory_space<vmem>>, %arg4: memref<240x64xbf16, #tpu.memory_space<vmem>>, %arg5: memref<240x64xbf16, #tpu.memory_space<vmem>>, %arg6: memref<240x64xbf16, #tpu.memory_space<vmem>>, %arg7: memref<288x64xbf16, #tpu.memory_space<vmem>>, %arg8: memref<64x64xbf16, #tpu.memory_space<vmem>>, %arg9: memref<288x64xbf16, #tpu.memory_space<vmem>>, %arg10: memref<288x64xbf16, #tpu.memory_space<vmem>>, %arg11: memref<288x64xbf16, #tpu.memory_space<vmem>>, %arg12: memref<384x64xbf16, #tpu.memory_space<vmem>>, %arg13: memref<64x64xbf16, #tpu.memory_space<vmem>>, %arg14: memref<384x64xbf16, #tpu.memory_space<vmem>>, %arg15: memref<384x64xbf16, #tpu.memory_space<vmem>>, %arg16: memref<384x64xbf16, #tpu.memory_space<vmem>>, %arg17: memref<576x64xbf16, #tpu.memory_space<vmem>>, %arg18: memref<64x64xbf16, #tpu.memory_space<vmem>>, %arg19: memref<576x64xbf16, #tpu.memory_space<vmem>>, %arg20: memref<576x64xbf16, #tpu.memory_space<vmem>>, %arg21: memref<64x3xf32, #tpu.memory_space<vmem>>, %arg22: memref<1x3xf32, #tpu.memory_space<vmem>>, %arg23: memref<2x3xf32, #tpu.memory_space<vmem>>) attributes {dimension_semantics = [], scalar_prefetch = 0 : i64, scratch_operands = 0 : i64, tpu.core_type = #tpu.core_type<tc>} {
    %c0 = arith.constant 0 : index
    %c0_0 = arith.constant 0 : index
    %0 = vector.load %arg0[%c0, %c0_0] : memref<16x128xf32, #tpu.memory_space<vmem>>, vector<16x128xf32>
    %c0_1 = arith.constant 0 : index
    %c0_2 = arith.constant 0 : index
    %1 = vector.load %arg1[%c0_1, %c0_2] : memref<408x128xbf16, #tpu.memory_space<vmem>>, vector<408x128xbf16>
    %2 = arith.truncf %0 : vector<16x128xf32> to vector<16x128xbf16>
    %3 = vector.extract_strided_slice %2 {offsets = [0, 124], sizes = [16, 4], strides = [1, 1]} : vector<16x128xbf16> to vector<16x4xbf16>
    %4 = vector.extract_strided_slice %2 {offsets = [0, 0], sizes = [16, 4], strides = [1, 1]} : vector<16x128xbf16> to vector<16x4xbf16>
    %5 = tpu.concatenate %3, %2, %4 in 1 : vector<16x4xbf16>, vector<16x128xbf16>, vector<16x4xbf16> -> vector<16x136xbf16>
    %cst = arith.constant 0.000000e+00 : bf16
    %6 = vector.broadcast %cst : bf16 to vector<1x136xbf16>
    %7 = vector.extract_strided_slice %5 {offsets = [0, 0], sizes = [8, 136], strides = [1, 1]} : vector<16x136xbf16> to vector<8x136xbf16>
    %8 = tpu.concatenate %6, %7, %6 in 0 : vector<1x136xbf16>, vector<8x136xbf16>, vector<1x136xbf16> -> vector<10x136xbf16>
    %9 = vector.extract_strided_slice %5 {offsets = [8, 0], sizes = [8, 136], strides = [1, 1]} : vector<16x136xbf16> to vector<8x136xbf16>
    %10 = tpu.concatenate %6, %9, %6 in 0 : vector<1x136xbf16>, vector<8x136xbf16>, vector<1x136xbf16> -> vector<10x136xbf16>
    %11 = vector.extract_strided_slice %8 {offsets = [0, 0], sizes = [8, 136], strides = [1, 1]} : vector<10x136xbf16> to vector<8x136xbf16>
    %12 = vector.extract_strided_slice %8 {offsets = [1, 0], sizes = [8, 136], strides = [1, 1]} : vector<10x136xbf16> to vector<8x136xbf16>
    %13 = vector.extract_strided_slice %8 {offsets = [2, 0], sizes = [8, 136], strides = [1, 1]} : vector<10x136xbf16> to vector<8x136xbf16>
    %14 = tpu.concatenate %11, %12, %13 in 1 : vector<8x136xbf16>, vector<8x136xbf16>, vector<8x136xbf16> -> vector<8x408xbf16>
    %15 = vector.extract_strided_slice %10 {offsets = [0, 0], sizes = [8, 136], strides = [1, 1]} : vector<10x136xbf16> to vector<8x136xbf16>
    %16 = vector.extract_strided_slice %10 {offsets = [1, 0], sizes = [8, 136], strides = [1, 1]} : vector<10x136xbf16> to vector<8x136xbf16>
    %17 = vector.extract_strided_slice %10 {offsets = [2, 0], sizes = [8, 136], strides = [1, 1]} : vector<10x136xbf16> to vector<8x136xbf16>
    %18 = tpu.concatenate %15, %16, %17 in 1 : vector<8x136xbf16>, vector<8x136xbf16>, vector<8x136xbf16> -> vector<8x408xbf16>
    %19 = tpu.concatenate %14, %18 in 0 : vector<8x408xbf16>, vector<8x408xbf16> -> vector<16x408xbf16>
    %cst_3 = arith.constant dense<0.000000e+00> : vector<16x128xf32>
    %20 = tpu.matmul %19, %1, %cst_3 {dimension_numbers = #tpu.dot_dimension_numbers<[1], [0], [0], [1], [0, 0, 1, 1], [], []>} : vector<16x408xbf16>, vector<408x128xbf16>, vector<16x128xf32> -> vector<16x128xf32>
    %cst_4 = arith.constant 0.000000e+00 : f32
    %21 = vector.broadcast %cst_4 : f32 to vector<16x128xf32>
    %22 = arith.maximumf %20, %21 : vector<16x128xf32>
    %23 = vector.extract_strided_slice %22 {offsets = [0, 120], sizes = [16, 8], strides = [1, 1]} : vector<16x128xf32> to vector<16x8xf32>
    %24 = vector.extract_strided_slice %22 {offsets = [0, 0], sizes = [16, 8], strides = [1, 1]} : vector<16x128xf32> to vector<16x8xf32>
    %25 = tpu.concatenate %23, %22, %24 in 1 : vector<16x8xf32>, vector<16x128xf32>, vector<16x8xf32> -> vector<16x144xf32>
    %cst_5 = arith.constant 0.000000e+00 : f32
    %26 = vector.broadcast %cst_5 : f32 to vector<1x144xf32>
    %27 = vector.extract_strided_slice %25 {offsets = [0, 0], sizes = [8, 144], strides = [1, 1]} : vector<16x144xf32> to vector<8x144xf32>
    %28 = tpu.concatenate %26, %27, %26 in 0 : vector<1x144xf32>, vector<8x144xf32>, vector<1x144xf32> -> vector<10x144xf32>
    %29 = vector.extract_strided_slice %25 {offsets = [8, 0], sizes = [8, 144], strides = [1, 1]} : vector<16x144xf32> to vector<8x144xf32>
    %30 = tpu.concatenate %26, %29, %26 in 0 : vector<1x144xf32>, vector<8x144xf32>, vector<1x144xf32> -> vector<10x144xf32>
    %31 = vector.extract_strided_slice %28 {offsets = [0, 0], sizes = [8, 144], strides = [1, 1]} : vector<10x144xf32> to vector<8x144xf32>
    %32 = vector.extract_strided_slice %28 {offsets = [1, 0], sizes = [8, 144], strides = [1, 1]} : vector<10x144xf32> to vector<8x144xf32>
    %33 = arith.maximumf %31, %32 : vector<8x144xf32>
    %34 = vector.extract_strided_slice %28 {offsets = [2, 0], sizes = [8, 144], strides = [1, 1]} : vector<10x144xf32> to vector<8x144xf32>
    %35 = arith.maximumf %33, %34 : vector<8x144xf32>
    %36 = vector.extract_strided_slice %30 {offsets = [0, 0], sizes = [8, 144], strides = [1, 1]} : vector<10x144xf32> to vector<8x144xf32>
    %37 = vector.extract_strided_slice %30 {offsets = [1, 0], sizes = [8, 144], strides = [1, 1]} : vector<10x144xf32> to vector<8x144xf32>
    %38 = arith.maximumf %36, %37 : vector<8x144xf32>
    %39 = vector.extract_strided_slice %30 {offsets = [2, 0], sizes = [8, 144], strides = [1, 1]} : vector<10x144xf32> to vector<8x144xf32>
    %40 = arith.maximumf %38, %39 : vector<8x144xf32>
    %41 = tpu.concatenate %35, %40 in 0 : vector<8x144xf32>, vector<8x144xf32> -> vector<16x144xf32>
    %42 = vector.extract_strided_slice %41 {offsets = [0, 0], sizes = [16, 8], strides = [1, 1]} : vector<16x144xf32> to vector<16x8xf32>
    %43 = vector.extract_strided_slice %41 {offsets = [0, 8], sizes = [16, 8], strides = [1, 1]} : vector<16x144xf32> to vector<16x8xf32>
    %44 = arith.maximumf %42, %43 : vector<16x8xf32>
    %45 = vector.extract_strided_slice %41 {offsets = [0, 16], sizes = [16, 8], strides = [1, 1]} : vector<16x144xf32> to vector<16x8xf32>
    %46 = arith.maximumf %44, %45 : vector<16x8xf32>
    %47 = vector.extract_strided_slice %41 {offsets = [0, 16], sizes = [16, 8], strides = [1, 1]} : vector<16x144xf32> to vector<16x8xf32>
    %48 = vector.extract_strided_slice %41 {offsets = [0, 24], sizes = [16, 8], strides = [1, 1]} : vector<16x144xf32> to vector<16x8xf32>
    %49 = arith.maximumf %47, %48 : vector<16x8xf32>
    %50 = vector.extract_strided_slice %41 {offsets = [0, 32], sizes = [16, 8], strides = [1, 1]} : vector<16x144xf32> to vector<16x8xf32>
    %51 = arith.maximumf %49, %50 : vector<16x8xf32>
    %52 = vector.extract_strided_slice %41 {offsets = [0, 32], sizes = [16, 8], strides = [1, 1]} : vector<16x144xf32> to vector<16x8xf32>
    %53 = vector.extract_strided_slice %41 {offsets = [0, 40], sizes = [16, 8], strides = [1, 1]} : vector<16x144xf32> to vector<16x8xf32>
    %54 = arith.maximumf %52, %53 : vector<16x8xf32>
    %55 = vector.extract_strided_slice %41 {offsets = [0, 48], sizes = [16, 8], strides = [1, 1]} : vector<16x144xf32> to vector<16x8xf32>
    %56 = arith.maximumf %54, %55 : vector<16x8xf32>
    %57 = vector.extract_strided_slice %41 {offsets = [0, 48], sizes = [16, 8], strides = [1, 1]} : vector<16x144xf32> to vector<16x8xf32>
    %58 = vector.extract_strided_slice %41 {offsets = [0, 56], sizes = [16, 8], strides = [1, 1]} : vector<16x144xf32> to vector<16x8xf32>
    %59 = arith.maximumf %57, %58 : vector<16x8xf32>
    %60 = vector.extract_strided_slice %41 {offsets = [0, 64], sizes = [16, 8], strides = [1, 1]} : vector<16x144xf32> to vector<16x8xf32>
    %61 = arith.maximumf %59, %60 : vector<16x8xf32>
    %62 = vector.extract_strided_slice %41 {offsets = [0, 64], sizes = [16, 8], strides = [1, 1]} : vector<16x144xf32> to vector<16x8xf32>
    %63 = vector.extract_strided_slice %41 {offsets = [0, 72], sizes = [16, 8], strides = [1, 1]} : vector<16x144xf32> to vector<16x8xf32>
    %64 = arith.maximumf %62, %63 : vector<16x8xf32>
    %65 = vector.extract_strided_slice %41 {offsets = [0, 80], sizes = [16, 8], strides = [1, 1]} : vector<16x144xf32> to vector<16x8xf32>
    %66 = arith.maximumf %64, %65 : vector<16x8xf32>
    %67 = vector.extract_strided_slice %41 {offsets = [0, 80], sizes = [16, 8], strides = [1, 1]} : vector<16x144xf32> to vector<16x8xf32>
    %68 = vector.extract_strided_slice %41 {offsets = [0, 88], sizes = [16, 8], strides = [1, 1]} : vector<16x144xf32> to vector<16x8xf32>
    %69 = arith.maximumf %67, %68 : vector<16x8xf32>
    %70 = vector.extract_strided_slice %41 {offsets = [0, 96], sizes = [16, 8], strides = [1, 1]} : vector<16x144xf32> to vector<16x8xf32>
    %71 = arith.maximumf %69, %70 : vector<16x8xf32>
    %72 = vector.extract_strided_slice %41 {offsets = [0, 96], sizes = [16, 8], strides = [1, 1]} : vector<16x144xf32> to vector<16x8xf32>
    %73 = vector.extract_strided_slice %41 {offsets = [0, 104], sizes = [16, 8], strides = [1, 1]} : vector<16x144xf32> to vector<16x8xf32>
    %74 = arith.maximumf %72, %73 : vector<16x8xf32>
    %75 = vector.extract_strided_slice %41 {offsets = [0, 112], sizes = [16, 8], strides = [1, 1]} : vector<16x144xf32> to vector<16x8xf32>
    %76 = arith.maximumf %74, %75 : vector<16x8xf32>
    %77 = vector.extract_strided_slice %41 {offsets = [0, 112], sizes = [16, 8], strides = [1, 1]} : vector<16x144xf32> to vector<16x8xf32>
    %78 = vector.extract_strided_slice %41 {offsets = [0, 120], sizes = [16, 8], strides = [1, 1]} : vector<16x144xf32> to vector<16x8xf32>
    %79 = arith.maximumf %77, %78 : vector<16x8xf32>
    %80 = vector.extract_strided_slice %41 {offsets = [0, 128], sizes = [16, 8], strides = [1, 1]} : vector<16x144xf32> to vector<16x8xf32>
    %81 = arith.maximumf %79, %80 : vector<16x8xf32>
    %82 = tpu.concatenate %46, %51, %56, %61, %66, %71, %76, %81 in 1 : vector<16x8xf32>, vector<16x8xf32>, vector<16x8xf32>, vector<16x8xf32>, vector<16x8xf32>, vector<16x8xf32>, vector<16x8xf32>, vector<16x8xf32> -> vector<16x64xf32>
    %c0_6 = arith.constant 0 : index
    %c0_7 = arith.constant 0 : index
    %83 = vector.load %arg2[%c0_6, %c0_7] : memref<240x64xbf16, #tpu.memory_space<vmem>>, vector<240x64xbf16>
    %c0_8 = arith.constant 0 : index
    %c0_9 = arith.constant 0 : index
    %84 = vector.load %arg3[%c0_8, %c0_9] : memref<240x64xbf16, #tpu.memory_space<vmem>>, vector<240x64xbf16>
    %85 = arith.truncf %82 : vector<16x64xf32> to vector<16x64xbf16>
    %86 = vector.extract_strided_slice %85 {offsets = [0, 56], sizes = [16, 8], strides = [1, 1]} : vector<16x64xbf16> to vector<16x8xbf16>
    %87 = vector.extract_strided_slice %85 {offsets = [0, 0], sizes = [16, 8], strides = [1, 1]} : vector<16x64xbf16> to vector<16x8xbf16>
    %88 = tpu.concatenate %86, %85, %87 in 1 : vector<16x8xbf16>, vector<16x64xbf16>, vector<16x8xbf16> -> vector<16x80xbf16>
    %cst_10 = arith.constant 0.000000e+00 : bf16
    %89 = vector.broadcast %cst_10 : bf16 to vector<1x80xbf16>
    %90 = vector.extract_strided_slice %88 {offsets = [0, 0], sizes = [8, 80], strides = [1, 1]} : vector<16x80xbf16> to vector<8x80xbf16>
    %91 = tpu.concatenate %89, %90, %89 in 0 : vector<1x80xbf16>, vector<8x80xbf16>, vector<1x80xbf16> -> vector<10x80xbf16>
    %92 = vector.extract_strided_slice %88 {offsets = [8, 0], sizes = [8, 80], strides = [1, 1]} : vector<16x80xbf16> to vector<8x80xbf16>
    %93 = tpu.concatenate %89, %92, %89 in 0 : vector<1x80xbf16>, vector<8x80xbf16>, vector<1x80xbf16> -> vector<10x80xbf16>
    %94 = vector.extract_strided_slice %91 {offsets = [0, 0], sizes = [8, 80], strides = [1, 1]} : vector<10x80xbf16> to vector<8x80xbf16>
    %95 = vector.extract_strided_slice %91 {offsets = [1, 0], sizes = [8, 80], strides = [1, 1]} : vector<10x80xbf16> to vector<8x80xbf16>
    %96 = vector.extract_strided_slice %91 {offsets = [2, 0], sizes = [8, 80], strides = [1, 1]} : vector<10x80xbf16> to vector<8x80xbf16>
    %97 = tpu.concatenate %94, %95, %96 in 1 : vector<8x80xbf16>, vector<8x80xbf16>, vector<8x80xbf16> -> vector<8x240xbf16>
    %98 = vector.extract_strided_slice %93 {offsets = [0, 0], sizes = [8, 80], strides = [1, 1]} : vector<10x80xbf16> to vector<8x80xbf16>
    %99 = vector.extract_strided_slice %93 {offsets = [1, 0], sizes = [8, 80], strides = [1, 1]} : vector<10x80xbf16> to vector<8x80xbf16>
    %100 = vector.extract_strided_slice %93 {offsets = [2, 0], sizes = [8, 80], strides = [1, 1]} : vector<10x80xbf16> to vector<8x80xbf16>
    %101 = tpu.concatenate %98, %99, %100 in 1 : vector<8x80xbf16>, vector<8x80xbf16>, vector<8x80xbf16> -> vector<8x240xbf16>
    %102 = tpu.concatenate %97, %101 in 0 : vector<8x240xbf16>, vector<8x240xbf16> -> vector<16x240xbf16>
    %cst_11 = arith.constant dense<0.000000e+00> : vector<16x64xf32>
    %103 = tpu.matmul %102, %83, %cst_11 {dimension_numbers = #tpu.dot_dimension_numbers<[1], [0], [0], [1], [0, 0, 1, 1], [], []>} : vector<16x240xbf16>, vector<240x64xbf16>, vector<16x64xf32> -> vector<16x64xf32>
    %cst_12 = arith.constant 0.000000e+00 : f32
    %104 = vector.broadcast %cst_12 : f32 to vector<16x64xf32>
    %105 = arith.maximumf %103, %104 : vector<16x64xf32>
    %106 = arith.truncf %105 : vector<16x64xf32> to vector<16x64xbf16>
    %107 = vector.extract_strided_slice %106 {offsets = [0, 56], sizes = [16, 8], strides = [1, 1]} : vector<16x64xbf16> to vector<16x8xbf16>
    %108 = vector.extract_strided_slice %106 {offsets = [0, 0], sizes = [16, 8], strides = [1, 1]} : vector<16x64xbf16> to vector<16x8xbf16>
    %109 = tpu.concatenate %107, %106, %108 in 1 : vector<16x8xbf16>, vector<16x64xbf16>, vector<16x8xbf16> -> vector<16x80xbf16>
    %cst_13 = arith.constant 0.000000e+00 : bf16
    %110 = vector.broadcast %cst_13 : bf16 to vector<1x80xbf16>
    %111 = vector.extract_strided_slice %109 {offsets = [0, 0], sizes = [8, 80], strides = [1, 1]} : vector<16x80xbf16> to vector<8x80xbf16>
    %112 = tpu.concatenate %110, %111, %110 in 0 : vector<1x80xbf16>, vector<8x80xbf16>, vector<1x80xbf16> -> vector<10x80xbf16>
    %113 = vector.extract_strided_slice %109 {offsets = [8, 0], sizes = [8, 80], strides = [1, 1]} : vector<16x80xbf16> to vector<8x80xbf16>
    %114 = tpu.concatenate %110, %113, %110 in 0 : vector<1x80xbf16>, vector<8x80xbf16>, vector<1x80xbf16> -> vector<10x80xbf16>
    %115 = vector.extract_strided_slice %112 {offsets = [0, 0], sizes = [8, 80], strides = [1, 1]} : vector<10x80xbf16> to vector<8x80xbf16>
    %116 = vector.extract_strided_slice %112 {offsets = [1, 0], sizes = [8, 80], strides = [1, 1]} : vector<10x80xbf16> to vector<8x80xbf16>
    %117 = vector.extract_strided_slice %112 {offsets = [2, 0], sizes = [8, 80], strides = [1, 1]} : vector<10x80xbf16> to vector<8x80xbf16>
    %118 = tpu.concatenate %115, %116, %117 in 1 : vector<8x80xbf16>, vector<8x80xbf16>, vector<8x80xbf16> -> vector<8x240xbf16>
    %119 = vector.extract_strided_slice %114 {offsets = [0, 0], sizes = [8, 80], strides = [1, 1]} : vector<10x80xbf16> to vector<8x80xbf16>
    %120 = vector.extract_strided_slice %114 {offsets = [1, 0], sizes = [8, 80], strides = [1, 1]} : vector<10x80xbf16> to vector<8x80xbf16>
    %121 = vector.extract_strided_slice %114 {offsets = [2, 0], sizes = [8, 80], strides = [1, 1]} : vector<10x80xbf16> to vector<8x80xbf16>
    %122 = tpu.concatenate %119, %120, %121 in 1 : vector<8x80xbf16>, vector<8x80xbf16>, vector<8x80xbf16> -> vector<8x240xbf16>
    %123 = tpu.concatenate %118, %122 in 0 : vector<8x240xbf16>, vector<8x240xbf16> -> vector<16x240xbf16>
    %cst_14 = arith.constant dense<0.000000e+00> : vector<16x64xf32>
    %124 = tpu.matmul %123, %84, %cst_14 {dimension_numbers = #tpu.dot_dimension_numbers<[1], [0], [0], [1], [0, 0, 1, 1], [], []>} : vector<16x240xbf16>, vector<240x64xbf16>, vector<16x64xf32> -> vector<16x64xf32>
    %125 = arith.addf %124, %82 : vector<16x64xf32>
    %cst_15 = arith.constant 0.000000e+00 : f32
    %126 = vector.broadcast %cst_15 : f32 to vector<16x64xf32>
    %127 = arith.maximumf %125, %126 : vector<16x64xf32>
    %c0_16 = arith.constant 0 : index
    %c0_17 = arith.constant 0 : index
    %128 = vector.load %arg4[%c0_16, %c0_17] : memref<240x64xbf16, #tpu.memory_space<vmem>>, vector<240x64xbf16>
    %c0_18 = arith.constant 0 : index
    %c0_19 = arith.constant 0 : index
    %129 = vector.load %arg5[%c0_18, %c0_19] : memref<240x64xbf16, #tpu.memory_space<vmem>>, vector<240x64xbf16>
    %130 = arith.truncf %127 : vector<16x64xf32> to vector<16x64xbf16>
    %131 = vector.extract_strided_slice %130 {offsets = [0, 56], sizes = [16, 8], strides = [1, 1]} : vector<16x64xbf16> to vector<16x8xbf16>
    %132 = vector.extract_strided_slice %130 {offsets = [0, 0], sizes = [16, 8], strides = [1, 1]} : vector<16x64xbf16> to vector<16x8xbf16>
    %133 = tpu.concatenate %131, %130, %132 in 1 : vector<16x8xbf16>, vector<16x64xbf16>, vector<16x8xbf16> -> vector<16x80xbf16>
    %cst_20 = arith.constant 0.000000e+00 : bf16
    %134 = vector.broadcast %cst_20 : bf16 to vector<1x80xbf16>
    %135 = vector.extract_strided_slice %133 {offsets = [0, 0], sizes = [8, 80], strides = [1, 1]} : vector<16x80xbf16> to vector<8x80xbf16>
    %136 = tpu.concatenate %134, %135, %134 in 0 : vector<1x80xbf16>, vector<8x80xbf16>, vector<1x80xbf16> -> vector<10x80xbf16>
    %137 = vector.extract_strided_slice %133 {offsets = [8, 0], sizes = [8, 80], strides = [1, 1]} : vector<16x80xbf16> to vector<8x80xbf16>
    %138 = tpu.concatenate %134, %137, %134 in 0 : vector<1x80xbf16>, vector<8x80xbf16>, vector<1x80xbf16> -> vector<10x80xbf16>
    %139 = vector.extract_strided_slice %136 {offsets = [0, 0], sizes = [8, 80], strides = [1, 1]} : vector<10x80xbf16> to vector<8x80xbf16>
    %140 = vector.extract_strided_slice %136 {offsets = [1, 0], sizes = [8, 80], strides = [1, 1]} : vector<10x80xbf16> to vector<8x80xbf16>
    %141 = vector.extract_strided_slice %136 {offsets = [2, 0], sizes = [8, 80], strides = [1, 1]} : vector<10x80xbf16> to vector<8x80xbf16>
    %142 = tpu.concatenate %139, %140, %141 in 1 : vector<8x80xbf16>, vector<8x80xbf16>, vector<8x80xbf16> -> vector<8x240xbf16>
    %143 = vector.extract_strided_slice %138 {offsets = [0, 0], sizes = [8, 80], strides = [1, 1]} : vector<10x80xbf16> to vector<8x80xbf16>
    %144 = vector.extract_strided_slice %138 {offsets = [1, 0], sizes = [8, 80], strides = [1, 1]} : vector<10x80xbf16> to vector<8x80xbf16>
    %145 = vector.extract_strided_slice %138 {offsets = [2, 0], sizes = [8, 80], strides = [1, 1]} : vector<10x80xbf16> to vector<8x80xbf16>
    %146 = tpu.concatenate %143, %144, %145 in 1 : vector<8x80xbf16>, vector<8x80xbf16>, vector<8x80xbf16> -> vector<8x240xbf16>
    %147 = tpu.concatenate %142, %146 in 0 : vector<8x240xbf16>, vector<8x240xbf16> -> vector<16x240xbf16>
    %cst_21 = arith.constant dense<0.000000e+00> : vector<16x64xf32>
    %148 = tpu.matmul %147, %128, %cst_21 {dimension_numbers = #tpu.dot_dimension_numbers<[1], [0], [0], [1], [0, 0, 1, 1], [], []>} : vector<16x240xbf16>, vector<240x64xbf16>, vector<16x64xf32> -> vector<16x64xf32>
    %cst_22 = arith.constant 0.000000e+00 : f32
    %149 = vector.broadcast %cst_22 : f32 to vector<16x64xf32>
    %150 = arith.maximumf %148, %149 : vector<16x64xf32>
    %151 = arith.truncf %150 : vector<16x64xf32> to vector<16x64xbf16>
    %152 = vector.extract_strided_slice %151 {offsets = [0, 56], sizes = [16, 8], strides = [1, 1]} : vector<16x64xbf16> to vector<16x8xbf16>
    %153 = vector.extract_strided_slice %151 {offsets = [0, 0], sizes = [16, 8], strides = [1, 1]} : vector<16x64xbf16> to vector<16x8xbf16>
    %154 = tpu.concatenate %152, %151, %153 in 1 : vector<16x8xbf16>, vector<16x64xbf16>, vector<16x8xbf16> -> vector<16x80xbf16>
    %cst_23 = arith.constant 0.000000e+00 : bf16
    %155 = vector.broadcast %cst_23 : bf16 to vector<1x80xbf16>
    %156 = vector.extract_strided_slice %154 {offsets = [0, 0], sizes = [8, 80], strides = [1, 1]} : vector<16x80xbf16> to vector<8x80xbf16>
    %157 = tpu.concatenate %155, %156, %155 in 0 : vector<1x80xbf16>, vector<8x80xbf16>, vector<1x80xbf16> -> vector<10x80xbf16>
    %158 = vector.extract_strided_slice %154 {offsets = [8, 0], sizes = [8, 80], strides = [1, 1]} : vector<16x80xbf16> to vector<8x80xbf16>
    %159 = tpu.concatenate %155, %158, %155 in 0 : vector<1x80xbf16>, vector<8x80xbf16>, vector<1x80xbf16> -> vector<10x80xbf16>
    %160 = vector.extract_strided_slice %157 {offsets = [0, 0], sizes = [8, 80], strides = [1, 1]} : vector<10x80xbf16> to vector<8x80xbf16>
    %161 = vector.extract_strided_slice %157 {offsets = [1, 0], sizes = [8, 80], strides = [1, 1]} : vector<10x80xbf16> to vector<8x80xbf16>
    %162 = vector.extract_strided_slice %157 {offsets = [2, 0], sizes = [8, 80], strides = [1, 1]} : vector<10x80xbf16> to vector<8x80xbf16>
    %163 = tpu.concatenate %160, %161, %162 in 1 : vector<8x80xbf16>, vector<8x80xbf16>, vector<8x80xbf16> -> vector<8x240xbf16>
    %164 = vector.extract_strided_slice %159 {offsets = [0, 0], sizes = [8, 80], strides = [1, 1]} : vector<10x80xbf16> to vector<8x80xbf16>
    %165 = vector.extract_strided_slice %159 {offsets = [1, 0], sizes = [8, 80], strides = [1, 1]} : vector<10x80xbf16> to vector<8x80xbf16>
    %166 = vector.extract_strided_slice %159 {offsets = [2, 0], sizes = [8, 80], strides = [1, 1]} : vector<10x80xbf16> to vector<8x80xbf16>
    %167 = tpu.concatenate %164, %165, %166 in 1 : vector<8x80xbf16>, vector<8x80xbf16>, vector<8x80xbf16> -> vector<8x240xbf16>
    %168 = tpu.concatenate %163, %167 in 0 : vector<8x240xbf16>, vector<8x240xbf16> -> vector<16x240xbf16>
    %cst_24 = arith.constant dense<0.000000e+00> : vector<16x64xf32>
    %169 = tpu.matmul %168, %129, %cst_24 {dimension_numbers = #tpu.dot_dimension_numbers<[1], [0], [0], [1], [0, 0, 1, 1], [], []>} : vector<16x240xbf16>, vector<240x64xbf16>, vector<16x64xf32> -> vector<16x64xf32>
    %170 = arith.addf %169, %127 : vector<16x64xf32>
    %cst_25 = arith.constant 0.000000e+00 : f32
    %171 = vector.broadcast %cst_25 : f32 to vector<16x64xf32>
    %172 = arith.maximumf %170, %171 : vector<16x64xf32>
    %c0_26 = arith.constant 0 : index
    %c0_27 = arith.constant 0 : index
    %173 = vector.load %arg6[%c0_26, %c0_27] : memref<240x64xbf16, #tpu.memory_space<vmem>>, vector<240x64xbf16>
    %c0_28 = arith.constant 0 : index
    %c0_29 = arith.constant 0 : index
    %174 = vector.load %arg7[%c0_28, %c0_29] : memref<288x64xbf16, #tpu.memory_space<vmem>>, vector<288x64xbf16>
    %c0_30 = arith.constant 0 : index
    %c0_31 = arith.constant 0 : index
    %175 = vector.load %arg8[%c0_30, %c0_31] : memref<64x64xbf16, #tpu.memory_space<vmem>>, vector<64x64xbf16>
    %176 = arith.truncf %172 : vector<16x64xf32> to vector<16x64xbf16>
    %177 = vector.extract_strided_slice %176 {offsets = [0, 56], sizes = [16, 8], strides = [1, 1]} : vector<16x64xbf16> to vector<16x8xbf16>
    %178 = vector.extract_strided_slice %176 {offsets = [0, 0], sizes = [16, 8], strides = [1, 1]} : vector<16x64xbf16> to vector<16x8xbf16>
    %179 = tpu.concatenate %177, %176, %178 in 1 : vector<16x8xbf16>, vector<16x64xbf16>, vector<16x8xbf16> -> vector<16x80xbf16>
    %cst_32 = arith.constant 0.000000e+00 : bf16
    %180 = vector.broadcast %cst_32 : bf16 to vector<1x80xbf16>
    %181 = vector.extract_strided_slice %179 {offsets = [0, 0], sizes = [8, 80], strides = [1, 1]} : vector<16x80xbf16> to vector<8x80xbf16>
    %182 = tpu.concatenate %180, %181, %180 in 0 : vector<1x80xbf16>, vector<8x80xbf16>, vector<1x80xbf16> -> vector<10x80xbf16>
    %183 = vector.extract_strided_slice %179 {offsets = [8, 0], sizes = [8, 80], strides = [1, 1]} : vector<16x80xbf16> to vector<8x80xbf16>
    %184 = tpu.concatenate %180, %183, %180 in 0 : vector<1x80xbf16>, vector<8x80xbf16>, vector<1x80xbf16> -> vector<10x80xbf16>
    %185 = vector.extract_strided_slice %182 {offsets = [0, 0], sizes = [8, 80], strides = [1, 1]} : vector<10x80xbf16> to vector<8x80xbf16>
    %186 = vector.extract_strided_slice %182 {offsets = [1, 0], sizes = [8, 80], strides = [1, 1]} : vector<10x80xbf16> to vector<8x80xbf16>
    %187 = vector.extract_strided_slice %182 {offsets = [2, 0], sizes = [8, 80], strides = [1, 1]} : vector<10x80xbf16> to vector<8x80xbf16>
    %188 = tpu.concatenate %185, %186, %187 in 1 : vector<8x80xbf16>, vector<8x80xbf16>, vector<8x80xbf16> -> vector<8x240xbf16>
    %189 = vector.extract_strided_slice %184 {offsets = [0, 0], sizes = [8, 80], strides = [1, 1]} : vector<10x80xbf16> to vector<8x80xbf16>
    %190 = vector.extract_strided_slice %184 {offsets = [1, 0], sizes = [8, 80], strides = [1, 1]} : vector<10x80xbf16> to vector<8x80xbf16>
    %191 = vector.extract_strided_slice %184 {offsets = [2, 0], sizes = [8, 80], strides = [1, 1]} : vector<10x80xbf16> to vector<8x80xbf16>
    %192 = tpu.concatenate %189, %190, %191 in 1 : vector<8x80xbf16>, vector<8x80xbf16>, vector<8x80xbf16> -> vector<8x240xbf16>
    %193 = tpu.concatenate %188, %192 in 0 : vector<8x240xbf16>, vector<8x240xbf16> -> vector<16x240xbf16>
    %cst_33 = arith.constant dense<0.000000e+00> : vector<16x64xf32>
    %194 = tpu.matmul %193, %173, %cst_33 {dimension_numbers = #tpu.dot_dimension_numbers<[1], [0], [0], [1], [0, 0, 1, 1], [], []>} : vector<16x240xbf16>, vector<240x64xbf16>, vector<16x64xf32> -> vector<16x64xf32>
    %cst_34 = arith.constant 0.000000e+00 : f32
    %195 = vector.broadcast %cst_34 : f32 to vector<16x64xf32>
    %196 = arith.maximumf %194, %195 : vector<16x64xf32>
    %197 = arith.truncf %196 : vector<16x64xf32> to vector<16x64xbf16>
    %198 = vector.extract_strided_slice %197 {offsets = [0, 48], sizes = [16, 16], strides = [1, 1]} : vector<16x64xbf16> to vector<16x16xbf16>
    %199 = vector.extract_strided_slice %197 {offsets = [0, 0], sizes = [16, 16], strides = [1, 1]} : vector<16x64xbf16> to vector<16x16xbf16>
    %200 = tpu.concatenate %198, %197, %199 in 1 : vector<16x16xbf16>, vector<16x64xbf16>, vector<16x16xbf16> -> vector<16x96xbf16>
    %cst_35 = arith.constant 0.000000e+00 : bf16
    %201 = vector.broadcast %cst_35 : bf16 to vector<1x96xbf16>
    %202 = vector.extract_strided_slice %200 {offsets = [0, 0], sizes = [8, 96], strides = [1, 1]} : vector<16x96xbf16> to vector<8x96xbf16>
    %203 = tpu.concatenate %201, %202, %201 in 0 : vector<1x96xbf16>, vector<8x96xbf16>, vector<1x96xbf16> -> vector<10x96xbf16>
    %204 = vector.extract_strided_slice %200 {offsets = [8, 0], sizes = [8, 96], strides = [1, 1]} : vector<16x96xbf16> to vector<8x96xbf16>
    %205 = tpu.concatenate %201, %204, %201 in 0 : vector<1x96xbf16>, vector<8x96xbf16>, vector<1x96xbf16> -> vector<10x96xbf16>
    %206 = vector.extract_strided_slice %203 {offsets = [0, 0], sizes = [8, 96], strides = [1, 1]} : vector<10x96xbf16> to vector<8x96xbf16>
    %207 = vector.extract_strided_slice %203 {offsets = [1, 0], sizes = [8, 96], strides = [1, 1]} : vector<10x96xbf16> to vector<8x96xbf16>
    %208 = vector.extract_strided_slice %203 {offsets = [2, 0], sizes = [8, 96], strides = [1, 1]} : vector<10x96xbf16> to vector<8x96xbf16>
    %209 = tpu.concatenate %206, %207, %208 in 1 : vector<8x96xbf16>, vector<8x96xbf16>, vector<8x96xbf16> -> vector<8x288xbf16>
    %210 = vector.extract_strided_slice %205 {offsets = [0, 0], sizes = [8, 96], strides = [1, 1]} : vector<10x96xbf16> to vector<8x96xbf16>
    %211 = vector.extract_strided_slice %205 {offsets = [1, 0], sizes = [8, 96], strides = [1, 1]} : vector<10x96xbf16> to vector<8x96xbf16>
    %212 = vector.extract_strided_slice %205 {offsets = [2, 0], sizes = [8, 96], strides = [1, 1]} : vector<10x96xbf16> to vector<8x96xbf16>
    %213 = tpu.concatenate %210, %211, %212 in 1 : vector<8x96xbf16>, vector<8x96xbf16>, vector<8x96xbf16> -> vector<8x288xbf16>
    %214 = tpu.concatenate %209, %213 in 0 : vector<8x288xbf16>, vector<8x288xbf16> -> vector<16x288xbf16>
    %cst_36 = arith.constant dense<0.000000e+00> : vector<16x64xf32>
    %215 = tpu.matmul %214, %174, %cst_36 {dimension_numbers = #tpu.dot_dimension_numbers<[1], [0], [0], [1], [0, 0, 1, 1], [], []>} : vector<16x288xbf16>, vector<288x64xbf16>, vector<16x64xf32> -> vector<16x64xf32>
    %216 = arith.truncf %172 : vector<16x64xf32> to vector<16x64xbf16>
    %cst_37 = arith.constant dense<0.000000e+00> : vector<16x64xf32>
    %217 = tpu.matmul %216, %175, %cst_37 {dimension_numbers = #tpu.dot_dimension_numbers<[1], [0], [0], [1], [0, 0, 1, 1], [], []>} : vector<16x64xbf16>, vector<64x64xbf16>, vector<16x64xf32> -> vector<16x64xf32>
    %218 = arith.addf %215, %217 : vector<16x64xf32>
    %cst_38 = arith.constant 0.000000e+00 : f32
    %219 = vector.broadcast %cst_38 : f32 to vector<16x64xf32>
    %220 = arith.maximumf %218, %219 : vector<16x64xf32>
    %c0_39 = arith.constant 0 : index
    %c0_40 = arith.constant 0 : index
    %221 = vector.load %arg9[%c0_39, %c0_40] : memref<288x64xbf16, #tpu.memory_space<vmem>>, vector<288x64xbf16>
    %c0_41 = arith.constant 0 : index
    %c0_42 = arith.constant 0 : index
    %222 = vector.load %arg10[%c0_41, %c0_42] : memref<288x64xbf16, #tpu.memory_space<vmem>>, vector<288x64xbf16>
    %223 = arith.truncf %220 : vector<16x64xf32> to vector<16x64xbf16>
    %224 = vector.extract_strided_slice %223 {offsets = [0, 48], sizes = [16, 16], strides = [1, 1]} : vector<16x64xbf16> to vector<16x16xbf16>
    %225 = vector.extract_strided_slice %223 {offsets = [0, 0], sizes = [16, 16], strides = [1, 1]} : vector<16x64xbf16> to vector<16x16xbf16>
    %226 = tpu.concatenate %224, %223, %225 in 1 : vector<16x16xbf16>, vector<16x64xbf16>, vector<16x16xbf16> -> vector<16x96xbf16>
    %cst_43 = arith.constant 0.000000e+00 : bf16
    %227 = vector.broadcast %cst_43 : bf16 to vector<1x96xbf16>
    %228 = vector.extract_strided_slice %226 {offsets = [0, 0], sizes = [8, 96], strides = [1, 1]} : vector<16x96xbf16> to vector<8x96xbf16>
    %229 = tpu.concatenate %227, %228, %227 in 0 : vector<1x96xbf16>, vector<8x96xbf16>, vector<1x96xbf16> -> vector<10x96xbf16>
    %230 = vector.extract_strided_slice %226 {offsets = [8, 0], sizes = [8, 96], strides = [1, 1]} : vector<16x96xbf16> to vector<8x96xbf16>
    %231 = tpu.concatenate %227, %230, %227 in 0 : vector<1x96xbf16>, vector<8x96xbf16>, vector<1x96xbf16> -> vector<10x96xbf16>
    %232 = vector.extract_strided_slice %229 {offsets = [0, 0], sizes = [8, 96], strides = [1, 1]} : vector<10x96xbf16> to vector<8x96xbf16>
    %233 = vector.extract_strided_slice %229 {offsets = [1, 0], sizes = [8, 96], strides = [1, 1]} : vector<10x96xbf16> to vector<8x96xbf16>
    %234 = vector.extract_strided_slice %229 {offsets = [2, 0], sizes = [8, 96], strides = [1, 1]} : vector<10x96xbf16> to vector<8x96xbf16>
    %235 = tpu.concatenate %232, %233, %234 in 1 : vector<8x96xbf16>, vector<8x96xbf16>, vector<8x96xbf16> -> vector<8x288xbf16>
    %236 = vector.extract_strided_slice %231 {offsets = [0, 0], sizes = [8, 96], strides = [1, 1]} : vector<10x96xbf16> to vector<8x96xbf16>
    %237 = vector.extract_strided_slice %231 {offsets = [1, 0], sizes = [8, 96], strides = [1, 1]} : vector<10x96xbf16> to vector<8x96xbf16>
    %238 = vector.extract_strided_slice %231 {offsets = [2, 0], sizes = [8, 96], strides = [1, 1]} : vector<10x96xbf16> to vector<8x96xbf16>
    %239 = tpu.concatenate %236, %237, %238 in 1 : vector<8x96xbf16>, vector<8x96xbf16>, vector<8x96xbf16> -> vector<8x288xbf16>
    %240 = tpu.concatenate %235, %239 in 0 : vector<8x288xbf16>, vector<8x288xbf16> -> vector<16x288xbf16>
    %cst_44 = arith.constant dense<0.000000e+00> : vector<16x64xf32>
    %241 = tpu.matmul %240, %221, %cst_44 {dimension_numbers = #tpu.dot_dimension_numbers<[1], [0], [0], [1], [0, 0, 1, 1], [], []>} : vector<16x288xbf16>, vector<288x64xbf16>, vector<16x64xf32> -> vector<16x64xf32>
    %cst_45 = arith.constant 0.000000e+00 : f32
    %242 = vector.broadcast %cst_45 : f32 to vector<16x64xf32>
    %243 = arith.maximumf %241, %242 : vector<16x64xf32>
    %244 = arith.truncf %243 : vector<16x64xf32> to vector<16x64xbf16>
    %245 = vector.extract_strided_slice %244 {offsets = [0, 48], sizes = [16, 16], strides = [1, 1]} : vector<16x64xbf16> to vector<16x16xbf16>
    %246 = vector.extract_strided_slice %244 {offsets = [0, 0], sizes = [16, 16], strides = [1, 1]} : vector<16x64xbf16> to vector<16x16xbf16>
    %247 = tpu.concatenate %245, %244, %246 in 1 : vector<16x16xbf16>, vector<16x64xbf16>, vector<16x16xbf16> -> vector<16x96xbf16>
    %cst_46 = arith.constant 0.000000e+00 : bf16
    %248 = vector.broadcast %cst_46 : bf16 to vector<1x96xbf16>
    %249 = vector.extract_strided_slice %247 {offsets = [0, 0], sizes = [8, 96], strides = [1, 1]} : vector<16x96xbf16> to vector<8x96xbf16>
    %250 = tpu.concatenate %248, %249, %248 in 0 : vector<1x96xbf16>, vector<8x96xbf16>, vector<1x96xbf16> -> vector<10x96xbf16>
    %251 = vector.extract_strided_slice %247 {offsets = [8, 0], sizes = [8, 96], strides = [1, 1]} : vector<16x96xbf16> to vector<8x96xbf16>
    %252 = tpu.concatenate %248, %251, %248 in 0 : vector<1x96xbf16>, vector<8x96xbf16>, vector<1x96xbf16> -> vector<10x96xbf16>
    %253 = vector.extract_strided_slice %250 {offsets = [0, 0], sizes = [8, 96], strides = [1, 1]} : vector<10x96xbf16> to vector<8x96xbf16>
    %254 = vector.extract_strided_slice %250 {offsets = [1, 0], sizes = [8, 96], strides = [1, 1]} : vector<10x96xbf16> to vector<8x96xbf16>
    %255 = vector.extract_strided_slice %250 {offsets = [2, 0], sizes = [8, 96], strides = [1, 1]} : vector<10x96xbf16> to vector<8x96xbf16>
    %256 = tpu.concatenate %253, %254, %255 in 1 : vector<8x96xbf16>, vector<8x96xbf16>, vector<8x96xbf16> -> vector<8x288xbf16>
    %257 = vector.extract_strided_slice %252 {offsets = [0, 0], sizes = [8, 96], strides = [1, 1]} : vector<10x96xbf16> to vector<8x96xbf16>
    %258 = vector.extract_strided_slice %252 {offsets = [1, 0], sizes = [8, 96], strides = [1, 1]} : vector<10x96xbf16> to vector<8x96xbf16>
    %259 = vector.extract_strided_slice %252 {offsets = [2, 0], sizes = [8, 96], strides = [1, 1]} : vector<10x96xbf16> to vector<8x96xbf16>
    %260 = tpu.concatenate %257, %258, %259 in 1 : vector<8x96xbf16>, vector<8x96xbf16>, vector<8x96xbf16> -> vector<8x288xbf16>
    %261 = tpu.concatenate %256, %260 in 0 : vector<8x288xbf16>, vector<8x288xbf16> -> vector<16x288xbf16>
    %cst_47 = arith.constant dense<0.000000e+00> : vector<16x64xf32>
    %262 = tpu.matmul %261, %222, %cst_47 {dimension_numbers = #tpu.dot_dimension_numbers<[1], [0], [0], [1], [0, 0, 1, 1], [], []>} : vector<16x288xbf16>, vector<288x64xbf16>, vector<16x64xf32> -> vector<16x64xf32>
    %263 = arith.addf %262, %220 : vector<16x64xf32>
    %cst_48 = arith.constant 0.000000e+00 : f32
    %264 = vector.broadcast %cst_48 : f32 to vector<16x64xf32>
    %265 = arith.maximumf %263, %264 : vector<16x64xf32>
    %c0_49 = arith.constant 0 : index
    %c0_50 = arith.constant 0 : index
    %266 = vector.load %arg11[%c0_49, %c0_50] : memref<288x64xbf16, #tpu.memory_space<vmem>>, vector<288x64xbf16>
    %c0_51 = arith.constant 0 : index
    %c0_52 = arith.constant 0 : index
    %267 = vector.load %arg12[%c0_51, %c0_52] : memref<384x64xbf16, #tpu.memory_space<vmem>>, vector<384x64xbf16>
    %c0_53 = arith.constant 0 : index
    %c0_54 = arith.constant 0 : index
    %268 = vector.load %arg13[%c0_53, %c0_54] : memref<64x64xbf16, #tpu.memory_space<vmem>>, vector<64x64xbf16>
    %269 = arith.truncf %265 : vector<16x64xf32> to vector<16x64xbf16>
    %270 = vector.extract_strided_slice %269 {offsets = [0, 48], sizes = [16, 16], strides = [1, 1]} : vector<16x64xbf16> to vector<16x16xbf16>
    %271 = vector.extract_strided_slice %269 {offsets = [0, 0], sizes = [16, 16], strides = [1, 1]} : vector<16x64xbf16> to vector<16x16xbf16>
    %272 = tpu.concatenate %270, %269, %271 in 1 : vector<16x16xbf16>, vector<16x64xbf16>, vector<16x16xbf16> -> vector<16x96xbf16>
    %cst_55 = arith.constant 0.000000e+00 : bf16
    %273 = vector.broadcast %cst_55 : bf16 to vector<1x96xbf16>
    %274 = vector.extract_strided_slice %272 {offsets = [0, 0], sizes = [8, 96], strides = [1, 1]} : vector<16x96xbf16> to vector<8x96xbf16>
    %275 = tpu.concatenate %273, %274, %273 in 0 : vector<1x96xbf16>, vector<8x96xbf16>, vector<1x96xbf16> -> vector<10x96xbf16>
    %276 = vector.extract_strided_slice %272 {offsets = [8, 0], sizes = [8, 96], strides = [1, 1]} : vector<16x96xbf16> to vector<8x96xbf16>
    %277 = tpu.concatenate %273, %276, %273 in 0 : vector<1x96xbf16>, vector<8x96xbf16>, vector<1x96xbf16> -> vector<10x96xbf16>
    %278 = vector.extract_strided_slice %275 {offsets = [0, 0], sizes = [8, 96], strides = [1, 1]} : vector<10x96xbf16> to vector<8x96xbf16>
    %279 = vector.extract_strided_slice %275 {offsets = [1, 0], sizes = [8, 96], strides = [1, 1]} : vector<10x96xbf16> to vector<8x96xbf16>
    %280 = vector.extract_strided_slice %275 {offsets = [2, 0], sizes = [8, 96], strides = [1, 1]} : vector<10x96xbf16> to vector<8x96xbf16>
    %281 = tpu.concatenate %278, %279, %280 in 1 : vector<8x96xbf16>, vector<8x96xbf16>, vector<8x96xbf16> -> vector<8x288xbf16>
    %282 = vector.extract_strided_slice %277 {offsets = [0, 0], sizes = [8, 96], strides = [1, 1]} : vector<10x96xbf16> to vector<8x96xbf16>
    %283 = vector.extract_strided_slice %277 {offsets = [1, 0], sizes = [8, 96], strides = [1, 1]} : vector<10x96xbf16> to vector<8x96xbf16>
    %284 = vector.extract_strided_slice %277 {offsets = [2, 0], sizes = [8, 96], strides = [1, 1]} : vector<10x96xbf16> to vector<8x96xbf16>
    %285 = tpu.concatenate %282, %283, %284 in 1 : vector<8x96xbf16>, vector<8x96xbf16>, vector<8x96xbf16> -> vector<8x288xbf16>
    %286 = tpu.concatenate %281, %285 in 0 : vector<8x288xbf16>, vector<8x288xbf16> -> vector<16x288xbf16>
    %cst_56 = arith.constant dense<0.000000e+00> : vector<16x64xf32>
    %287 = tpu.matmul %286, %266, %cst_56 {dimension_numbers = #tpu.dot_dimension_numbers<[1], [0], [0], [1], [0, 0, 1, 1], [], []>} : vector<16x288xbf16>, vector<288x64xbf16>, vector<16x64xf32> -> vector<16x64xf32>
    %cst_57 = arith.constant 0.000000e+00 : f32
    %288 = vector.broadcast %cst_57 : f32 to vector<16x64xf32>
    %289 = arith.maximumf %287, %288 : vector<16x64xf32>
    %290 = arith.truncf %289 : vector<16x64xf32> to vector<16x64xbf16>
    %291 = vector.extract_strided_slice %290 {offsets = [0, 32], sizes = [16, 32], strides = [1, 1]} : vector<16x64xbf16> to vector<16x32xbf16>
    %292 = vector.extract_strided_slice %290 {offsets = [0, 0], sizes = [16, 32], strides = [1, 1]} : vector<16x64xbf16> to vector<16x32xbf16>
    %293 = tpu.concatenate %291, %290, %292 in 1 : vector<16x32xbf16>, vector<16x64xbf16>, vector<16x32xbf16> -> vector<16x128xbf16>
    %cst_58 = arith.constant 0.000000e+00 : bf16
    %294 = vector.broadcast %cst_58 : bf16 to vector<1x128xbf16>
    %295 = vector.extract_strided_slice %293 {offsets = [0, 0], sizes = [8, 128], strides = [1, 1]} : vector<16x128xbf16> to vector<8x128xbf16>
    %296 = tpu.concatenate %294, %295, %294 in 0 : vector<1x128xbf16>, vector<8x128xbf16>, vector<1x128xbf16> -> vector<10x128xbf16>
    %297 = vector.extract_strided_slice %293 {offsets = [8, 0], sizes = [8, 128], strides = [1, 1]} : vector<16x128xbf16> to vector<8x128xbf16>
    %298 = tpu.concatenate %294, %297, %294 in 0 : vector<1x128xbf16>, vector<8x128xbf16>, vector<1x128xbf16> -> vector<10x128xbf16>
    %299 = vector.extract_strided_slice %296 {offsets = [0, 0], sizes = [8, 128], strides = [1, 1]} : vector<10x128xbf16> to vector<8x128xbf16>
    %300 = vector.extract_strided_slice %296 {offsets = [1, 0], sizes = [8, 128], strides = [1, 1]} : vector<10x128xbf16> to vector<8x128xbf16>
    %301 = vector.extract_strided_slice %296 {offsets = [2, 0], sizes = [8, 128], strides = [1, 1]} : vector<10x128xbf16> to vector<8x128xbf16>
    %302 = tpu.concatenate %299, %300, %301 in 1 : vector<8x128xbf16>, vector<8x128xbf16>, vector<8x128xbf16> -> vector<8x384xbf16>
    %303 = vector.extract_strided_slice %298 {offsets = [0, 0], sizes = [8, 128], strides = [1, 1]} : vector<10x128xbf16> to vector<8x128xbf16>
    %304 = vector.extract_strided_slice %298 {offsets = [1, 0], sizes = [8, 128], strides = [1, 1]} : vector<10x128xbf16> to vector<8x128xbf16>
    %305 = vector.extract_strided_slice %298 {offsets = [2, 0], sizes = [8, 128], strides = [1, 1]} : vector<10x128xbf16> to vector<8x128xbf16>
    %306 = tpu.concatenate %303, %304, %305 in 1 : vector<8x128xbf16>, vector<8x128xbf16>, vector<8x128xbf16> -> vector<8x384xbf16>
    %307 = tpu.concatenate %302, %306 in 0 : vector<8x384xbf16>, vector<8x384xbf16> -> vector<16x384xbf16>
    %cst_59 = arith.constant dense<0.000000e+00> : vector<16x64xf32>
    %308 = tpu.matmul %307, %267, %cst_59 {dimension_numbers = #tpu.dot_dimension_numbers<[1], [0], [0], [1], [0, 0, 1, 1], [], []>} : vector<16x384xbf16>, vector<384x64xbf16>, vector<16x64xf32> -> vector<16x64xf32>
    %309 = arith.truncf %265 : vector<16x64xf32> to vector<16x64xbf16>
    %cst_60 = arith.constant dense<0.000000e+00> : vector<16x64xf32>
    %310 = tpu.matmul %309, %268, %cst_60 {dimension_numbers = #tpu.dot_dimension_numbers<[1], [0], [0], [1], [0, 0, 1, 1], [], []>} : vector<16x64xbf16>, vector<64x64xbf16>, vector<16x64xf32> -> vector<16x64xf32>
    %311 = arith.addf %308, %310 : vector<16x64xf32>
    %cst_61 = arith.constant 0.000000e+00 : f32
    %312 = vector.broadcast %cst_61 : f32 to vector<16x64xf32>
    %313 = arith.maximumf %311, %312 : vector<16x64xf32>
    %c0_62 = arith.constant 0 : index
    %c0_63 = arith.constant 0 : index
    %314 = vector.load %arg14[%c0_62, %c0_63] : memref<384x64xbf16, #tpu.memory_space<vmem>>, vector<384x64xbf16>
    %c0_64 = arith.constant 0 : index
    %c0_65 = arith.constant 0 : index
    %315 = vector.load %arg15[%c0_64, %c0_65] : memref<384x64xbf16, #tpu.memory_space<vmem>>, vector<384x64xbf16>
    %316 = arith.truncf %313 : vector<16x64xf32> to vector<16x64xbf16>
    %317 = vector.extract_strided_slice %316 {offsets = [0, 32], sizes = [16, 32], strides = [1, 1]} : vector<16x64xbf16> to vector<16x32xbf16>
    %318 = vector.extract_strided_slice %316 {offsets = [0, 0], sizes = [16, 32], strides = [1, 1]} : vector<16x64xbf16> to vector<16x32xbf16>
    %319 = tpu.concatenate %317, %316, %318 in 1 : vector<16x32xbf16>, vector<16x64xbf16>, vector<16x32xbf16> -> vector<16x128xbf16>
    %cst_66 = arith.constant 0.000000e+00 : bf16
    %320 = vector.broadcast %cst_66 : bf16 to vector<1x128xbf16>
    %321 = vector.extract_strided_slice %319 {offsets = [0, 0], sizes = [8, 128], strides = [1, 1]} : vector<16x128xbf16> to vector<8x128xbf16>
    %322 = tpu.concatenate %320, %321, %320 in 0 : vector<1x128xbf16>, vector<8x128xbf16>, vector<1x128xbf16> -> vector<10x128xbf16>
    %323 = vector.extract_strided_slice %319 {offsets = [8, 0], sizes = [8, 128], strides = [1, 1]} : vector<16x128xbf16> to vector<8x128xbf16>
    %324 = tpu.concatenate %320, %323, %320 in 0 : vector<1x128xbf16>, vector<8x128xbf16>, vector<1x128xbf16> -> vector<10x128xbf16>
    %325 = vector.extract_strided_slice %322 {offsets = [0, 0], sizes = [8, 128], strides = [1, 1]} : vector<10x128xbf16> to vector<8x128xbf16>
    %326 = vector.extract_strided_slice %322 {offsets = [1, 0], sizes = [8, 128], strides = [1, 1]} : vector<10x128xbf16> to vector<8x128xbf16>
    %327 = vector.extract_strided_slice %322 {offsets = [2, 0], sizes = [8, 128], strides = [1, 1]} : vector<10x128xbf16> to vector<8x128xbf16>
    %328 = tpu.concatenate %325, %326, %327 in 1 : vector<8x128xbf16>, vector<8x128xbf16>, vector<8x128xbf16> -> vector<8x384xbf16>
    %329 = vector.extract_strided_slice %324 {offsets = [0, 0], sizes = [8, 128], strides = [1, 1]} : vector<10x128xbf16> to vector<8x128xbf16>
    %330 = vector.extract_strided_slice %324 {offsets = [1, 0], sizes = [8, 128], strides = [1, 1]} : vector<10x128xbf16> to vector<8x128xbf16>
    %331 = vector.extract_strided_slice %324 {offsets = [2, 0], sizes = [8, 128], strides = [1, 1]} : vector<10x128xbf16> to vector<8x128xbf16>
    %332 = tpu.concatenate %329, %330, %331 in 1 : vector<8x128xbf16>, vector<8x128xbf16>, vector<8x128xbf16> -> vector<8x384xbf16>
    %333 = tpu.concatenate %328, %332 in 0 : vector<8x384xbf16>, vector<8x384xbf16> -> vector<16x384xbf16>
    %cst_67 = arith.constant dense<0.000000e+00> : vector<16x64xf32>
    %334 = tpu.matmul %333, %314, %cst_67 {dimension_numbers = #tpu.dot_dimension_numbers<[1], [0], [0], [1], [0, 0, 1, 1], [], []>} : vector<16x384xbf16>, vector<384x64xbf16>, vector<16x64xf32> -> vector<16x64xf32>
    %cst_68 = arith.constant 0.000000e+00 : f32
    %335 = vector.broadcast %cst_68 : f32 to vector<16x64xf32>
    %336 = arith.maximumf %334, %335 : vector<16x64xf32>
    %337 = arith.truncf %336 : vector<16x64xf32> to vector<16x64xbf16>
    %338 = vector.extract_strided_slice %337 {offsets = [0, 32], sizes = [16, 32], strides = [1, 1]} : vector<16x64xbf16> to vector<16x32xbf16>
    %339 = vector.extract_strided_slice %337 {offsets = [0, 0], sizes = [16, 32], strides = [1, 1]} : vector<16x64xbf16> to vector<16x32xbf16>
    %340 = tpu.concatenate %338, %337, %339 in 1 : vector<16x32xbf16>, vector<16x64xbf16>, vector<16x32xbf16> -> vector<16x128xbf16>
    %cst_69 = arith.constant 0.000000e+00 : bf16
    %341 = vector.broadcast %cst_69 : bf16 to vector<1x128xbf16>
    %342 = vector.extract_strided_slice %340 {offsets = [0, 0], sizes = [8, 128], strides = [1, 1]} : vector<16x128xbf16> to vector<8x128xbf16>
    %343 = tpu.concatenate %341, %342, %341 in 0 : vector<1x128xbf16>, vector<8x128xbf16>, vector<1x128xbf16> -> vector<10x128xbf16>
    %344 = vector.extract_strided_slice %340 {offsets = [8, 0], sizes = [8, 128], strides = [1, 1]} : vector<16x128xbf16> to vector<8x128xbf16>
    %345 = tpu.concatenate %341, %344, %341 in 0 : vector<1x128xbf16>, vector<8x128xbf16>, vector<1x128xbf16> -> vector<10x128xbf16>
    %346 = vector.extract_strided_slice %343 {offsets = [0, 0], sizes = [8, 128], strides = [1, 1]} : vector<10x128xbf16> to vector<8x128xbf16>
    %347 = vector.extract_strided_slice %343 {offsets = [1, 0], sizes = [8, 128], strides = [1, 1]} : vector<10x128xbf16> to vector<8x128xbf16>
    %348 = vector.extract_strided_slice %343 {offsets = [2, 0], sizes = [8, 128], strides = [1, 1]} : vector<10x128xbf16> to vector<8x128xbf16>
    %349 = tpu.concatenate %346, %347, %348 in 1 : vector<8x128xbf16>, vector<8x128xbf16>, vector<8x128xbf16> -> vector<8x384xbf16>
    %350 = vector.extract_strided_slice %345 {offsets = [0, 0], sizes = [8, 128], strides = [1, 1]} : vector<10x128xbf16> to vector<8x128xbf16>
    %351 = vector.extract_strided_slice %345 {offsets = [1, 0], sizes = [8, 128], strides = [1, 1]} : vector<10x128xbf16> to vector<8x128xbf16>
    %352 = vector.extract_strided_slice %345 {offsets = [2, 0], sizes = [8, 128], strides = [1, 1]} : vector<10x128xbf16> to vector<8x128xbf16>
    %353 = tpu.concatenate %350, %351, %352 in 1 : vector<8x128xbf16>, vector<8x128xbf16>, vector<8x128xbf16> -> vector<8x384xbf16>
    %354 = tpu.concatenate %349, %353 in 0 : vector<8x384xbf16>, vector<8x384xbf16> -> vector<16x384xbf16>
    %cst_70 = arith.constant dense<0.000000e+00> : vector<16x64xf32>
    %355 = tpu.matmul %354, %315, %cst_70 {dimension_numbers = #tpu.dot_dimension_numbers<[1], [0], [0], [1], [0, 0, 1, 1], [], []>} : vector<16x384xbf16>, vector<384x64xbf16>, vector<16x64xf32> -> vector<16x64xf32>
    %356 = arith.addf %355, %313 : vector<16x64xf32>
    %cst_71 = arith.constant 0.000000e+00 : f32
    %357 = vector.broadcast %cst_71 : f32 to vector<16x64xf32>
    %358 = arith.maximumf %356, %357 : vector<16x64xf32>
    %c0_72 = arith.constant 0 : index
    %c0_73 = arith.constant 0 : index
    %359 = vector.load %arg16[%c0_72, %c0_73] : memref<384x64xbf16, #tpu.memory_space<vmem>>, vector<384x64xbf16>
    %c0_74 = arith.constant 0 : index
    %c0_75 = arith.constant 0 : index
    %360 = vector.load %arg17[%c0_74, %c0_75] : memref<576x64xbf16, #tpu.memory_space<vmem>>, vector<576x64xbf16>
    %c0_76 = arith.constant 0 : index
    %c0_77 = arith.constant 0 : index
    %361 = vector.load %arg18[%c0_76, %c0_77] : memref<64x64xbf16, #tpu.memory_space<vmem>>, vector<64x64xbf16>
    %362 = arith.truncf %358 : vector<16x64xf32> to vector<16x64xbf16>
    %363 = vector.extract_strided_slice %362 {offsets = [0, 32], sizes = [16, 32], strides = [1, 1]} : vector<16x64xbf16> to vector<16x32xbf16>
    %364 = vector.extract_strided_slice %362 {offsets = [0, 0], sizes = [16, 32], strides = [1, 1]} : vector<16x64xbf16> to vector<16x32xbf16>
    %365 = tpu.concatenate %363, %362, %364 in 1 : vector<16x32xbf16>, vector<16x64xbf16>, vector<16x32xbf16> -> vector<16x128xbf16>
    %cst_78 = arith.constant 0.000000e+00 : bf16
    %366 = vector.broadcast %cst_78 : bf16 to vector<1x128xbf16>
    %367 = vector.extract_strided_slice %365 {offsets = [0, 0], sizes = [8, 128], strides = [1, 1]} : vector<16x128xbf16> to vector<8x128xbf16>
    %368 = tpu.concatenate %366, %367, %366 in 0 : vector<1x128xbf16>, vector<8x128xbf16>, vector<1x128xbf16> -> vector<10x128xbf16>
    %369 = vector.extract_strided_slice %365 {offsets = [8, 0], sizes = [8, 128], strides = [1, 1]} : vector<16x128xbf16> to vector<8x128xbf16>
    %370 = tpu.concatenate %366, %369, %366 in 0 : vector<1x128xbf16>, vector<8x128xbf16>, vector<1x128xbf16> -> vector<10x128xbf16>
    %371 = vector.extract_strided_slice %368 {offsets = [0, 0], sizes = [1, 128], strides = [1, 1]} : vector<10x128xbf16> to vector<1x128xbf16>
    %372 = vector.extract_strided_slice %368 {offsets = [2, 0], sizes = [1, 128], strides = [1, 1]} : vector<10x128xbf16> to vector<1x128xbf16>
    %373 = vector.extract_strided_slice %368 {offsets = [4, 0], sizes = [1, 128], strides = [1, 1]} : vector<10x128xbf16> to vector<1x128xbf16>
    %374 = vector.extract_strided_slice %368 {offsets = [6, 0], sizes = [1, 128], strides = [1, 1]} : vector<10x128xbf16> to vector<1x128xbf16>
    %375 = tpu.concatenate %371, %372, %373, %374 in 0 : vector<1x128xbf16>, vector<1x128xbf16>, vector<1x128xbf16>, vector<1x128xbf16> -> vector<4x128xbf16>
    %376 = vector.extract_strided_slice %368 {offsets = [1, 0], sizes = [1, 128], strides = [1, 1]} : vector<10x128xbf16> to vector<1x128xbf16>
    %377 = vector.extract_strided_slice %368 {offsets = [3, 0], sizes = [1, 128], strides = [1, 1]} : vector<10x128xbf16> to vector<1x128xbf16>
    %378 = vector.extract_strided_slice %368 {offsets = [5, 0], sizes = [1, 128], strides = [1, 1]} : vector<10x128xbf16> to vector<1x128xbf16>
    %379 = vector.extract_strided_slice %368 {offsets = [7, 0], sizes = [1, 128], strides = [1, 1]} : vector<10x128xbf16> to vector<1x128xbf16>
    %380 = tpu.concatenate %376, %377, %378, %379 in 0 : vector<1x128xbf16>, vector<1x128xbf16>, vector<1x128xbf16>, vector<1x128xbf16> -> vector<4x128xbf16>
    %381 = vector.extract_strided_slice %368 {offsets = [2, 0], sizes = [1, 128], strides = [1, 1]} : vector<10x128xbf16> to vector<1x128xbf16>
    %382 = vector.extract_strided_slice %368 {offsets = [4, 0], sizes = [1, 128], strides = [1, 1]} : vector<10x128xbf16> to vector<1x128xbf16>
    %383 = vector.extract_strided_slice %368 {offsets = [6, 0], sizes = [1, 128], strides = [1, 1]} : vector<10x128xbf16> to vector<1x128xbf16>
    %384 = vector.extract_strided_slice %368 {offsets = [8, 0], sizes = [1, 128], strides = [1, 1]} : vector<10x128xbf16> to vector<1x128xbf16>
    %385 = tpu.concatenate %381, %382, %383, %384 in 0 : vector<1x128xbf16>, vector<1x128xbf16>, vector<1x128xbf16>, vector<1x128xbf16> -> vector<4x128xbf16>
    %386 = tpu.concatenate %375, %380, %385 in 1 : vector<4x128xbf16>, vector<4x128xbf16>, vector<4x128xbf16> -> vector<4x384xbf16>
    %387 = vector.extract_strided_slice %370 {offsets = [0, 0], sizes = [1, 128], strides = [1, 1]} : vector<10x128xbf16> to vector<1x128xbf16>
    %388 = vector.extract_strided_slice %370 {offsets = [2, 0], sizes = [1, 128], strides = [1, 1]} : vector<10x128xbf16> to vector<1x128xbf16>
    %389 = vector.extract_strided_slice %370 {offsets = [4, 0], sizes = [1, 128], strides = [1, 1]} : vector<10x128xbf16> to vector<1x128xbf16>
    %390 = vector.extract_strided_slice %370 {offsets = [6, 0], sizes = [1, 128], strides = [1, 1]} : vector<10x128xbf16> to vector<1x128xbf16>
    %391 = tpu.concatenate %387, %388, %389, %390 in 0 : vector<1x128xbf16>, vector<1x128xbf16>, vector<1x128xbf16>, vector<1x128xbf16> -> vector<4x128xbf16>
    %392 = vector.extract_strided_slice %370 {offsets = [1, 0], sizes = [1, 128], strides = [1, 1]} : vector<10x128xbf16> to vector<1x128xbf16>
    %393 = vector.extract_strided_slice %370 {offsets = [3, 0], sizes = [1, 128], strides = [1, 1]} : vector<10x128xbf16> to vector<1x128xbf16>
    %394 = vector.extract_strided_slice %370 {offsets = [5, 0], sizes = [1, 128], strides = [1, 1]} : vector<10x128xbf16> to vector<1x128xbf16>
    %395 = vector.extract_strided_slice %370 {offsets = [7, 0], sizes = [1, 128], strides = [1, 1]} : vector<10x128xbf16> to vector<1x128xbf16>
    %396 = tpu.concatenate %392, %393, %394, %395 in 0 : vector<1x128xbf16>, vector<1x128xbf16>, vector<1x128xbf16>, vector<1x128xbf16> -> vector<4x128xbf16>
    %397 = vector.extract_strided_slice %370 {offsets = [2, 0], sizes = [1, 128], strides = [1, 1]} : vector<10x128xbf16> to vector<1x128xbf16>
    %398 = vector.extract_strided_slice %370 {offsets = [4, 0], sizes = [1, 128], strides = [1, 1]} : vector<10x128xbf16> to vector<1x128xbf16>
    %399 = vector.extract_strided_slice %370 {offsets = [6, 0], sizes = [1, 128], strides = [1, 1]} : vector<10x128xbf16> to vector<1x128xbf16>
    %400 = vector.extract_strided_slice %370 {offsets = [8, 0], sizes = [1, 128], strides = [1, 1]} : vector<10x128xbf16> to vector<1x128xbf16>
    %401 = tpu.concatenate %397, %398, %399, %400 in 0 : vector<1x128xbf16>, vector<1x128xbf16>, vector<1x128xbf16>, vector<1x128xbf16> -> vector<4x128xbf16>
    %402 = tpu.concatenate %391, %396, %401 in 1 : vector<4x128xbf16>, vector<4x128xbf16>, vector<4x128xbf16> -> vector<4x384xbf16>
    %403 = tpu.concatenate %386, %402 in 0 : vector<4x384xbf16>, vector<4x384xbf16> -> vector<8x384xbf16>
    %cst_79 = arith.constant dense<0.000000e+00> : vector<8x64xf32>
    %404 = tpu.matmul %403, %359, %cst_79 {dimension_numbers = #tpu.dot_dimension_numbers<[1], [0], [0], [1], [0, 0, 1, 1], [], []>} : vector<8x384xbf16>, vector<384x64xbf16>, vector<8x64xf32> -> vector<8x64xf32>
    %cst_80 = arith.constant 0.000000e+00 : f32
    %405 = vector.broadcast %cst_80 : f32 to vector<8x64xf32>
    %406 = arith.maximumf %404, %405 : vector<8x64xf32>
    %407 = arith.truncf %406 : vector<8x64xf32> to vector<8x64xbf16>
    %408 = tpu.concatenate %407, %407, %407 in 1 : vector<8x64xbf16>, vector<8x64xbf16>, vector<8x64xbf16> -> vector<8x192xbf16>
    %cst_81 = arith.constant 0.000000e+00 : bf16
    %409 = vector.broadcast %cst_81 : bf16 to vector<1x192xbf16>
    %410 = vector.extract_strided_slice %408 {offsets = [0, 0], sizes = [4, 192], strides = [1, 1]} : vector<8x192xbf16> to vector<4x192xbf16>
    %411 = tpu.concatenate %409, %410, %409 in 0 : vector<1x192xbf16>, vector<4x192xbf16>, vector<1x192xbf16> -> vector<6x192xbf16>
    %412 = vector.extract_strided_slice %408 {offsets = [4, 0], sizes = [4, 192], strides = [1, 1]} : vector<8x192xbf16> to vector<4x192xbf16>
    %413 = tpu.concatenate %409, %412, %409 in 0 : vector<1x192xbf16>, vector<4x192xbf16>, vector<1x192xbf16> -> vector<6x192xbf16>
    %414 = vector.extract_strided_slice %411 {offsets = [0, 0], sizes = [4, 192], strides = [1, 1]} : vector<6x192xbf16> to vector<4x192xbf16>
    %415 = vector.extract_strided_slice %411 {offsets = [1, 0], sizes = [4, 192], strides = [1, 1]} : vector<6x192xbf16> to vector<4x192xbf16>
    %416 = vector.extract_strided_slice %411 {offsets = [2, 0], sizes = [4, 192], strides = [1, 1]} : vector<6x192xbf16> to vector<4x192xbf16>
    %417 = tpu.concatenate %414, %415, %416 in 1 : vector<4x192xbf16>, vector<4x192xbf16>, vector<4x192xbf16> -> vector<4x576xbf16>
    %418 = vector.extract_strided_slice %413 {offsets = [0, 0], sizes = [4, 192], strides = [1, 1]} : vector<6x192xbf16> to vector<4x192xbf16>
    %419 = vector.extract_strided_slice %413 {offsets = [1, 0], sizes = [4, 192], strides = [1, 1]} : vector<6x192xbf16> to vector<4x192xbf16>
    %420 = vector.extract_strided_slice %413 {offsets = [2, 0], sizes = [4, 192], strides = [1, 1]} : vector<6x192xbf16> to vector<4x192xbf16>
    %421 = tpu.concatenate %418, %419, %420 in 1 : vector<4x192xbf16>, vector<4x192xbf16>, vector<4x192xbf16> -> vector<4x576xbf16>
    %422 = tpu.concatenate %417, %421 in 0 : vector<4x576xbf16>, vector<4x576xbf16> -> vector<8x576xbf16>
    %cst_82 = arith.constant dense<0.000000e+00> : vector<8x64xf32>
    %423 = tpu.matmul %422, %360, %cst_82 {dimension_numbers = #tpu.dot_dimension_numbers<[1], [0], [0], [1], [0, 0, 1, 1], [], []>} : vector<8x576xbf16>, vector<576x64xbf16>, vector<8x64xf32> -> vector<8x64xf32>
    %424 = vector.extract_strided_slice %358 {offsets = [0, 0], sizes = [1, 64], strides = [1, 1]} : vector<16x64xf32> to vector<1x64xf32>
    %425 = vector.extract_strided_slice %358 {offsets = [2, 0], sizes = [1, 64], strides = [1, 1]} : vector<16x64xf32> to vector<1x64xf32>
    %426 = vector.extract_strided_slice %358 {offsets = [4, 0], sizes = [1, 64], strides = [1, 1]} : vector<16x64xf32> to vector<1x64xf32>
    %427 = vector.extract_strided_slice %358 {offsets = [6, 0], sizes = [1, 64], strides = [1, 1]} : vector<16x64xf32> to vector<1x64xf32>
    %428 = tpu.concatenate %424, %425, %426, %427 in 0 : vector<1x64xf32>, vector<1x64xf32>, vector<1x64xf32>, vector<1x64xf32> -> vector<4x64xf32>
    %429 = vector.extract_strided_slice %358 {offsets = [8, 0], sizes = [1, 64], strides = [1, 1]} : vector<16x64xf32> to vector<1x64xf32>
    %430 = vector.extract_strided_slice %358 {offsets = [10, 0], sizes = [1, 64], strides = [1, 1]} : vector<16x64xf32> to vector<1x64xf32>
    %431 = vector.extract_strided_slice %358 {offsets = [12, 0], sizes = [1, 64], strides = [1, 1]} : vector<16x64xf32> to vector<1x64xf32>
    %432 = vector.extract_strided_slice %358 {offsets = [14, 0], sizes = [1, 64], strides = [1, 1]} : vector<16x64xf32> to vector<1x64xf32>
    %433 = tpu.concatenate %429, %430, %431, %432 in 0 : vector<1x64xf32>, vector<1x64xf32>, vector<1x64xf32>, vector<1x64xf32> -> vector<4x64xf32>
    %434 = tpu.concatenate %428, %433 in 0 : vector<4x64xf32>, vector<4x64xf32> -> vector<8x64xf32>
    %435 = arith.truncf %434 : vector<8x64xf32> to vector<8x64xbf16>
    %cst_83 = arith.constant dense<0.000000e+00> : vector<8x64xf32>
    %436 = tpu.matmul %435, %361, %cst_83 {dimension_numbers = #tpu.dot_dimension_numbers<[1], [0], [0], [1], [0, 0, 1, 1], [], []>} : vector<8x64xbf16>, vector<64x64xbf16>, vector<8x64xf32> -> vector<8x64xf32>
    %437 = arith.addf %423, %436 : vector<8x64xf32>
    %cst_84 = arith.constant 0.000000e+00 : f32
    %438 = vector.broadcast %cst_84 : f32 to vector<8x64xf32>
    %439 = arith.maximumf %437, %438 : vector<8x64xf32>
    %c0_85 = arith.constant 0 : index
    %c0_86 = arith.constant 0 : index
    %440 = vector.load %arg19[%c0_85, %c0_86] : memref<576x64xbf16, #tpu.memory_space<vmem>>, vector<576x64xbf16>
    %c0_87 = arith.constant 0 : index
    %c0_88 = arith.constant 0 : index
    %441 = vector.load %arg20[%c0_87, %c0_88] : memref<576x64xbf16, #tpu.memory_space<vmem>>, vector<576x64xbf16>
    %442 = arith.truncf %439 : vector<8x64xf32> to vector<8x64xbf16>
    %443 = tpu.concatenate %442, %442, %442 in 1 : vector<8x64xbf16>, vector<8x64xbf16>, vector<8x64xbf16> -> vector<8x192xbf16>
    %cst_89 = arith.constant 0.000000e+00 : bf16
    %444 = vector.broadcast %cst_89 : bf16 to vector<1x192xbf16>
    %445 = vector.extract_strided_slice %443 {offsets = [0, 0], sizes = [4, 192], strides = [1, 1]} : vector<8x192xbf16> to vector<4x192xbf16>
    %446 = tpu.concatenate %444, %445, %444 in 0 : vector<1x192xbf16>, vector<4x192xbf16>, vector<1x192xbf16> -> vector<6x192xbf16>
    %447 = vector.extract_strided_slice %443 {offsets = [4, 0], sizes = [4, 192], strides = [1, 1]} : vector<8x192xbf16> to vector<4x192xbf16>
    %448 = tpu.concatenate %444, %447, %444 in 0 : vector<1x192xbf16>, vector<4x192xbf16>, vector<1x192xbf16> -> vector<6x192xbf16>
    %449 = vector.extract_strided_slice %446 {offsets = [0, 0], sizes = [4, 192], strides = [1, 1]} : vector<6x192xbf16> to vector<4x192xbf16>
    %450 = vector.extract_strided_slice %446 {offsets = [1, 0], sizes = [4, 192], strides = [1, 1]} : vector<6x192xbf16> to vector<4x192xbf16>
    %451 = vector.extract_strided_slice %446 {offsets = [2, 0], sizes = [4, 192], strides = [1, 1]} : vector<6x192xbf16> to vector<4x192xbf16>
    %452 = tpu.concatenate %449, %450, %451 in 1 : vector<4x192xbf16>, vector<4x192xbf16>, vector<4x192xbf16> -> vector<4x576xbf16>
    %453 = vector.extract_strided_slice %448 {offsets = [0, 0], sizes = [4, 192], strides = [1, 1]} : vector<6x192xbf16> to vector<4x192xbf16>
    %454 = vector.extract_strided_slice %448 {offsets = [1, 0], sizes = [4, 192], strides = [1, 1]} : vector<6x192xbf16> to vector<4x192xbf16>
    %455 = vector.extract_strided_slice %448 {offsets = [2, 0], sizes = [4, 192], strides = [1, 1]} : vector<6x192xbf16> to vector<4x192xbf16>
    %456 = tpu.concatenate %453, %454, %455 in 1 : vector<4x192xbf16>, vector<4x192xbf16>, vector<4x192xbf16> -> vector<4x576xbf16>
    %457 = tpu.concatenate %452, %456 in 0 : vector<4x576xbf16>, vector<4x576xbf16> -> vector<8x576xbf16>
    %cst_90 = arith.constant dense<0.000000e+00> : vector<8x64xf32>
    %458 = tpu.matmul %457, %440, %cst_90 {dimension_numbers = #tpu.dot_dimension_numbers<[1], [0], [0], [1], [0, 0, 1, 1], [], []>} : vector<8x576xbf16>, vector<576x64xbf16>, vector<8x64xf32> -> vector<8x64xf32>
    %cst_91 = arith.constant 0.000000e+00 : f32
    %459 = vector.broadcast %cst_91 : f32 to vector<8x64xf32>
    %460 = arith.maximumf %458, %459 : vector<8x64xf32>
    %461 = arith.truncf %460 : vector<8x64xf32> to vector<8x64xbf16>
    %462 = tpu.concatenate %461, %461, %461 in 1 : vector<8x64xbf16>, vector<8x64xbf16>, vector<8x64xbf16> -> vector<8x192xbf16>
    %cst_92 = arith.constant 0.000000e+00 : bf16
    %463 = vector.broadcast %cst_92 : bf16 to vector<1x192xbf16>
    %464 = vector.extract_strided_slice %462 {offsets = [0, 0], sizes = [4, 192], strides = [1, 1]} : vector<8x192xbf16> to vector<4x192xbf16>
    %465 = tpu.concatenate %463, %464, %463 in 0 : vector<1x192xbf16>, vector<4x192xbf16>, vector<1x192xbf16> -> vector<6x192xbf16>
    %466 = vector.extract_strided_slice %462 {offsets = [4, 0], sizes = [4, 192], strides = [1, 1]} : vector<8x192xbf16> to vector<4x192xbf16>
    %467 = tpu.concatenate %463, %466, %463 in 0 : vector<1x192xbf16>, vector<4x192xbf16>, vector<1x192xbf16> -> vector<6x192xbf16>
    %468 = vector.extract_strided_slice %465 {offsets = [0, 0], sizes = [4, 192], strides = [1, 1]} : vector<6x192xbf16> to vector<4x192xbf16>
    %469 = vector.extract_strided_slice %465 {offsets = [1, 0], sizes = [4, 192], strides = [1, 1]} : vector<6x192xbf16> to vector<4x192xbf16>
    %470 = vector.extract_strided_slice %465 {offsets = [2, 0], sizes = [4, 192], strides = [1, 1]} : vector<6x192xbf16> to vector<4x192xbf16>
    %471 = tpu.concatenate %468, %469, %470 in 1 : vector<4x192xbf16>, vector<4x192xbf16>, vector<4x192xbf16> -> vector<4x576xbf16>
    %472 = vector.extract_strided_slice %467 {offsets = [0, 0], sizes = [4, 192], strides = [1, 1]} : vector<6x192xbf16> to vector<4x192xbf16>
    %473 = vector.extract_strided_slice %467 {offsets = [1, 0], sizes = [4, 192], strides = [1, 1]} : vector<6x192xbf16> to vector<4x192xbf16>
    %474 = vector.extract_strided_slice %467 {offsets = [2, 0], sizes = [4, 192], strides = [1, 1]} : vector<6x192xbf16> to vector<4x192xbf16>
    %475 = tpu.concatenate %472, %473, %474 in 1 : vector<4x192xbf16>, vector<4x192xbf16>, vector<4x192xbf16> -> vector<4x576xbf16>
    %476 = tpu.concatenate %471, %475 in 0 : vector<4x576xbf16>, vector<4x576xbf16> -> vector<8x576xbf16>
    %cst_93 = arith.constant dense<0.000000e+00> : vector<8x64xf32>
    %477 = tpu.matmul %476, %441, %cst_93 {dimension_numbers = #tpu.dot_dimension_numbers<[1], [0], [0], [1], [0, 0, 1, 1], [], []>} : vector<8x576xbf16>, vector<576x64xbf16>, vector<8x64xf32> -> vector<8x64xf32>
    %478 = arith.addf %477, %439 : vector<8x64xf32>
    %cst_94 = arith.constant 0.000000e+00 : f32
    %479 = vector.broadcast %cst_94 : f32 to vector<8x64xf32>
    %480 = arith.maximumf %478, %479 : vector<8x64xf32>
    %c0_95 = arith.constant 0 : index
    %c0_96 = arith.constant 0 : index
    %481 = vector.load %arg21[%c0_95, %c0_96] : memref<64x3xf32, #tpu.memory_space<vmem>>, vector<64x3xf32>
    %c0_97 = arith.constant 0 : index
    %c0_98 = arith.constant 0 : index
    %482 = vector.load %arg22[%c0_97, %c0_98] : memref<1x3xf32, #tpu.memory_space<vmem>>, vector<1x3xf32>
    %483 = vector.extract_strided_slice %480 {offsets = [0, 0], sizes = [4, 64], strides = [1, 1]} : vector<8x64xf32> to vector<4x64xf32>
    %cst_99 = arith.constant dense<0.000000e+00> : vector<64xf32>
    %484 = vector.multi_reduction <add>, %483, %cst_99 [0] : vector<4x64xf32> to vector<64xf32>
    %485 = vector.shape_cast %484 : vector<64xf32> to vector<1x64xf32>
    %486 = vector.extract_strided_slice %480 {offsets = [4, 0], sizes = [4, 64], strides = [1, 1]} : vector<8x64xf32> to vector<4x64xf32>
    %cst_100 = arith.constant dense<0.000000e+00> : vector<64xf32>
    %487 = vector.multi_reduction <add>, %486, %cst_100 [0] : vector<4x64xf32> to vector<64xf32>
    %488 = vector.shape_cast %487 : vector<64xf32> to vector<1x64xf32>
    %489 = tpu.concatenate %485, %488 in 0 : vector<1x64xf32>, vector<1x64xf32> -> vector<2x64xf32>
    %cst_101 = arith.constant 2.500000e-01 : f32
    %490 = vector.broadcast %cst_101 : f32 to vector<2x64xf32>
    %491 = arith.mulf %489, %490 : vector<2x64xf32>
    %cst_102 = arith.constant dense<0.000000e+00> : vector<2x3xf32>
    %492 = tpu.matmul %491, %481, %cst_102 {dimension_numbers = #tpu.dot_dimension_numbers<[1], [0], [0], [1], [0, 0, 1, 1], [], []>} : vector<2x64xf32>, vector<64x3xf32>, vector<2x3xf32> -> vector<2x3xf32>
    %493 = vector.broadcast %482 : vector<1x3xf32> to vector<2x3xf32>
    %494 = arith.addf %492, %493 : vector<2x3xf32>
    %c0_103 = arith.constant 0 : index
    %c0_104 = arith.constant 0 : index
    %495 = vector.load %arg23[%c0_103, %c0_104] : memref<2x3xf32, #tpu.memory_space<vmem>>, vector<2x3xf32>
    tpu.vector_store %arg23[%c0_103, %c0_104], %494 {strides = array<i32>} : memref<2x3xf32, #tpu.memory_space<vmem>>, vector<2x3xf32>,
    return
  }
}

</mosaic_0001>

<bundles_post_ra>
// kernel: _lambda_.1
= control target key start
LH: loop header
LB: loop body
LE: loop exit
PB: predicated region body
PF: predicated region fallthrough
CT: control target
= control target key end

     0   :  { %s9886_s0 = inlined_call_operand.vmem [shape: f32[16,128], index: 0, kind: input, shape index: {}]   ;;  %s9887_s1 = inlined_call_operand.vmem [shape: bf16[408,128], index: 1, kind: input, shape index: {}]   ;;  %s9888_s2 = inlined_call_operand.vmem [shape: bf16[240,64], index: 2, kind: input, shape index: {}]   ;;  %s9889_s3 = inlined_call_operand.vmem [shape: bf16[240,64], index: 3, kind: input, shape index: {}]   ;;  %s9890_s4 = inlined_call_operand.vmem [shape: bf16[240,64], index: 4, kind: input, shape index: {}]   ;;  %s9891_s5 = inlined_call_operand.vmem [shape: bf16[240,64], index: 5, kind: input, shape index: {}]   ;;  %s9892_s6 = inlined_call_operand.vmem [shape: bf16[240,64], index: 6, kind: input, shape index: {}]   ;;  %s9893_s7 = inlined_call_operand.vmem [shape: bf16[288,64], index: 7, kind: input, shape index: {}]   ;;  %s9894_s8 = inlined_call_operand.vmem [shape: bf16[64,64], index: 8, kind: input, shape index: {}]   ;;  %s9895_s9 = inlined_call_operand.vmem [shape: bf16[288,64], index: 9, kind: input, shape index: {}]   ;;  %s9896_s10 = inlined_call_operand.vmem [shape: bf16[288,64], index: 10, kind: input, shape index: {}]   ;;  %s9897_s11 = inlined_call_operand.vmem [shape: bf16[288,64], index: 11, kind: input, shape index: {}]   ;;  %s9898_s12 = inlined_call_operand.vmem [shape: bf16[384,64], index: 12, kind: input, shape index: {}]   ;;  %s9899_s13 = inlined_call_operand.vmem [shape: bf16[64,64], index: 13, kind: input, shape index: {}]   ;;  %s9900_s14 = inlined_call_operand.vmem [shape: bf16[384,64], index: 14, kind: input, shape index: {}]   ;;  %s9901_s15 = inlined_call_operand.vmem [shape: bf16[384,64], index: 15, kind: input, shape index: {}]   ;;  %s9902_s16 = inlined_call_operand.vmem [shape: bf16[384,64], index: 16, kind: input, shape index: {}]   ;;  %s9903_s17 = inlined_call_operand.vmem [shape: bf16[576,64], index: 17, kind: input, shape index: {}]   ;;  %s9904_s18 = inlined_call_operand.vmem [shape: bf16[64,64], index: 18, kind: input, shape index: {}]   ;;  %s9905_s19 = inlined_call_operand.vmem [shape: bf16[576,64], index: 19, kind: input, shape index: {}]   ;;  %s9906_s20 = inlined_call_operand.vmem [shape: bf16[576,64], index: 20, kind: input, shape index: {}]   ;;  %s9907_s21 = inlined_call_operand.vmem [shape: f32[64,3], index: 21, kind: input, shape index: {}]   ;;  %s9908_s22 = inlined_call_operand.vmem [shape: f32[1,3], index: 22, kind: input, shape index: {}]   ;;  %s9909_s23 = inlined_call_operand.hbm [shape: f32[2,3], index: 23, kind: output, shape index: {}]  }
   0x1   :  { %9918 = sst [smem:[#allocation5_spill]] %s9886_s0 }
   0x2   :  { %9919 = sst [smem:[#allocation6_spill]] %s9887_s1 }
   0x3   :  { %9920 = sst [smem:[#allocation7_spill]] %s9888_s2 }
   0x4   :  { %9921 = sst [smem:[#allocation8_spill]] %s9889_s3 }
   0x5   :  { %9922 = sst [smem:[#allocation9_spill]] %s9890_s4 }
   0x6   :  { %9923 = sst [smem:[#allocation10_spill]] %s9891_s5 }
   0x7   :  { %9924 = sst [smem:[#allocation11_spill]] %s9892_s6 }
   0x8   :  { %9925 = sst [smem:[#allocation12_spill]] %s9893_s7 }
   0x9   :  { %s9926_s24 = sld [smem:[#allocation5_spill]]  ;;  %s7753_s1 = smov 4   ;;  %v7754_v5 = vmov 0   ;;  %vm141_vm0 = vcmask 1040384   ;;  %vm142_vm1 = vsmask.f32 256 }
   0xa   :  { %s9927_s6 = sld [smem:[#allocation6_spill]]  ;;  %409 = vmatprep.subr.bf16.mxu1 %v7754_v5  ;;  %vm145_vm2 = vcmask 1044480   ;;  %vm146_vm3 = vsmask.f32 4352  ;;  %vm197_vm4 = vcmask 1043456   ;;  %vm7977_vm5 = vmand %vm141_vm0, %vm142_vm1  ;;  %vm168_vm7 = vcmask 64512  }
   0xb   :  { %vm7985_vm6 = vmand %vm145_vm2, %vm146_vm3  ;;  %vm171_vm8 = vcmask 130048   ;;  %vm362_vm9 = vcmask 195584  }
   0xf   :  { %v76_v0 = vld [vmem:[%s9926_s24] sm:$0xff]  ;;  %v77_v1 = vld [vmem:[%s9926_s24 + $0x8] sm:$0xff]  ;;  %s7756_s24 = smov 16  }
  0x10   :  { %v129_v2 = vpack.c.bf16 %v77_v1, %v76_v0  ;;  %v7342_v3 = vld [vmem:[%s9927_s6 + $0xb8] sm:$0xff]   ;;  %v7346_v7 = vld [vmem:[%s9927_s6 + $0x70] sm:$0xff]   ;;  %v7349_v10 = vld [vmem:[%s9927_s6 + $0x68] sm:$0xff]  }
  0x11   :  { %v7343_v4 = vld [vmem:[%s9927_s6 + $0x78] sm:$0xff]   ;;  %410 = vmatpush1.bf16.msra.mxu1 %v7342_v3  ;;  %v7344_v8 = vld [vmem:[%s9927_s6 + $0xb0] sm:$0xff]   ;;  %v7347_v11 = vld [vmem:[%s9927_s6 + $0xa8] sm:$0xff]  }
  0x12   :  { %131 = vrot.lane.b32.xlu0 %v129_v2, %s7753_s1  ;;  %v7345_v6 = vld [vmem:[%s9927_s6 + $0x38] sm:$0xff]   ;;  %6706 = vmatprep.subr.bf16.mxu0 %v7343_v4  ;;  %v7348_v9 = vld [vmem:[%s9927_s6 + $0x30] sm:$0xff]   ;;  %v7351_v12 = vld [vmem:[%s9927_s6 + $0x28] sm:$0xff]  }
  0x13   :  { %411 = vmatprep.subr.bf16.mxu1 %v7754_v5  ;;  %6707 = vmatpush3.bf16.msra.mxu0 %v7345_v6  ;;  %v7352_v13 = vld [vmem:[%s9927_s6 + $0x60] sm:$0xff]   ;;  %v7355_v16 = vld [vmem:[%s9927_s6 + $0x58] sm:$0xff]   ;;  %v7356_v19 = vld [vmem:[%s9927_s6 + $0x90] sm:$0xff]  }
  0x14   :  { %6708 = vmatprep.subr.bf16.mxu0 %v7346_v7  ;;  %v7350_v14 = vld [vmem:[%s9927_s6 + $0xa0] sm:$0xff]   ;;  %v7353_v17 = vld [vmem:[%s9927_s6 + $0x98] sm:$0xff]   ;;  %v7358_v20 = vld [vmem:[%s9927_s6 + $0x50] sm:$0xff]  }
  0x15   :  { %412 = vmatpush1.bf16.msra.mxu1 %v7344_v8  ;;  %v7354_v15 = vld [vmem:[%s9927_s6 + $0x20] sm:$0xff]   ;;  %v7357_v18 = vld [vmem:[%s9927_s6 + $0x18] sm:$0xff]   ;;  %v7360_v21 = vld [vmem:[%s9927_s6 + $0x10] sm:$0xff]  }
  0x16   :  { %413 = vmatprep.subr.bf16.mxu1 %v7754_v5  ;;  %v7361_v22 = vld [vmem:[%s9927_s6 + $0x48] sm:$0xff]   ;;  %v7362_v25 = vld [vmem:[%s9927_s6 + $0x80] sm:$0xff]  }
  0x17   :  { %6709 = vmatpush3.bf16.msra.mxu0 %v7348_v9  ;;  %v7359_v23 = vld [vmem:[%s9927_s6 + $0x88] sm:$0xff]   ;;  %v7364_v30 = vld [vmem:[%s9927_s6 + $0x40] sm:$0xff]  }
  0x18   :  { %6710 = vmatprep.subr.bf16.mxu0 %v7349_v10  ;;  %v7363_v24 = vld [vmem:[%s9927_s6 + $0x8] sm:$0xff]   ;;  %v7366_v36 = vld [vmem:[%s9927_s6] sm:$0xff]  }
  0x19   :  { %414 = vmatpush1.bf16.msra.mxu1 %v7347_v11  ;;  %v7365_v29 = vld [vmem:[%s9927_s6 + $0xc8] ss:$0 sps:$4 sm:$0xff]   ;;  %v7367_v40 = vld [vmem:[%s9927_s6 + $0xc0] sm:$0xff]   ;;  %s7755_s6 = smov 8  }
  0x1a   :  { %415 = vmatprep.subr.bf16.mxu1 %v7754_v5  ;;  %v366_v35 = vsel %vm197_vm4, %v7365_v29, 0 }
  0x1b   :  { %6711 = vmatpush3.bf16.msra.mxu0 %v7351_v12 }
  0x1c   :  { %6712 = vmatprep.subr.bf16.mxu0 %v7352_v13 }
  0x1d   :  { %416 = vmatpush1.bf16.msra.mxu1 %v7350_v14 }
  0x1e   :  { %417 = vmatprep.subr.bf16.mxu1 %v7754_v5 }
  0x1f   :  { %6713 = vmatpush3.bf16.msra.mxu0 %v7354_v15 }
  0x20   :  { %6714 = vmatprep.subr.bf16.mxu0 %v7355_v16 }
  0x21   :  { %418 = vmatpush1.bf16.msra.mxu1 %v7353_v17 }
  0x22   :  { %419 = vmatprep.subr.bf16.mxu1 %v7754_v5 }
  0x23   :  { %6715 = vmatpush3.bf16.msra.mxu0 %v7357_v18 }
  0x24   :  { %6716 = vmatprep.subr.bf16.mxu0 %v7358_v20 }
  0x25   :  { %420 = vmatpush1.bf16.msra.mxu1 %v7356_v19 }
  0x26   :  { %421 = vmatprep.subr.bf16.mxu1 %v7754_v5 }
  0x27   :  { %6717 = vmatpush3.bf16.msra.mxu0 %v7360_v21 }
  0x28   :  { %6718 = vmatprep.subr.bf16.mxu0 %v7361_v22 }
  0x29   :  { %422 = vmatpush1.bf16.msra.mxu1 %v7359_v23 }
  0x2a   :  { %423 = vmatprep.subr.bf16.mxu1 %v7754_v5 }
  0x2b   :  { %6719 = vmatpush3.bf16.msra.mxu0 %v7363_v24 }
  0x2c   :  { %6720 = vmatprep.subr.bf16.mxu0 %v7364_v30 }
  0x2d   :  { %424 = vmatpush1.bf16.msra.mxu1 %v7362_v25 }
  0x2e   :  { %437 = vmatprep.subr.bf16.mxu1 %v7754_v5 }
  0x2f   :  { %6721 = vmatpush3.bf16.msra.mxu0 %v7366_v36 }
  0x30   :  { %800 = vmatprep.subr.bf16.mxu0 %v7754_v5 }
  0x31   :  { %438 = vmatpush2.bf16.msra.mxu1 %v366_v35 }
  0x32   :  { %439 = vmatprep.subr.bf16.mxu1 %v7754_v5 }
  0x35   :  { %440 = vmatpush2.bf16.msra.mxu1 %v7367_v40 }
  0x36   :  { %1003 = vmatprep.subr.bf16.mxu1 %v7754_v5 }
  0x84   :  { %v132_v26 = vpop.permute.xlu0 %131 }
  0x85   :  { %v134_v27 = vshrl.u32 %v132_v26, 16  ;;  %v137_v28 = vshll.u32 %v132_v26, 16 }
  0x87   :  { %v136_v32 = vrot.slane %v134_v27, 7  ;;  %v149_v33 = vrot.slane %v134_v27, 3  ;;  %v150_v34 = vrot.slane %v137_v28, 4 }
  0x89   :  { %v139_v38 = vor.u32 %v137_v28, %v136_v32  ;;  %v151_v39 = vor.u32 %v150_v34, %v149_v33 }
  0x8b   :  { %v144_v41 = vsel %vm7977_vm5, 0, %v139_v38  ;;  %v153_v42 = vsel %vm7977_vm5, 0, %v151_v39 }
  0x8c   :  { %v148_v43 = vsel %vm7985_vm6, %v144_v41, 0  ;;  %v154_v44 = vsel %vm7985_vm6, %v153_v42, 0 }
  0x8d   :  { %v177_v45 = vshll.u32 %v154_v44, 16  ;;  %v158_v46 = vshll.u32 %v148_v43, 16  ;;  %v175_v47 = vshrl.u32 %v154_v44, 16  ;;  %v156_v48 = vshrl.u32 %v148_v43, 16 }
  0x8e   :  { %v165_v53 = vrot.slane %v148_v43, 1  ;;  %v184_v54 = vrot.slane %v154_v44, 1  ;;  %v193_v55 = vrot.slane %v154_v44, 4 }
  0x8f   :  { %v179_v49 = vrot.slane %v177_v45, 1  ;;  %v160_v50 = vrot.slane %v158_v46, 1 }
  0x90   :  { %v199_v2 = vsel %vm197_vm4, %v148_v43, %v193_v55 }
  0x91   :  { %v180_v51 = vor.u32 %v179_v49, %v175_v47  ;;  %v161_v52 = vor.u32 %v160_v50, %v156_v48 }
  0x93   :  { %181 = vrot.lane.b32.xlu0 %v180_v51, %s7755_s6  ;;  %162 = vrot.lane.b32.xlu1 %v161_v52, %s7755_s6 }
  0x97   :  { %166 = vrot.lane.b32.xlu0 %v165_v53, %s7756_s24  ;;  %185 = vrot.lane.b32.xlu1 %v184_v54, %s7756_s24 }
 0x105   :  { %v182_v56 = vpop.permute.xlu0 %181  ;;  %v163_v57 = vpop.permute.xlu1 %162 }
 0x106   :  { %v188_v58 = vsel %vm168_vm7, %v154_v44, %v182_v56  ;;  %v170_v60 = vsel %vm168_vm7, %v148_v43, %v163_v57 }
 0x107   :  { %v194_v59 = vrot.slane %v188_v58, 4 }
 0x109   :  { %v167_v61 = vpop.permute.xlu0 %166  ;;  %v186_v62 = vpop.permute.xlu1 %185  ;;  %v202_v63 = vsel %vm197_vm4, %v170_v60, %v194_v59 }
 0x10a   :  { %v190_v0 = vsel %vm171_vm8, %v182_v56, %v186_v62  ;;  %v196_v1 = vrot.slane %v186_v62, 4  ;;  %400 = vmatprep.mubr.bf16.mxu0 %v202_v63  ;;  %v173_v4 = vsel %vm171_vm8, %v163_v57, %v167_v61 }
 0x10b   :  { %v195_v3 = vrot.slane %v190_v0, 4  ;;  %401 = vmatmul.mubr.bf16.vlgmr.msra.gmra.mxu0 %v199_v2 }
 0x10c   :  { %v208_v6 = vsel %vm197_vm4, %v167_v61, %v196_v1 }
 0x10d   :  { %6316 = vmatprep.mubr.msk.bf16.mxu1 %vm362_vm9, %v208_v6  ;;  %v205_v7 = vsel %vm197_vm4, %v173_v4, %v195_v3 }
 0x10e   :  { %442 = vmatmul.mubr.bf16.vlgmr.msra.gmra.mxu1 %v205_v7 }
 0x10f   :  { %28 = vsyncpa [#allocation3], 0  ;;  %vm473_vm10 = vcmask 1046528   ;;  %vm479_vm11 = vcmask 1045504   ;;  %s7757_s25 = smov 120   ;;  %s7758_s5 = smov 112  }
 0x110   :  { %s7759_s1 = smov 104   ;;  %s7760_s26 = smov 96   ;;  %vm565_vm12 = vcmask 261120   ;;  %vm568_vm13 = vcmask 326656   ;;  %vm571_vm14 = vcmask 392192   ;;  %vm574_vm15 = vcmask 457728  }
 0x111   :  { %s7761_s2 = smov 88   ;;  %s7762_s27 = smov 80   ;;  %vm646_vm1 = vcmask 588800   ;;  %vm676_vm2 = vcmask 654336   ;;  %vm797_vm3 = vcmask 916480  }
 0x112   :  { %s7763_s7 = smov 72   ;;  %s9932_s3 = sld [smem:[#allocation7_spill]] }
 0x113   :  { %s7764_s4 = smov 32   ;;  %s9934_s0 = sld [smem:[#allocation9_spill]] }
 0x114   :  { %s9935_s28 = sld [smem:[#allocation10_spill]] }
 0x115   :  { %s9937_s29 = sld [smem:[#allocation12_spill]] }
 0x1cb   :  { %v6722_v8 = vpop.f32.mrf.mxu0 }
 0x1cd   :  { %v6723_v9 = vpop.f32.mrf.mxu0 }
 0x1ce   :  { %v6724_v10 = vadd.f32 %v6723_v9, %v6722_v8  ;;  %v443_v11 = vpop.f32.mrf.mxu1 }
 0x1cf   :  { %v6725_v12 = vpop.f32.mrf.mxu0 }
 0x1d0   :  { %v444_v13 = vadd.f32 %v6724_v10, %v443_v11  ;;  %v445_v14 = vpop.f32.mrf.mxu1 }
 0x1d1   :  { %v6726_v15 = vpop.f32.mrf.mxu0 }
 0x1d2   :  { %v450_v16 = vmax.f32 %v444_v13, 0.0  ;;  %v6727_v17 = vadd.f32 %v6726_v15, %v6725_v12  ;;  %v446_v18 = vpop.f32.mrf.mxu1 }
 0x1d4   :  { %v447_v19 = vadd.f32 %v6727_v17, %v446_v18  ;;  %v448_v20 = vpop.f32.mrf.mxu1  ;;  %454 = vrot.lane.b32.xlu1 %v450_v16, %s7755_s6 }
 0x1d6   :  { %v451_v21 = vmax.f32 %v447_v19, 0.0 }
 0x1d8   :  { %456 = vrot.lane.b32.xlu0 %v451_v21, %s7755_s6 }
 0x246   :  { %v455_v22 = vpop.permute.xlu1 %454 }
 0x247   :  { %v461_v23 = vrot.slane %v455_v22, 7  ;;  %v7368_v22 = vld [vmem:[%s9932_s3 + $0x38] sm:$0xff]  }
 0x248   :  { %801 = vmatpush1.bf16.msra.mxu0 %v7368_v22 }
 0x249   :  { %v464_v24 = vsel %vm141_vm0, 0.0, %v461_v23  ;;  %v465_v25 = vsel %vm141_vm0, %v461_v23, 0.0  ;;  %v7369_v23 = vld [vmem:[%s9932_s3 + $0x30] sm:$0xff]   ;;  %802 = vmatprep.subr.bf16.mxu0 %v7754_v5 }
 0x24a   :  { %v474_v26 = vrot.slane %v464_v24, 1  ;;  %v475_v27 = vrot.slane %v465_v25, 1  ;;  %v480_v28 = vrot.slane %v464_v24, 2  ;;  %v481_v29 = vrot.slane %v465_v25, 2  ;;  %v457_v30 = vpop.permute.xlu0 %456  ;;  %v7371_v25 = vld [vmem:[%s9932_s3 + $0x20] sm:$0xff]  }
 0x24b   :  { %v467_v32 = vrot.slane %v457_v30, 7  ;;  %v7376_v30 = vld [vmem:[%s9932_s3 + $0x70] sm:$0xff]  }
 0x24c   :  { %v476_v33 = vsel %vm473_vm10, %v474_v26, %v475_v27  ;;  %v482_v38 = vsel %vm479_vm11, %v480_v28, %v481_v29  ;;  %803 = vmatpush1.bf16.msra.mxu0 %v7369_v23  ;;  %v7372_v26 = vld [vmem:[%s9932_s3 + $0x18] sm:$0xff]   ;;  %v7373_v27 = vld [vmem:[%s9932_s3 + $0x10] sm:$0xff]   ;;  %v7374_v28 = vld [vmem:[%s9932_s3 + $0x8] sm:$0xff]  }
 0x24d   :  { %v478_v34 = vmax.f32 %v464_v24, %v476_v33  ;;  %v469_v35 = vsel %vm141_vm0, 0.0, %v467_v32  ;;  %v470_v36 = vsel %vm141_vm0, %v467_v32, 0.0  ;;  %v7370_v24 = vld [vmem:[%s9932_s3 + $0x28] sm:$0xff]   ;;  %804 = vmatprep.subr.bf16.mxu0 %v7754_v5  ;;  %v7375_v29 = vld [vmem:[%s9932_s3] sm:$0xff]  }
 0x24e   :  { %v487_v39 = vrot.slane %v469_v35, 1  ;;  %v488_v40 = vrot.slane %v470_v36, 1  ;;  %v492_v41 = vrot.slane %v469_v35, 2  ;;  %v493_v42 = vrot.slane %v470_v36, 2  ;;  %v7377_v32 = vld [vmem:[%s9932_s3 + $0x68] sm:$0xff]   ;;  %v7378_v33 = vld [vmem:[%s9932_s3 + $0x60] sm:$0xff]  }
 0x24f   :  { %v484_v43 = vmax.f32 %v478_v34, %v482_v38  ;;  %v7379_v34 = vld [vmem:[%s9932_s3 + $0x58] sm:$0xff]  }
 0x250   :  { %v489_v44 = vsel %vm473_vm10, %v487_v39, %v488_v40  ;;  %v494_v46 = vsel %vm479_vm11, %v492_v41, %v493_v42  ;;  %805 = vmatpush1.bf16.msra.mxu0 %v7370_v24  ;;  %vm1830_vm10 = vcmask 523264   ;;  %vm4601_vm11 = vcmask 1042432  }
 0x251   :  { %v491_v45 = vmax.f32 %v469_v35, %v489_v44  ;;  %499 = vrot.lane.b32.xlu1 %v484_v43, %s7757_s25  ;;  %806 = vmatprep.subr.bf16.mxu0 %v7754_v5  ;;  %v7380_v35 = vld [vmem:[%s9932_s3 + $0x50] sm:$0xff]  }
 0x253   :  { %v496_v47 = vmax.f32 %v491_v45, %v494_v46 }
 0x254   :  { %807 = vmatpush1.bf16.msra.mxu0 %v7371_v25 }
 0x255   :  { %501 = vrot.lane.b32.xlu0 %v496_v47, %s7757_s25  ;;  %507 = vrot.lane.b32.xlu1 %v484_v43, %s7758_s5 }
 0x256   :  { %808 = vmatprep.subr.bf16.mxu0 %v7754_v5 }
 0x258   :  { %809 = vmatpush1.bf16.msra.mxu0 %v7372_v26 }
 0x259   :  { %509 = vrot.lane.b32.xlu0 %v496_v47, %s7758_s5  ;;  %810 = vmatprep.subr.bf16.mxu0 %v7754_v5 }
 0x25c   :  { %811 = vmatpush1.bf16.msra.mxu0 %v7373_v27 }
 0x25d   :  { %812 = vmatprep.subr.bf16.mxu0 %v7754_v5 }
 0x260   :  { %813 = vmatpush1.bf16.msra.mxu0 %v7374_v28 }
 0x261   :  { %814 = vmatprep.subr.bf16.mxu0 %v7754_v5 }
 0x264   :  { %815 = vmatpush1.bf16.msra.mxu0 %v7375_v29 }
 0x265   :  { %818 = vmatprep.subr.bf16.mxu0 %v7754_v5 }
 0x268   :  { %819 = vmatpush2.bf16.msra.mxu0 %v7376_v30 }
 0x269   :  { %820 = vmatprep.subr.bf16.mxu0 %v7754_v5 }
 0x26c   :  { %821 = vmatpush2.bf16.msra.mxu0 %v7377_v32 }
 0x26d   :  { %822 = vmatprep.subr.bf16.mxu0 %v7754_v5 }
 0x270   :  { %823 = vmatpush2.bf16.msra.mxu0 %v7378_v33 }
 0x271   :  { %824 = vmatprep.subr.bf16.mxu0 %v7754_v5 }
 0x274   :  { %825 = vmatpush2.bf16.msra.mxu0 %v7379_v34 }
 0x275   :  { %826 = vmatprep.subr.bf16.mxu0 %v7754_v5 }
 0x278   :  { %827 = vmatpush2.bf16.msra.mxu0 %v7380_v35 }
 0x279   :  { %828 = vmatprep.subr.bf16.mxu0 %v7754_v5 }
 0x2c3   :  { %v500_v48 = vpop.permute.xlu1 %499 }
 0x2c4   :  { %v505_v49 = vmax.f32 %v484_v43, %v500_v48  ;;  %v7381_v43 = vld [vmem:[%s9932_s3 + $0x48] sm:$0xff]  }
 0x2c5   :  { %829 = vmatpush2.bf16.msra.mxu0 %v7381_v43 }
 0x2c6   :  { %830 = vmatprep.subr.bf16.mxu0 %v7754_v5 }
 0x2c7   :  { %v502_v50 = vpop.permute.xlu0 %501  ;;  %v508_v51 = vpop.permute.xlu1 %507 }
 0x2c8   :  { %v513_v52 = vmax.f32 %v505_v49, %v508_v51  ;;  %v506_v53 = vmax.f32 %v496_v47, %v502_v50  ;;  %v7382_v49 = vld [vmem:[%s9932_s3 + $0x40] sm:$0xff]  }
 0x2c9   :  { %831 = vmatpush2.bf16.msra.mxu0 %v7382_v49 }
 0x2ca   :  { %517 = vrot.lane.b32.xlu1 %v513_v52, %s7757_s25  ;;  %1266 = vmatprep.subr.bf16.mxu0 %v7754_v5 }
 0x2cb   :  { %v510_v54 = vpop.permute.xlu0 %509 }
 0x2cc   :  { %v514_v55 = vmax.f32 %v506_v53, %v510_v54 }
 0x2ce   :  { %519 = vrot.lane.b32.xlu0 %v514_v55, %s7757_s25  ;;  %523 = vrot.lane.b32.xlu1 %v513_v52, %s7758_s5  ;;  %s9933_s25 = sld [smem:[#allocation8_spill]] }
 0x2d2   :  { %525 = vrot.lane.b32.xlu0 %v514_v55, %s7758_s5  ;;  %529 = vrot.lane.b32.xlu1 %v513_v52, %s7759_s1 }
 0x2d4   :  { %v7383_v22 = vld [vmem:[%s9933_s25 + $0x38] sm:$0xff]   ;;  %v7384_v23 = vld [vmem:[%s9933_s25 + $0x30] sm:$0xff]   ;;  %v7385_v24 = vld [vmem:[%s9933_s25 + $0x28] sm:$0xff]  }
 0x2d5   :  { %1004 = vmatpush1.bf16.msra.mxu1 %v7383_v22  ;;  %v7386_v25 = vld [vmem:[%s9933_s25 + $0x20] sm:$0xff]   ;;  %v7387_v26 = vld [vmem:[%s9933_s25 + $0x18] sm:$0xff]   ;;  %v7388_v27 = vld [vmem:[%s9933_s25 + $0x10] sm:$0xff]  }
 0x2d6   :  { %531 = vrot.lane.b32.xlu0 %v514_v55, %s7759_s1  ;;  %535 = vrot.lane.b32.xlu1 %v513_v52, %s7760_s26  ;;  %v7389_v28 = vld [vmem:[%s9933_s25 + $0x8] sm:$0xff]   ;;  %v7390_v29 = vld [vmem:[%s9933_s25] sm:$0xff]  }
 0x2d7   :  { %1005 = vmatprep.subr.bf16.mxu1 %v7754_v5  ;;  %v7391_v30 = vld [vmem:[%s9933_s25 + $0x70] sm:$0xff]   ;;  %v7392_v32 = vld [vmem:[%s9933_s25 + $0x68] sm:$0xff]   ;;  %v7393_v33 = vld [vmem:[%s9933_s25 + $0x60] sm:$0xff]  }
 0x2d8   :  { %v7394_v34 = vld [vmem:[%s9933_s25 + $0x58] sm:$0xff]   ;;  %v7395_v35 = vld [vmem:[%s9933_s25 + $0x50] sm:$0xff]   ;;  %v7396_v43 = vld [vmem:[%s9933_s25 + $0x48] sm:$0xff]  }
 0x2d9   :  { %1006 = vmatpush1.bf16.msra.mxu1 %v7384_v23  ;;  %v7397_v49 = vld [vmem:[%s9933_s25 + $0x40] sm:$0xff]  }
 0x2da   :  { %537 = vrot.lane.b32.xlu0 %v514_v55, %s7760_s26  ;;  %541 = vrot.lane.b32.xlu1 %v513_v52, %s7761_s2 }
 0x2db   :  { %1007 = vmatprep.subr.bf16.mxu1 %v7754_v5 }
 0x2dd   :  { %1008 = vmatpush1.bf16.msra.mxu1 %v7385_v24  ;;  %v7400_v24 = vld [vmem:[%s9934_s0 + $0x28] sm:$0xff]  }
 0x2de   :  { %543 = vrot.lane.b32.xlu0 %v514_v55, %s7761_s2  ;;  %547 = vrot.lane.b32.xlu1 %v513_v52, %s7762_s27 }
 0x2df   :  { %1009 = vmatprep.subr.bf16.mxu1 %v7754_v5 }
 0x2e1   :  { %1010 = vmatpush1.bf16.msra.mxu1 %v7386_v25  ;;  %v7401_v25 = vld [vmem:[%s9934_s0 + $0x20] sm:$0xff]  }
 0x2e2   :  { %549 = vrot.lane.b32.xlu0 %v514_v55, %s7762_s27  ;;  %553 = vrot.lane.b32.xlu1 %v513_v52, %s7763_s7 }
 0x2e3   :  { %1011 = vmatprep.subr.bf16.mxu1 %v7754_v5 }
 0x2e5   :  { %1012 = vmatpush1.bf16.msra.mxu1 %v7387_v26  ;;  %v7402_v26 = vld [vmem:[%s9934_s0 + $0x18] sm:$0xff]  }
 0x2e6   :  { %555 = vrot.lane.b32.xlu0 %v514_v55, %s7763_s7  ;;  %1013 = vmatprep.subr.bf16.mxu1 %v7754_v5 }
 0x2e9   :  { %1014 = vmatpush1.bf16.msra.mxu1 %v7388_v27  ;;  %v7403_v27 = vld [vmem:[%s9934_s0 + $0x10] sm:$0xff]  }
 0x2ea   :  { %1015 = vmatprep.subr.bf16.mxu1 %v7754_v5 }
 0x2ed   :  { %1016 = vmatpush1.bf16.msra.mxu1 %v7389_v28  ;;  %v7404_v28 = vld [vmem:[%s9934_s0 + $0x8] sm:$0xff]  }
 0x2ee   :  { %1017 = vmatprep.subr.bf16.mxu1 %v7754_v5 }
 0x2f1   :  { %1018 = vmatpush1.bf16.msra.mxu1 %v7390_v29  ;;  %v7405_v29 = vld [vmem:[%s9934_s0] sm:$0xff]  }
 0x2f2   :  { %1021 = vmatprep.subr.bf16.mxu1 %v7754_v5 }
 0x2f5   :  { %1022 = vmatpush2.bf16.msra.mxu1 %v7391_v30  ;;  %v7406_v30 = vld [vmem:[%s9934_s0 + $0x70] sm:$0xff]  }
 0x2f6   :  { %1023 = vmatprep.subr.bf16.mxu1 %v7754_v5 }
 0x2f9   :  { %1024 = vmatpush2.bf16.msra.mxu1 %v7392_v32  ;;  %v7407_v32 = vld [vmem:[%s9934_s0 + $0x68] sm:$0xff]  }
 0x2fa   :  { %1025 = vmatprep.subr.bf16.mxu1 %v7754_v5 }
 0x2fd   :  { %1026 = vmatpush2.bf16.msra.mxu1 %v7393_v33  ;;  %v7408_v33 = vld [vmem:[%s9934_s0 + $0x60] sm:$0xff]  }
 0x2fe   :  { %1027 = vmatprep.subr.bf16.mxu1 %v7754_v5 }
 0x301   :  { %1028 = vmatpush2.bf16.msra.mxu1 %v7394_v34  ;;  %v7409_v34 = vld [vmem:[%s9934_s0 + $0x58] sm:$0xff]  }
 0x302   :  { %1029 = vmatprep.subr.bf16.mxu1 %v7754_v5 }
 0x305   :  { %1030 = vmatpush2.bf16.msra.mxu1 %v7395_v35  ;;  %v7410_v35 = vld [vmem:[%s9934_s0 + $0x50] sm:$0xff]  }
 0x306   :  { %1031 = vmatprep.subr.bf16.mxu1 %v7754_v5 }
 0x309   :  { %1032 = vmatpush2.bf16.msra.mxu1 %v7396_v43  ;;  %v7411_v43 = vld [vmem:[%s9934_s0 + $0x48] sm:$0xff]  }
 0x30a   :  { %1033 = vmatprep.subr.bf16.mxu1 %v7754_v5 }
 0x30d   :  { %1034 = vmatpush2.bf16.msra.mxu1 %v7397_v49  ;;  %v7412_v49 = vld [vmem:[%s9934_s0 + $0x40] sm:$0xff]  }
 0x30e   :  { %1469 = vmatprep.subr.bf16.mxu1 %v7754_v5 }
 0x33c   :  { %v518_v56 = vpop.permute.xlu1 %517 }
 0x33d   :  { %v559_v3 = vsel %vm168_vm7, %v513_v52, %v518_v56 }
 0x340   :  { %v520_v57 = vpop.permute.xlu0 %519  ;;  %v524_v58 = vpop.permute.xlu1 %523 }
 0x341   :  { %v560_v4 = vsel %vm168_vm7, %v514_v55, %v520_v57  ;;  %v561_v6 = vsel %vm171_vm8, %v559_v3, %v524_v58 }
 0x344   :  { %v526_v59 = vpop.permute.xlu0 %525  ;;  %v530_v60 = vpop.permute.xlu1 %529 }
 0x345   :  { %v562_v7 = vsel %vm171_vm8, %v560_v4, %v526_v59  ;;  %v563_v9 = vsel %vm362_vm9, %v561_v6, %v530_v60 }
 0x348   :  { %v532_v61 = vpop.permute.xlu0 %531  ;;  %v536_v62 = vpop.permute.xlu1 %535 }
 0x349   :  { %v564_v10 = vsel %vm362_vm9, %v562_v7, %v532_v61  ;;  %v566_v11 = vsel %vm565_vm12, %v563_v9, %v536_v62  ;;  %vm7766_vm9 = vmmov 0  }
 0x34c   :  { %v538_v63 = vpop.permute.xlu0 %537  ;;  %v542_v0 = vpop.permute.xlu1 %541 }
 0x34d   :  { %v567_v12 = vsel %vm565_vm12, %v564_v10, %v538_v63  ;;  %v569_v14 = vsel %vm568_vm13, %v566_v11, %v542_v0 }
 0x350   :  { %v544_v1 = vpop.permute.xlu0 %543  ;;  %v548_v2 = vpop.permute.xlu1 %547 }
 0x351   :  { %v570_v15 = vsel %vm568_vm13, %v567_v12, %v544_v1  ;;  %v572_v16 = vsel %vm571_vm14, %v569_v14, %v548_v2 }
 0x354   :  { %v550_v8 = vpop.permute.xlu0 %549  ;;  %v554_v13 = vpop.permute.xlu1 %553 }
 0x355   :  { %v573_v17 = vsel %vm571_vm14, %v570_v15, %v550_v8  ;;  %v8040_v19 = vsel %vm574_vm15, %v572_v16, %v554_v13  ;;  %vm6274_vm14 = vcmask 17408  }
 0x358   :  { %v556_v18 = vpop.permute.xlu0 %555 }
 0x359   :  { %v8042_v20 = vsel %vm574_vm15, %v573_v17, %v556_v18 }
 0x35a   :  { %v637_v21 = vpack.c.bf16 %v8042_v20, %v8040_v19 }
 0x35c   :  { %641 = vrot.lane.b32.xlu0 %v637_v21, %s7755_s6  ;;  %639 = vrot.lane.b32.xlu1 %v637_v21, %s7763_s7 }
 0x3ce   :  { %v642_v36 = vpop.permute.xlu0 %641  ;;  %v640_v38 = vpop.permute.xlu1 %639 }
 0x3cf   :  { %v645_v39 = vsel %vm168_vm7, %v640_v38, %v642_v36 }
 0x3d0   :  { %v647_v40 = vsel %vm646_vm1, %v645_v39, %v640_v38 }
 0x3d1   :  { %v648_v41 = vshrl.u32 %v647_v40, 16  ;;  %v651_v42 = vshll.u32 %v647_v40, 16 }
 0x3d3   :  { %v650_v44 = vrot.slane %v648_v41, 7  ;;  %v657_v45 = vrot.slane %v648_v41, 3  ;;  %v658_v46 = vrot.slane %v651_v42, 4 }
 0x3d5   :  { %v653_v47 = vor.u32 %v651_v42, %v650_v44  ;;  %v659_v48 = vor.u32 %v658_v46, %v657_v45 }
 0x3d7   :  { %v655_v50 = vsel %vm7977_vm5, 0, %v653_v47  ;;  %v661_v51 = vsel %vm7977_vm5, 0, %v659_v48 }
 0x3d8   :  { %v656_v52 = vsel %vm7985_vm6, %v655_v50, 0  ;;  %v662_v53 = vsel %vm7985_vm6, %v661_v51, 0 }
 0x3d9   :  { %v691_v54 = vrot.slane %v662_v53, 1  ;;  %v684_v55 = vshll.u32 %v662_v53, 16  ;;  %v666_v56 = vshll.u32 %v656_v52, 16  ;;  %v682_v57 = vshrl.u32 %v662_v53, 16 }
 0x3da   :  { %v673_v60 = vrot.slane %v656_v52, 1  ;;  %v664_v62 = vshrl.u32 %v656_v52, 16 }
 0x3db   :  { %692 = vrot.lane.b32.xlu0 %v691_v54, %s7764_s4  ;;  %v686_v58 = vrot.slane %v684_v55, 1  ;;  %v668_v61 = vrot.slane %v666_v56, 1 }
 0x3dd   :  { %v687_v59 = vor.u32 %v686_v58, %v682_v57  ;;  %v669_v63 = vor.u32 %v668_v61, %v664_v62 }
 0x3df   :  { %688 = vrot.lane.b32.xlu1 %v687_v59, %s7762_s27  ;;  %674 = vrot.lane.b32.xlu0 %v673_v60, %s7764_s4 }
 0x3e3   :  { %670 = vrot.lane.b32.xlu1 %v669_v63, %s7762_s27 }
 0x44d   :  { %v693_v0 = vpop.permute.xlu0 %692 }
 0x451   :  { %v689_v1 = vpop.permute.xlu1 %688  ;;  %v675_v7 = vpop.permute.xlu0 %674 }
 0x452   :  { %v695_v2 = vsel %vm676_vm2, %v662_v53, %v689_v1  ;;  %v697_v3 = vsel %vm565_vm12, %v689_v1, %v693_v0 }
 0x453   :  { %v700_v4 = vrot.slane %v695_v2, 4  ;;  %v701_v6 = vrot.slane %v697_v3, 4 }
 0x455   :  { %v671_v8 = vpop.permute.xlu1 %670 }
 0x456   :  { %v678_v9 = vsel %vm676_vm2, %v656_v52, %v671_v8  ;;  %v680_v10 = vsel %vm565_vm12, %v671_v8, %v675_v7 }
 0x457   :  { %v706_v11 = vsel %vm197_vm4, %v680_v10, %v701_v6  ;;  %v703_v12 = vsel %vm197_vm4, %v678_v9, %v700_v4 }
 0x458   :  { %6332 = vmatprep.mubr.msk.bf16.mxu0 %vm797_vm3, %v706_v11 }
 0x459   :  { %833 = vmatmul.mubr.bf16.vlgmr.msra.gmra.mxu0 %v703_v12 }
 0x519   :  { %v834_v13 = vpop.f32.mrf.mxu0 }
 0x51a   :  { %v841_v16 = vmax.f32 %v834_v13, 0.0 }
 0x51b   :  { %v836_v14 = vpop.f32.mrf.mxu0 }
 0x51d   :  { %v837_v15 = vpop.f32.mrf.mxu0 }
 0x51e   :  { %v842_v17 = vmax.f32 %v837_v15, 0.0 }
 0x51f   :  { %v839_v18 = vpop.f32.mrf.mxu0 }
 0x520   :  { %v843_v21 = vpack.c.bf16 %v842_v17, %v841_v16 }
 0x522   :  { %847 = vrot.lane.b32.xlu0 %v843_v21, %s7755_s6  ;;  %845 = vrot.lane.b32.xlu1 %v843_v21, %s7763_s7 }
 0x594   :  { %v848_v36 = vpop.permute.xlu0 %847  ;;  %v846_v38 = vpop.permute.xlu1 %845 }
 0x595   :  { %v851_v39 = vsel %vm168_vm7, %v846_v38, %v848_v36 }
 0x596   :  { %v852_v40 = vsel %vm646_vm1, %v851_v39, %v846_v38 }
 0x597   :  { %v853_v41 = vshrl.u32 %v852_v40, 16  ;;  %v856_v42 = vshll.u32 %v852_v40, 16 }
 0x599   :  { %v855_v44 = vrot.slane %v853_v41, 7  ;;  %v862_v45 = vrot.slane %v853_v41, 3  ;;  %v863_v46 = vrot.slane %v856_v42, 4 }
 0x59b   :  { %v858_v47 = vor.u32 %v856_v42, %v855_v44  ;;  %v864_v48 = vor.u32 %v863_v46, %v862_v45 }
 0x59d   :  { %v860_v50 = vsel %vm7977_vm5, 0, %v858_v47  ;;  %v866_v51 = vsel %vm7977_vm5, 0, %v864_v48 }
 0x59e   :  { %v861_v52 = vsel %vm7985_vm6, %v860_v50, 0  ;;  %v867_v53 = vsel %vm7985_vm6, %v866_v51, 0 }
 0x59f   :  { %v895_v54 = vrot.slane %v867_v53, 1  ;;  %v888_v55 = vshll.u32 %v867_v53, 16  ;;  %v871_v56 = vshll.u32 %v861_v52, 16  ;;  %v886_v57 = vshrl.u32 %v867_v53, 16 }
 0x5a0   :  { %v878_v60 = vrot.slane %v861_v52, 1  ;;  %v869_v62 = vshrl.u32 %v861_v52, 16 }
 0x5a1   :  { %896 = vrot.lane.b32.xlu0 %v895_v54, %s7764_s4  ;;  %v890_v58 = vrot.slane %v888_v55, 1  ;;  %v873_v61 = vrot.slane %v871_v56, 1 }
 0x5a3   :  { %v891_v59 = vor.u32 %v890_v58, %v886_v57  ;;  %v874_v63 = vor.u32 %v873_v61, %v869_v62 }
 0x5a5   :  { %892 = vrot.lane.b32.xlu1 %v891_v59, %s7762_s27  ;;  %879 = vrot.lane.b32.xlu0 %v878_v60, %s7764_s4 }
 0x5a9   :  { %875 = vrot.lane.b32.xlu1 %v874_v63, %s7762_s27 }
 0x613   :  { %v897_v0 = vpop.permute.xlu0 %896 }
 0x617   :  { %v893_v1 = vpop.permute.xlu1 %892  ;;  %v880_v7 = vpop.permute.xlu0 %879 }
 0x618   :  { %v899_v2 = vsel %vm676_vm2, %v867_v53, %v893_v1  ;;  %v901_v3 = vsel %vm565_vm12, %v893_v1, %v897_v0 }
 0x619   :  { %v904_v4 = vrot.slane %v899_v2, 4  ;;  %v905_v6 = vrot.slane %v901_v3, 4 }
 0x61b   :  { %v876_v8 = vpop.permute.xlu1 %875 }
 0x61c   :  { %v882_v9 = vsel %vm676_vm2, %v861_v52, %v876_v8  ;;  %v884_v10 = vsel %vm565_vm12, %v876_v8, %v880_v7 }
 0x61d   :  { %v910_v11 = vsel %vm197_vm4, %v884_v10, %v905_v6  ;;  %v907_v12 = vsel %vm197_vm4, %v882_v9, %v904_v4 }
 0x61e   :  { %6348 = vmatprep.mubr.msk.bf16.mxu1 %vm797_vm3, %v910_v11 }
 0x61f   :  { %1036 = vmatmul.mubr.bf16.vlgmr.msra.gmra.mxu1 %v907_v12 }
 0x6df   :  { %v1037_v13 = vpop.f32.mrf.mxu1 }
 0x6e0   :  { %v8213_v15 = vadd.f32 %v1037_v13, %v8040_v19  ;;  %v7398_v19 = vld [vmem:[%s9934_s0 + $0x38] sm:$0xff]  }
 0x6e1   :  { %v1039_v14 = vpop.f32.mrf.mxu1  ;;  %1267 = vmatpush1.bf16.msra.mxu0 %v7398_v19 }
 0x6e2   :  { %v1044_v21 = vmax.f32 %v8213_v15, 0.0  ;;  %1268 = vmatprep.subr.bf16.mxu0 %v7754_v5 }
 0x6e3   :  { %v1040_v16 = vpop.f32.mrf.mxu1 }
 0x6e4   :  { %v8216_v17 = vadd.f32 %v1040_v16, %v8042_v20  ;;  %v7399_v20 = vld [vmem:[%s9934_s0 + $0x30] sm:$0xff]  }
 0x6e5   :  { %v1042_v18 = vpop.f32.mrf.mxu1  ;;  %1269 = vmatpush1.bf16.msra.mxu0 %v7399_v20 }
 0x6e6   :  { %v1045_v22 = vmax.f32 %v8216_v17, 0.0  ;;  %1270 = vmatprep.subr.bf16.mxu0 %v7754_v5 }
 0x6e8   :  { %v1106_v23 = vpack.c.bf16 %v1045_v22, %v1044_v21 }
 0x6e9   :  { %1271 = vmatpush1.bf16.msra.mxu0 %v7400_v24  ;;  %v7413_v24 = vld [vmem:[%s9935_s28 + $0x38] sm:$0xff]  }
 0x6ea   :  { %1110 = vrot.lane.b32.xlu0 %v1106_v23, %s7755_s6  ;;  %1108 = vrot.lane.b32.xlu1 %v1106_v23, %s7763_s7 }
 0x6eb   :  { %1272 = vmatprep.subr.bf16.mxu0 %v7754_v5  ;;  %1470 = vmatpush1.bf16.msra.mxu1 %v7413_v24 }
 0x6ec   :  { %1471 = vmatprep.subr.bf16.mxu1 %v7754_v5 }
 0x6ed   :  { %1273 = vmatpush1.bf16.msra.mxu0 %v7401_v25  ;;  %v7414_v25 = vld [vmem:[%s9935_s28 + $0x30] sm:$0xff]  }
 0x6ee   :  { %1274 = vmatprep.subr.bf16.mxu0 %v7754_v5 }
 0x6ef   :  { %1472 = vmatpush1.bf16.msra.mxu1 %v7414_v25 }
 0x6f0   :  { %1473 = vmatprep.subr.bf16.mxu1 %v7754_v5 }
 0x6f1   :  { %1275 = vmatpush1.bf16.msra.mxu0 %v7402_v26  ;;  %v7415_v26 = vld [vmem:[%s9935_s28 + $0x28] sm:$0xff]  }
 0x6f2   :  { %1276 = vmatprep.subr.bf16.mxu0 %v7754_v5 }
 0x6f3   :  { %1474 = vmatpush1.bf16.msra.mxu1 %v7415_v26 }
 0x6f4   :  { %1475 = vmatprep.subr.bf16.mxu1 %v7754_v5 }
 0x6f5   :  { %1277 = vmatpush1.bf16.msra.mxu0 %v7403_v27  ;;  %v7416_v27 = vld [vmem:[%s9935_s28 + $0x20] sm:$0xff]  }
 0x6f6   :  { %1278 = vmatprep.subr.bf16.mxu0 %v7754_v5 }
 0x6f7   :  { %1476 = vmatpush1.bf16.msra.mxu1 %v7416_v27 }
 0x6f8   :  { %1477 = vmatprep.subr.bf16.mxu1 %v7754_v5 }
 0x6f9   :  { %1279 = vmatpush1.bf16.msra.mxu0 %v7404_v28  ;;  %v7417_v28 = vld [vmem:[%s9935_s28 + $0x18] sm:$0xff]  }
 0x6fa   :  { %1280 = vmatprep.subr.bf16.mxu0 %v7754_v5 }
 0x6fb   :  { %1478 = vmatpush1.bf16.msra.mxu1 %v7417_v28 }
 0x6fc   :  { %1479 = vmatprep.subr.bf16.mxu1 %v7754_v5 }
 0x6fd   :  { %1281 = vmatpush1.bf16.msra.mxu0 %v7405_v29  ;;  %v7418_v29 = vld [vmem:[%s9935_s28 + $0x10] sm:$0xff]  }
 0x6fe   :  { %1284 = vmatprep.subr.bf16.mxu0 %v7754_v5 }
 0x6ff   :  { %1480 = vmatpush1.bf16.msra.mxu1 %v7418_v29 }
 0x700   :  { %1481 = vmatprep.subr.bf16.mxu1 %v7754_v5 }
 0x701   :  { %1285 = vmatpush2.bf16.msra.mxu0 %v7406_v30  ;;  %v7419_v30 = vld [vmem:[%s9935_s28 + $0x8] sm:$0xff]  }
 0x702   :  { %1286 = vmatprep.subr.bf16.mxu0 %v7754_v5 }
 0x703   :  { %1482 = vmatpush1.bf16.msra.mxu1 %v7419_v30 }
 0x704   :  { %1483 = vmatprep.subr.bf16.mxu1 %v7754_v5 }
 0x705   :  { %1287 = vmatpush2.bf16.msra.mxu0 %v7407_v32  ;;  %v7420_v32 = vld [vmem:[%s9935_s28] sm:$0xff]  }
 0x706   :  { %1288 = vmatprep.subr.bf16.mxu0 %v7754_v5 }
 0x707   :  { %1484 = vmatpush1.bf16.msra.mxu1 %v7420_v32 }
 0x708   :  { %1487 = vmatprep.subr.bf16.mxu1 %v7754_v5 }
 0x709   :  { %1289 = vmatpush2.bf16.msra.mxu0 %v7408_v33  ;;  %v7421_v33 = vld [vmem:[%s9935_s28 + $0x70] sm:$0xff]  }
 0x70a   :  { %1290 = vmatprep.subr.bf16.mxu0 %v7754_v5 }
 0x70b   :  { %1488 = vmatpush2.bf16.msra.mxu1 %v7421_v33 }
 0x70c   :  { %1489 = vmatprep.subr.bf16.mxu1 %v7754_v5 }
 0x70d   :  { %1291 = vmatpush2.bf16.msra.mxu0 %v7409_v34  ;;  %v7422_v34 = vld [vmem:[%s9935_s28 + $0x68] sm:$0xff]  }
 0x70e   :  { %1292 = vmatprep.subr.bf16.mxu0 %v7754_v5 }
 0x70f   :  { %1490 = vmatpush2.bf16.msra.mxu1 %v7422_v34 }
 0x710   :  { %1491 = vmatprep.subr.bf16.mxu1 %v7754_v5 }
 0x711   :  { %1293 = vmatpush2.bf16.msra.mxu0 %v7410_v35  ;;  %v7423_v35 = vld [vmem:[%s9935_s28 + $0x60] sm:$0xff]  }
 0x712   :  { %1294 = vmatprep.subr.bf16.mxu0 %v7754_v5 }
 0x713   :  { %1492 = vmatpush2.bf16.msra.mxu1 %v7423_v35 }
 0x714   :  { %1493 = vmatprep.subr.bf16.mxu1 %v7754_v5 }
 0x715   :  { %1295 = vmatpush2.bf16.msra.mxu0 %v7411_v43 }
 0x716   :  { %1296 = vmatprep.subr.bf16.mxu0 %v7754_v5 }
 0x719   :  { %1297 = vmatpush2.bf16.msra.mxu0 %v7412_v49 }
 0x71a   :  { %1746 = vmatprep.subr.bf16.mxu0 %v7754_v5 }
 0x75c   :  { %v1111_v36 = vpop.permute.xlu0 %1110  ;;  %v1109_v38 = vpop.permute.xlu1 %1108 }
 0x75d   :  { %v1114_v39 = vsel %vm168_vm7, %v1109_v38, %v1111_v36  ;;  %v7424_v36 = vld [vmem:[%s9935_s28 + $0x58] sm:$0xff]  }
 0x75e   :  { %v1115_v40 = vsel %vm646_vm1, %v1114_v39, %v1109_v38  ;;  %1494 = vmatpush2.bf16.msra.mxu1 %v7424_v36  ;;  %v7425_v38 = vld [vmem:[%s9935_s28 + $0x50] sm:$0xff]  }
 0x75f   :  { %v1116_v41 = vshrl.u32 %v1115_v40, 16  ;;  %v1119_v42 = vshll.u32 %v1115_v40, 16  ;;  %1495 = vmatprep.subr.bf16.mxu1 %v7754_v5 }
 0x761   :  { %v1118_v44 = vrot.slane %v1116_v41, 7  ;;  %v1125_v45 = vrot.slane %v1116_v41, 3  ;;  %v1126_v46 = vrot.slane %v1119_v42, 4 }
 0x762   :  { %1496 = vmatpush2.bf16.msra.mxu1 %v7425_v38 }
 0x763   :  { %v1121_v47 = vor.u32 %v1119_v42, %v1118_v44  ;;  %v1127_v48 = vor.u32 %v1126_v46, %v1125_v45  ;;  %1497 = vmatprep.subr.bf16.mxu1 %v7754_v5  ;;  %v7426_v45 = vld [vmem:[%s9935_s28 + $0x48] sm:$0xff]  }
 0x765   :  { %v1123_v50 = vsel %vm7977_vm5, 0, %v1121_v47  ;;  %v1129_v51 = vsel %vm7977_vm5, 0, %v1127_v48 }
 0x766   :  { %v1124_v52 = vsel %vm7985_vm6, %v1123_v50, 0  ;;  %v1130_v53 = vsel %vm7985_vm6, %v1129_v51, 0  ;;  %1498 = vmatpush2.bf16.msra.mxu1 %v7426_v45  ;;  %v7427_v51 = vld [vmem:[%s9935_s28 + $0x40] sm:$0xff]   ;;  %s9936_s28 = sld [smem:[#allocation11_spill]] }
 0x767   :  { %v1158_v54 = vrot.slane %v1130_v53, 1  ;;  %v1151_v55 = vshll.u32 %v1130_v53, 16  ;;  %v1134_v56 = vshll.u32 %v1124_v52, 16  ;;  %v1149_v57 = vshrl.u32 %v1130_v53, 16  ;;  %1499 = vmatprep.subr.bf16.mxu1 %v7754_v5 }
 0x768   :  { %v1141_v60 = vrot.slane %v1124_v52, 1  ;;  %v1132_v62 = vshrl.u32 %v1124_v52, 16 }
 0x769   :  { %1159 = vrot.lane.b32.xlu0 %v1158_v54, %s7764_s4  ;;  %v1153_v58 = vrot.slane %v1151_v55, 1  ;;  %v1136_v61 = vrot.slane %v1134_v56, 1 }
 0x76a   :  { %1500 = vmatpush2.bf16.msra.mxu1 %v7427_v51 }
 0x76b   :  { %v1154_v59 = vor.u32 %v1153_v58, %v1149_v57  ;;  %v1137_v63 = vor.u32 %v1136_v61, %v1132_v62  ;;  %v7765_v61 = vmov 0.0  }
 0x76c   :  { %7123 = vmatprep.subr.bf16.mxu1 %v7765_v61  ;;  %v7432_v15 = vld [vmem:[%s9936_s28 + $0x38] sm:$0xff]   ;;  %v7433_v17 = vld [vmem:[%s9936_s28 + $0x30] sm:$0xff]   ;;  %v7438_v36 = vld [vmem:[%s9936_s28 + $0x8] sm:$0xff]  }
 0x76d   :  { %1155 = vrot.lane.b32.xlu1 %v1154_v59, %s7762_s27  ;;  %1142 = vrot.lane.b32.xlu0 %v1141_v60, %s7764_s4  ;;  %v7436_v34 = vld [vmem:[%s9936_s28 + $0x18] sm:$0xff]   ;;  %v7437_v35 = vld [vmem:[%s9936_s28 + $0x10] sm:$0xff]  }
 0x76e   :  { %v7439_v38 = vld [vmem:[%s9936_s28] sm:$0xff]  }
 0x771   :  { %1138 = vrot.lane.b32.xlu1 %v1137_v63, %s7762_s27 }
 0x7db   :  { %v1160_v0 = vpop.permute.xlu0 %1159 }
 0x7df   :  { %v1156_v1 = vpop.permute.xlu1 %1155  ;;  %v1143_v7 = vpop.permute.xlu0 %1142 }
 0x7e0   :  { %v1162_v2 = vsel %vm676_vm2, %v1130_v53, %v1156_v1  ;;  %v1164_v3 = vsel %vm565_vm12, %v1156_v1, %v1160_v0 }
 0x7e1   :  { %v1167_v4 = vrot.slane %v1162_v2, 4  ;;  %v1168_v6 = vrot.slane %v1164_v3, 4 }
 0x7e3   :  { %v1139_v8 = vpop.permute.xlu1 %1138 }
 0x7e4   :  { %v1145_v9 = vsel %vm676_vm2, %v1124_v52, %v1139_v8  ;;  %v1147_v10 = vsel %vm565_vm12, %v1139_v8, %v1143_v7 }
 0x7e5   :  { %v1173_v11 = vsel %vm197_vm4, %v1147_v10, %v1168_v6  ;;  %v1170_v12 = vsel %vm197_vm4, %v1145_v9, %v1167_v4 }
 0x7e6   :  { %6364 = vmatprep.mubr.msk.bf16.mxu0 %vm797_vm3, %v1173_v11 }
 0x7e7   :  { %1299 = vmatmul.mubr.bf16.vlgmr.msra.gmra.mxu0 %v1170_v12 }
 0x7e8   :  { %1747 = vmatpush1.bf16.msra.mxu0 %v7432_v15 }
 0x7e9   :  { %1748 = vmatprep.subr.bf16.mxu0 %v7754_v5 }
 0x7ec   :  { %1749 = vmatpush1.bf16.msra.mxu0 %v7433_v17 }
 0x7ed   :  { %1750 = vmatprep.subr.bf16.mxu0 %v7754_v5 }
 0x8a7   :  { %v1300_v13 = vpop.f32.mrf.mxu0 }
 0x8a8   :  { %v1307_v18 = vmax.f32 %v1300_v13, 0.0 }
 0x8a9   :  { %v1302_v14 = vpop.f32.mrf.mxu0 }
 0x8aa   :  { %v7428_v14 = vld [vmem:[%s9894_s8 + $0x18] sm:$0xff]  }
 0x8ab   :  { %v1303_v16 = vpop.f32.mrf.mxu0 }
 0x8ac   :  { %v1308_v23 = vmax.f32 %v1303_v16, 0.0 }
 0x8ad   :  { %v1305_v19 = vpop.f32.mrf.mxu0 }
 0x8ae   :  { %v1309_v20 = vpack.c.bf16 %v1308_v23, %v1307_v18  ;;  %v7429_v23 = vld [vmem:[%s9894_s8 + $0x10] sm:$0xff]   ;;  %v7430_v19 = vld [vmem:[%s9894_s8 + $0x8] sm:$0xff]  }
 0x8b0   :  { %1313 = vrot.lane.b32.xlu0 %v1309_v20, %s7755_s6  ;;  %1311 = vrot.lane.b32.xlu1 %v1309_v20, %s7763_s7  ;;  %v7431_v20 = vld [vmem:[%s9894_s8] sm:$0xff]  }
 0x922   :  { %v1314_v39 = vpop.permute.xlu0 %1313  ;;  %v1312_v40 = vpop.permute.xlu1 %1311 }
 0x923   :  { %v1317_v41 = vsel %vm168_vm7, %v1312_v40, %v1314_v39  ;;  %v7440_v39 = vld [vmem:[%s9936_s28 + $0x70] sm:$0xff]  }
 0x924   :  { %v1318_v42 = vsel %vm646_vm1, %v1317_v41, %v1312_v40  ;;  %v7441_v40 = vld [vmem:[%s9936_s28 + $0x68] sm:$0xff]   ;;  %v7442_v41 = vld [vmem:[%s9936_s28 + $0x60] sm:$0xff]  }
 0x925   :  { %v1319_v43 = vshrl.u32 %v1318_v42, 16  ;;  %v1322_v44 = vshll.u32 %v1318_v42, 16  ;;  %v7443_v42 = vld [vmem:[%s9936_s28 + $0x58] sm:$0xff]  }
 0x927   :  { %v1321_v46 = vrot.slane %v1319_v43, 7  ;;  %v1328_v47 = vrot.slane %v1319_v43, 3  ;;  %v1329_v48 = vrot.slane %v1322_v44, 4  ;;  %v7444_v43 = vld [vmem:[%s9936_s28 + $0x50] sm:$0xff]  }
 0x929   :  { %v1324_v49 = vor.u32 %v1322_v44, %v1321_v46  ;;  %v1330_v50 = vor.u32 %v1329_v48, %v1328_v47 }
 0x92b   :  { %v1326_v52 = vsel %vm7977_vm5, 0, %v1324_v49  ;;  %v1332_v53 = vsel %vm7977_vm5, 0, %v1330_v50  ;;  %v7445_v50 = vld [vmem:[%s9936_s28 + $0x48] sm:$0xff]  }
 0x92c   :  { %v1327_v54 = vsel %vm7985_vm6, %v1326_v52, 0  ;;  %v1333_v55 = vsel %vm7985_vm6, %v1332_v53, 0 }
 0x92d   :  { %v1361_v56 = vrot.slane %v1333_v55, 1  ;;  %v1354_v57 = vshll.u32 %v1333_v55, 16  ;;  %v1337_v58 = vshll.u32 %v1327_v54, 16  ;;  %v1352_v59 = vshrl.u32 %v1333_v55, 16 }
 0x92e   :  { %v1344_v63 = vrot.slane %v1327_v54, 1  ;;  %v1335_v1 = vshrl.u32 %v1327_v54, 16 }
 0x92f   :  { %1362 = vrot.lane.b32.xlu0 %v1361_v56, %s7764_s4  ;;  %v1356_v60 = vrot.slane %v1354_v57, 1  ;;  %v1339_v0 = vrot.slane %v1337_v58, 1  ;;  %v7446_v56 = vld [vmem:[%s9936_s28 + $0x40] sm:$0xff]  }
 0x931   :  { %v1357_v62 = vor.u32 %v1356_v60, %v1352_v59  ;;  %v1340_v2 = vor.u32 %v1339_v0, %v1335_v1 }
 0x933   :  { %1358 = vrot.lane.b32.xlu1 %v1357_v62, %s7762_s27  ;;  %1345 = vrot.lane.b32.xlu0 %v1344_v63, %s7764_s4 }
 0x937   :  { %1341 = vrot.lane.b32.xlu1 %v1340_v2, %s7762_s27 }
 0x9a1   :  { %v1363_v3 = vpop.permute.xlu0 %1362 }
 0x9a5   :  { %v1359_v4 = vpop.permute.xlu1 %1358  ;;  %v1346_v10 = vpop.permute.xlu0 %1345 }
 0x9a6   :  { %v1365_v6 = vsel %vm676_vm2, %v1333_v55, %v1359_v4  ;;  %v1367_v7 = vsel %vm565_vm12, %v1359_v4, %v1363_v3 }
 0x9a7   :  { %v1370_v8 = vrot.slane %v1365_v6, 4  ;;  %v1371_v9 = vrot.slane %v1367_v7, 4 }
 0x9a9   :  { %v1342_v11 = vpop.permute.xlu1 %1341 }
 0x9aa   :  { %v1348_v12 = vsel %vm676_vm2, %v1327_v54, %v1342_v11  ;;  %v1350_v13 = vsel %vm565_vm12, %v1342_v11, %v1346_v10 }
 0x9ab   :  { %v1376_v16 = vsel %vm197_vm4, %v1350_v13, %v1371_v9  ;;  %v1373_v18 = vsel %vm197_vm4, %v1348_v12, %v1370_v8 }
 0x9ac   :  { %6380 = vmatprep.mubr.msk.bf16.mxu1 %vm797_vm3, %v1376_v16 }
 0x9ad   :  { %1502 = vmatmul.mubr.bf16.vlgmr.msra.gmra.mxu1 %v1373_v18 }
 0x9ae   :  { %7124 = vmatpush3.bf16.msra.mxu1 %v7428_v14  ;;  %7131 = vmatprep.mubr.msk.bf16.mxu1 %vm7766_vm9, %v7765_v61 }
 0x9af   :  { %7125 = vmatprep.subr.bf16.mxu1 %v7765_v61 }
 0x9b2   :  { %7126 = vmatpush3.bf16.msra.mxu1 %v7429_v23 }
 0x9b3   :  { %7127 = vmatprep.subr.bf16.mxu1 %v7765_v61 }
 0x9b6   :  { %7128 = vmatpush3.bf16.msra.mxu1 %v7430_v19 }
 0x9b7   :  { %7129 = vmatprep.subr.bf16.mxu1 %v7765_v61 }
 0x9ba   :  { %7130 = vmatpush3.bf16.msra.mxu1 %v7431_v20 }
 0xa6d   :  { %v1503_v24 = vpop.f32.mrf.mxu1 }
 0xa6e   :  { %v1504_v26 = vadd.f32 %v1503_v24, %v1044_v21  ;;  %v7434_v21 = vld [vmem:[%s9936_s28 + $0x28] sm:$0xff]  }
 0xa6f   :  { %v1505_v25 = vpop.f32.mrf.mxu1  ;;  %1751 = vmatpush1.bf16.msra.mxu0 %v7434_v21  ;;  %v7447_v21 = vld [vmem:[%s9937_s29 + $0x78] sm:$0xff]  }
 0xa70   :  { %v1510_v30 = vmax.f32 %v1504_v26, 0.0  ;;  %1752 = vmatprep.subr.bf16.mxu0 %v7754_v5  ;;  %6733 = vmatprep.subr.bf16.mxu1 %v7447_v21 }
 0xa71   :  { %v1506_v27 = vpop.f32.mrf.mxu1 }
 0xa72   :  { %v1507_v28 = vadd.f32 %v1506_v27, %v1045_v22  ;;  %v7435_v22 = vld [vmem:[%s9936_s28 + $0x20] sm:$0xff]  }
 0xa73   :  { %v1508_v29 = vpop.f32.mrf.mxu1  ;;  %1753 = vmatpush1.bf16.msra.mxu0 %v7435_v22  ;;  %v7448_v22 = vld [vmem:[%s9937_s29 + $0x38] sm:$0xff]  }
 0xa74   :  { %v1511_v32 = vmax.f32 %v1507_v28, 0.0  ;;  %1754 = vmatprep.subr.bf16.mxu0 %v7754_v5 }
 0xa76   :  { %v1586_v33 = vpack.c.bf16 %v1511_v32, %v1510_v30 }
 0xa77   :  { %1755 = vmatpush1.bf16.msra.mxu0 %v7436_v34  ;;  %v7449_v34 = vld [vmem:[%s9937_s29 + $0x70] sm:$0xff]  }
 0xa78   :  { %1590 = vrot.lane.b32.xlu0 %v1586_v33, %s7755_s6  ;;  %1588 = vrot.lane.b32.xlu1 %v1586_v33, %s7763_s7  ;;  %s7767_s7 = smov 64  }
 0xa79   :  { %7132 = vmatmul.mubr.msk.bf16.vlgmr.msra.gmra.mxu1 %vm1830_vm10, %v1586_v33  ;;  %1756 = vmatprep.subr.bf16.mxu0 %v7754_v5 }
 0xa7a   :  { %6734 = vmatpush3.bf16.msra.mxu1 %v7448_v22 }
 0xa7b   :  { %1757 = vmatpush1.bf16.msra.mxu0 %v7437_v35  ;;  %v7450_v35 = vld [vmem:[%s9937_s29 + $0x30] sm:$0xff]   ;;  %6735 = vmatprep.subr.bf16.mxu1 %v7449_v34 }
 0xa7c   :  { %1758 = vmatprep.subr.bf16.mxu0 %v7754_v5 }
 0xa7e   :  { %6736 = vmatpush3.bf16.msra.mxu1 %v7450_v35 }
 0xa7f   :  { %1759 = vmatpush1.bf16.msra.mxu0 %v7438_v36  ;;  %v7451_v36 = vld [vmem:[%s9937_s29 + $0x68] sm:$0xff]  }
 0xa80   :  { %1760 = vmatprep.subr.bf16.mxu0 %v7754_v5  ;;  %6737 = vmatprep.subr.bf16.mxu1 %v7451_v36 }
 0xa83   :  { %1761 = vmatpush1.bf16.msra.mxu0 %v7439_v38  ;;  %v7452_v38 = vld [vmem:[%s9937_s29 + $0x28] sm:$0xff]  }
 0xa84   :  { %1764 = vmatprep.subr.bf16.mxu0 %v7754_v5  ;;  %6738 = vmatpush3.bf16.msra.mxu1 %v7452_v38 }
 0xa87   :  { %1765 = vmatpush2.bf16.msra.mxu0 %v7440_v39  ;;  %v7453_v39 = vld [vmem:[%s9937_s29 + $0x60] sm:$0xff]  }
 0xa88   :  { %1766 = vmatprep.subr.bf16.mxu0 %v7754_v5  ;;  %6739 = vmatprep.subr.bf16.mxu1 %v7453_v39 }
 0xa8b   :  { %1767 = vmatpush2.bf16.msra.mxu0 %v7441_v40  ;;  %v7454_v40 = vld [vmem:[%s9937_s29 + $0x20] sm:$0xff]  }
 0xa8c   :  { %1768 = vmatprep.subr.bf16.mxu0 %v7754_v5  ;;  %6740 = vmatpush3.bf16.msra.mxu1 %v7454_v40 }
 0xa8f   :  { %1769 = vmatpush2.bf16.msra.mxu0 %v7442_v41  ;;  %v7455_v41 = vld [vmem:[%s9937_s29 + $0x58] sm:$0xff]  }
 0xa90   :  { %1770 = vmatprep.subr.bf16.mxu0 %v7754_v5  ;;  %6741 = vmatprep.subr.bf16.mxu1 %v7455_v41 }
 0xa93   :  { %1771 = vmatpush2.bf16.msra.mxu0 %v7443_v42  ;;  %v7456_v42 = vld [vmem:[%s9937_s29 + $0x18] sm:$0xff]  }
 0xa94   :  { %1772 = vmatprep.subr.bf16.mxu0 %v7754_v5  ;;  %6742 = vmatpush3.bf16.msra.mxu1 %v7456_v42 }
 0xa97   :  { %1773 = vmatpush2.bf16.msra.mxu0 %v7444_v43  ;;  %v7457_v43 = vld [vmem:[%s9937_s29 + $0x50] sm:$0xff]  }
 0xa98   :  { %1774 = vmatprep.subr.bf16.mxu0 %v7754_v5  ;;  %6743 = vmatprep.subr.bf16.mxu1 %v7457_v43 }
 0xa9b   :  { %1775 = vmatpush2.bf16.msra.mxu0 %v7445_v50 }
 0xa9c   :  { %1776 = vmatprep.subr.bf16.mxu0 %v7754_v5 }
 0xa9f   :  { %1777 = vmatpush2.bf16.msra.mxu0 %v7446_v56  ;;  %v7461_v56 = vld [vmem:[%s9937_s29 + $0x40] sm:$0xff]  }
 0xaea   :  { %v1591_v44 = vpop.permute.xlu0 %1590  ;;  %v1589_v45 = vpop.permute.xlu1 %1588 }
 0xaeb   :  { %v1594_v46 = vsel %vm168_vm7, %v1589_v45, %v1591_v44  ;;  %v7458_v44 = vld [vmem:[%s9937_s29 + $0x10] sm:$0xff]   ;;  %vm1827_vm7 = vcmask 785408  }
 0xaec   :  { %v1595_v47 = vsel %vm646_vm1, %v1594_v46, %v1589_v45  ;;  %6744 = vmatpush3.bf16.msra.mxu1 %v7458_v44 }
 0xaed   :  { %v1596_v48 = vshrl.u32 %v1595_v47, 16  ;;  %v1599_v49 = vshll.u32 %v1595_v47, 16  ;;  %v7459_v47 = vld [vmem:[%s9937_s29 + $0x48] sm:$0xff]  }
 0xaee   :  { %6745 = vmatprep.subr.bf16.mxu1 %v7459_v47 }
 0xaef   :  { %v1598_v51 = vrot.slane %v1596_v48, 7  ;;  %v1605_v52 = vrot.slane %v1596_v48, 3  ;;  %v1606_v53 = vrot.slane %v1599_v49, 4  ;;  %v7460_v48 = vld [vmem:[%s9937_s29 + $0x8] sm:$0xff]  }
 0xaf0   :  { %6746 = vmatpush3.bf16.msra.mxu1 %v7460_v48  ;;  %v7467_v48 = vld [vmem:[%s9895_s9 + $0x70] sm:$0xff]  }
 0xaf1   :  { %v1601_v54 = vor.u32 %v1599_v49, %v1598_v51  ;;  %v1607_v55 = vor.u32 %v1606_v53, %v1605_v52  ;;  %6747 = vmatprep.subr.bf16.mxu1 %v7461_v56  ;;  %v7474_v56 = vld [vmem:[%s9895_s9 + $0x18] sm:$0xff]  }
 0xaf3   :  { %v1603_v57 = vsel %vm7977_vm5, 0, %v1601_v54  ;;  %v1609_v58 = vsel %vm7977_vm5, 0, %v1607_v55 }
 0xaf4   :  { %v1604_v59 = vsel %vm7985_vm6, %v1603_v57, 0  ;;  %v1610_v60 = vsel %vm7985_vm6, %v1609_v58, 0  ;;  %v7462_v57 = vld [vmem:[%s9937_s29] sm:$0xff]  }
 0xaf5   :  { %v1638_v5 = vrot.slane %v1610_v60, 1  ;;  %v1631_v62 = vshll.u32 %v1610_v60, 16  ;;  %v1614_v63 = vshll.u32 %v1604_v59, 16  ;;  %v1629_v0 = vshrl.u32 %v1610_v60, 16  ;;  %6748 = vmatpush3.bf16.msra.mxu1 %v7462_v57  ;;  %v7476_v57 = vld [vmem:[%s9895_s9 + $0x50] sm:$0xff]  }
 0xaf6   :  { %v1621_v3 = vrot.slane %v1604_v59, 1  ;;  %v1612_v6 = vshrl.u32 %v1604_v59, 16  ;;  %7135 = vmatprep.subr.bf16.mxu1 %v7765_v61 }
 0xaf7   :  { %1639 = vrot.lane.b32.xlu0 %v1638_v5, %s7764_s4  ;;  %v1633_v1 = vrot.slane %v1631_v62, 1  ;;  %v1616_v4 = vrot.slane %v1614_v63, 1 }
 0xaf9   :  { %v1634_v2 = vor.u32 %v1633_v1, %v1629_v0  ;;  %v1617_v7 = vor.u32 %v1616_v4, %v1612_v6 }
 0xafb   :  { %1635 = vrot.lane.b32.xlu1 %v1634_v2, %s7762_s27  ;;  %1622 = vrot.lane.b32.xlu0 %v1621_v3, %s7764_s4 }
 0xaff   :  { %1618 = vrot.lane.b32.xlu1 %v1617_v7, %s7762_s27 }
 0xb39   :  { %v8487_v8 = vpop.f32.mrf.mxu1 }
 0xb3b   :  { %v7133_v9 = vpop.f32.mrf.mxu1 }
 0xb3d   :  { %v8489_v10 = vpop.f32.mrf.mxu1 }
 0xb3f   :  { %v7134_v11 = vpop.f32.mrf.mxu1 }
 0xb69   :  { %v1640_v12 = vpop.permute.xlu0 %1639 }
 0xb6d   :  { %v1636_v13 = vpop.permute.xlu1 %1635  ;;  %v1623_v19 = vpop.permute.xlu0 %1622 }
 0xb6e   :  { %v1642_v14 = vsel %vm676_vm2, %v1610_v60, %v1636_v13  ;;  %v1644_v16 = vsel %vm565_vm12, %v1636_v13, %v1640_v12 }
 0xb6f   :  { %v1647_v18 = vrot.slane %v1642_v14, 4  ;;  %v1648_v23 = vrot.slane %v1644_v16, 4 }
 0xb71   :  { %v1619_v20 = vpop.permute.xlu1 %1618 }
 0xb72   :  { %v1625_v24 = vsel %vm676_vm2, %v1604_v59, %v1619_v20  ;;  %v1627_v25 = vsel %vm565_vm12, %v1619_v20, %v1623_v19 }
 0xb73   :  { %v1653_v26 = vsel %vm197_vm4, %v1627_v25, %v1648_v23  ;;  %v1650_v27 = vsel %vm197_vm4, %v1625_v24, %v1647_v18 }
 0xb74   :  { %6396 = vmatprep.mubr.msk.bf16.mxu0 %vm797_vm3, %v1653_v26 }
 0xb75   :  { %1779 = vmatmul.mubr.bf16.vlgmr.msra.gmra.mxu0 %v1650_v27  ;;  %v7463_v27 = vld [vmem:[%s9937_s29 + $0x88] sm:$0xff]  }
 0xc35   :  { %v1780_v28 = vpop.f32.mrf.mxu0 }
 0xc36   :  { %v1787_v32 = vmax.f32 %v1780_v28, 0.0 }
 0xc37   :  { %v1782_v29 = vpop.f32.mrf.mxu0 }
 0xc39   :  { %v1783_v30 = vpop.f32.mrf.mxu0 }
 0xc3a   :  { %v1788_v33 = vmax.f32 %v1783_v30, 0.0  ;;  %v7464_v30 = vld [vmem:[%s9937_s29 + $0x80] sm:$0xff]  }
 0xc3b   :  { %v1785_v15 = vpop.f32.mrf.mxu0 }
 0xc3c   :  { %v1789_v17 = vpack.c.bf16 %v1788_v33, %v1787_v32 }
 0xc3e   :  { %1793 = vrot.lane.b32.xlu0 %v1789_v17, %s7756_s24  ;;  %1791 = vrot.lane.b32.xlu1 %v1789_v17, %s7762_s27 }
 0xcb0   :  { %v1794_v45 = vpop.permute.xlu0 %1793  ;;  %v1792_v46 = vpop.permute.xlu1 %1791 }
 0xcb1   :  { %v1797_v49 = vsel %vm171_vm8, %v1792_v46, %v1794_v45 }
 0xcb2   :  { %v1798_v50 = vsel %vm676_vm2, %v1797_v49, %v1792_v46  ;;  %v7468_v49 = vld [vmem:[%s9895_s9 + $0x30] sm:$0xff]  }
 0xcb3   :  { %v1799_v51 = vshrl.u32 %v1798_v50, 16  ;;  %v1802_v52 = vshll.u32 %v1798_v50, 16  ;;  %v7475_v50 = vld [vmem:[%s9895_s9 + $0x88] sm:$0xff]  }
 0xcb5   :  { %v1801_v53 = vrot.slane %v1799_v51, 7  ;;  %v1808_v54 = vrot.slane %v1799_v51, 3  ;;  %v1809_v55 = vrot.slane %v1802_v52, 4  ;;  %v7469_v51 = vld [vmem:[%s9895_s9 + $0x68] sm:$0xff]  }
 0xcb7   :  { %v1804_v58 = vor.u32 %v1802_v52, %v1801_v53  ;;  %v1810_v59 = vor.u32 %v1809_v55, %v1808_v54  ;;  %v7470_v52 = vld [vmem:[%s9895_s9 + $0x28] sm:$0xff]   ;;  %v7471_v53 = vld [vmem:[%s9895_s9 + $0x60] sm:$0xff]   ;;  %v7473_v55 = vld [vmem:[%s9895_s9 + $0x58] sm:$0xff]  }
 0xcb8   :  { %v7472_v54 = vld [vmem:[%s9895_s9 + $0x20] sm:$0xff]  }
 0xcb9   :  { %v1806_v60 = vsel %vm7977_vm5, 0, %v1804_v58  ;;  %v1812_v5 = vsel %vm7977_vm5, 0, %v1810_v59  ;;  %v7477_v58 = vld [vmem:[%s9895_s9 + $0x10] sm:$0xff]  }
 0xcba   :  { %v1807_v62 = vsel %vm7985_vm6, %v1806_v60, 0  ;;  %v1813_v63 = vsel %vm7985_vm6, %v1812_v5, 0  ;;  %v7478_v5 = vld [vmem:[%s9895_s9 + $0x80] sm:$0xff]  }
 0xcbb   :  { %v1843_v0 = vrot.slane %v1813_v63, 1  ;;  %v1836_v1 = vshll.u32 %v1813_v63, 16  ;;  %v1817_v2 = vshll.u32 %v1807_v62, 16  ;;  %v1834_v3 = vshrl.u32 %v1813_v63, 16 }
 0xcbc   :  { %v1824_v7 = vrot.slane %v1807_v62, 1  ;;  %v1815_v11 = vshrl.u32 %v1807_v62, 16 }
 0xcbd   :  { %1844 = vrot.lane.b32.xlu0 %v1843_v0, %s7767_s7  ;;  %v1838_v4 = vrot.slane %v1836_v1, 1  ;;  %v1819_v9 = vrot.slane %v1817_v2, 1 }
 0xcbf   :  { %v1839_v6 = vor.u32 %v1838_v4, %v1834_v3  ;;  %v1820_v12 = vor.u32 %v1819_v9, %v1815_v11  ;;  %v7480_v3 = vld [vmem:[%s9895_s9 + $0x8] sm:$0xff]   ;;  %v7481_v9 = vld [vmem:[%s9895_s9 + $0x40] sm:$0xff]  }
 0xcc1   :  { %1840 = vrot.lane.b32.xlu1 %v1839_v6, %s7760_s26  ;;  %1825 = vrot.lane.b32.xlu0 %v1824_v7, %s7767_s7 }
 0xcc5   :  { %1821 = vrot.lane.b32.xlu1 %v1820_v12, %s7760_s26 }
 0xd2f   :  { %v1845_v13 = vpop.permute.xlu0 %1844 }
 0xd30   :  { %v1854_v32 = vrot.slane %v1845_v13, 4 }
 0xd33   :  { %v1841_v14 = vpop.permute.xlu1 %1840  ;;  %v1826_v20 = vpop.permute.xlu0 %1825 }
 0xd34   :  { %v1847_v16 = vsel %vm1827_vm7, %v1813_v63, %v1841_v14  ;;  %v1849_v18 = vsel %vm1830_vm10, %v1841_v14, %v1845_v13  ;;  %v1862_v33 = vsel %vm197_vm4, %v1826_v20, %v1854_v32  ;;  %v7482_v13 = vld [vmem:[%s9895_s9] sm:$0xff]  }
 0xd35   :  { %v1852_v23 = vrot.slane %v1847_v16, 4  ;;  %v1853_v19 = vrot.slane %v1849_v18, 4 }
 0xd37   :  { %v1822_v24 = vpop.permute.xlu1 %1821 }
 0xd38   :  { %v1829_v25 = vsel %vm1827_vm7, %v1807_v62, %v1822_v24  ;;  %v1832_v26 = vsel %vm1830_vm10, %v1822_v24, %v1826_v20  ;;  %v7479_v62 = vld [vmem:[%s9895_s9 + $0x48] sm:$0xff]  }
 0xd39   :  { %v1859_v28 = vsel %vm197_vm4, %v1832_v26, %v1853_v19  ;;  %v1856_v29 = vsel %vm197_vm4, %v1829_v25, %v1852_v23 }
 0xd3a   :  { %2073 = vmatprep.mubr.bf16.mxu1 %v1859_v28 }
 0xd3b   :  { %2074 = vmatmul.mubr.bf16.vlgmr.msra.gmra.mxu1 %v1856_v29 }
 0xd3c   :  { %7136 = vmatpush3.bf16.msra.mxu1 %v7463_v27  ;;  %7139 = vmatprep.mubr.msk.bf16.mxu1 %vm7766_vm9, %v7765_v61 }
 0xd3d   :  { %7137 = vmatprep.subr.bf16.mxu1 %v7765_v61 }
 0xd40   :  { %7138 = vmatpush3.bf16.msra.mxu1 %v7464_v30 }
 0xd41   :  { %7143 = vmatprep.subr.bf16.mxu1 %v7765_v61 }
 0xd43   :  { %7140 = vmatmul.mubr.msk.bf16.vlgmr.msra.gmra.mxu1 %vm565_vm12, %v1862_v33 }
 0xd44   :  { %7147 = vmatprep.mubr.msk.bf16.mxu1 %vm7766_vm9, %v7765_v61  ;;  %7144 = vmatpush3.bf16.msra.mxu1 %v7475_v50 }
 0xd45   :  { %7145 = vmatprep.subr.bf16.mxu1 %v7765_v61 }
 0xd48   :  { %7146 = vmatpush3.bf16.msra.mxu1 %v7478_v5  ;;  %v7483_v5 = vld [vmem:[%s9896_s10 + $0x78] sm:$0xff]  }
 0xd49   :  { %6783 = vmatprep.subr.bf16.mxu1 %v7483_v5 }
 0xdfb   :  { %v6749_v15 = vpop.f32.mrf.mxu1 }
 0xdfd   :  { %v6750_v17 = vpop.f32.mrf.mxu1 }
 0xdfe   :  { %v6751_v22 = vadd.f32 %v6750_v17, %v6749_v15 }
 0xdff   :  { %v6752_v21 = vpop.f32.mrf.mxu1 }
 0xe00   :  { %v2076_v38 = vadd.f32 %v6751_v22, %v8487_v8  ;;  %v7465_v8 = vld [vmem:[%s9895_s9 + $0x78] sm:$0xff]  }
 0xe01   :  { %v6753_v34 = vpop.f32.mrf.mxu1  ;;  %6758 = vmatprep.subr.bf16.mxu0 %v7465_v8 }
 0xe02   :  { %v6754_v35 = vadd.f32 %v6753_v34, %v6752_v21 }
 0xe03   :  { %v2116_v36 = vpop.f32.mrf.mxu1 }
 0xe04   :  { %v8584_v40 = vadd.f32 %v2116_v36, %v2076_v38  ;;  %v2079_v41 = vadd.f32 %v6754_v35, %v8489_v10  ;;  %v7466_v10 = vld [vmem:[%s9895_s9 + $0x38] sm:$0xff]  }
 0xe05   :  { %v7141_v39 = vpop.f32.mrf.mxu1  ;;  %6759 = vmatpush3.bf16.msra.mxu0 %v7466_v10 }
 0xe06   :  { %v2123_v45 = vmax.f32 %v8584_v40, 0.0  ;;  %6760 = vmatprep.subr.bf16.mxu0 %v7467_v48  ;;  %v7501_v40 = vld [vmem:[%s9897_s11 + $0x78] sm:$0xff]  }
 0xe07   :  { %v2119_v42 = vpop.f32.mrf.mxu1 }
 0xe08   :  { %v8587_v43 = vadd.f32 %v2119_v42, %v2079_v41 }
 0xe09   :  { %v7142_v44 = vpop.f32.mrf.mxu1  ;;  %6761 = vmatpush3.bf16.msra.mxu0 %v7468_v49 }
 0xe0a   :  { %v2124_v46 = vmax.f32 %v8587_v43, 0.0  ;;  %6762 = vmatprep.subr.bf16.mxu0 %v7469_v51  ;;  %v7502_v43 = vld [vmem:[%s9897_s11 + $0x38] sm:$0xff]  }
 0xe0c   :  { %v2197_v47 = vpack.c.bf16 %v2124_v46, %v2123_v45 }
 0xe0d   :  { %6763 = vmatpush3.bf16.msra.mxu0 %v7470_v52 }
 0xe0e   :  { %2201 = vrot.lane.b32.xlu0 %v2197_v47, %s7756_s24  ;;  %2199 = vrot.lane.b32.xlu1 %v2197_v47, %s7762_s27 }
 0xe0f   :  { %6764 = vmatprep.subr.bf16.mxu0 %v7471_v53 }
 0xe11   :  { %6765 = vmatpush3.bf16.msra.mxu0 %v7472_v54 }
 0xe12   :  { %6766 = vmatprep.subr.bf16.mxu0 %v7473_v55 }
 0xe15   :  { %6767 = vmatpush3.bf16.msra.mxu0 %v7474_v56 }
 0xe16   :  { %6768 = vmatprep.subr.bf16.mxu0 %v7476_v57 }
 0xe19   :  { %6769 = vmatpush3.bf16.msra.mxu0 %v7477_v58 }
 0xe1a   :  { %6770 = vmatprep.subr.bf16.mxu0 %v7479_v62  ;;  %v7484_v62 = vld [vmem:[%s9896_s10 + $0x38] sm:$0xff]  }
 0xe1d   :  { %6771 = vmatpush3.bf16.msra.mxu0 %v7480_v3  ;;  %v7488_v3 = vld [vmem:[%s9896_s10 + $0x28] sm:$0xff]  }
 0xe1e   :  { %6772 = vmatprep.subr.bf16.mxu0 %v7481_v9  ;;  %v7492_v9 = vld [vmem:[%s9896_s10 + $0x18] sm:$0xff]  }
 0xe21   :  { %6773 = vmatpush3.bf16.msra.mxu0 %v7482_v13 }
 0xe22   :  { %7151 = vmatprep.subr.bf16.mxu0 %v7765_v61 }
 0xe80   :  { %v2202_v59 = vpop.permute.xlu0 %2201  ;;  %v2200_v60 = vpop.permute.xlu1 %2199 }
 0xe81   :  { %v2205_v63 = vsel %vm171_vm8, %v2200_v60, %v2202_v59 }
 0xe82   :  { %v2206_v0 = vsel %vm676_vm2, %v2205_v63, %v2200_v60  ;;  %v7485_v63 = vld [vmem:[%s9896_s10 + $0x70] sm:$0xff]  }
 0xe83   :  { %v2207_v1 = vshrl.u32 %v2206_v0, 16  ;;  %v2210_v2 = vshll.u32 %v2206_v0, 16  ;;  %v7486_v0 = vld [vmem:[%s9896_s10 + $0x30] sm:$0xff]  }
 0xe85   :  { %v2209_v4 = vrot.slane %v2207_v1, 7  ;;  %v2216_v6 = vrot.slane %v2207_v1, 3  ;;  %v2217_v7 = vrot.slane %v2210_v2, 4  ;;  %v7493_v1 = vld [vmem:[%s9896_s10 + $0x88] sm:$0xff]  }
 0xe87   :  { %v2212_v11 = vor.u32 %v2210_v2, %v2209_v4  ;;  %v2218_v12 = vor.u32 %v2217_v7, %v2216_v6  ;;  %v7487_v2 = vld [vmem:[%s9896_s10 + $0x68] sm:$0xff]   ;;  %v7489_v4 = vld [vmem:[%s9896_s10 + $0x60] sm:$0xff]   ;;  %v7491_v7 = vld [vmem:[%s9896_s10 + $0x58] sm:$0xff]  }
 0xe88   :  { %v7490_v6 = vld [vmem:[%s9896_s10 + $0x20] sm:$0xff]  }
 0xe89   :  { %v2214_v14 = vsel %vm7977_vm5, 0, %v2212_v11  ;;  %v2220_v16 = vsel %vm7977_vm5, 0, %v2218_v12  ;;  %v7494_v11 = vld [vmem:[%s9896_s10 + $0x50] sm:$0xff]  }
 0xe8a   :  { %v2215_v18 = vsel %vm7985_vm6, %v2214_v14, 0  ;;  %v2221_v23 = vsel %vm7985_vm6, %v2220_v16, 0  ;;  %v7495_v12 = vld [vmem:[%s9896_s10 + $0x10] sm:$0xff]   ;;  %v7496_v16 = vld [vmem:[%s9896_s10 + $0x80] sm:$0xff]  }
 0xe8b   :  { %v2249_v19 = vrot.slane %v2221_v23, 1  ;;  %v2242_v20 = vshll.u32 %v2221_v23, 16  ;;  %v2225_v24 = vshll.u32 %v2215_v18, 16  ;;  %v2240_v25 = vshrl.u32 %v2221_v23, 16 }
 0xe8c   :  { %v2232_v28 = vrot.slane %v2215_v18, 1  ;;  %v2223_v30 = vshrl.u32 %v2215_v18, 16 }
 0xe8d   :  { %2250 = vrot.lane.b32.xlu0 %v2249_v19, %s7767_s7  ;;  %v2244_v26 = vrot.slane %v2242_v20, 1  ;;  %v2227_v29 = vrot.slane %v2225_v24, 1 }
 0xe8f   :  { %v2245_v27 = vor.u32 %v2244_v26, %v2240_v25  ;;  %v2228_v32 = vor.u32 %v2227_v29, %v2223_v30  ;;  %v7498_v25 = vld [vmem:[%s9896_s10 + $0x8] sm:$0xff]   ;;  %v7499_v29 = vld [vmem:[%s9896_s10 + $0x40] sm:$0xff]  }
 0xe91   :  { %2246 = vrot.lane.b32.xlu1 %v2245_v27, %s7760_s26  ;;  %2233 = vrot.lane.b32.xlu0 %v2232_v28, %s7767_s7 }
 0xe95   :  { %2229 = vrot.lane.b32.xlu1 %v2228_v32, %s7760_s26 }
 0xeff   :  { %v2251_v33 = vpop.permute.xlu0 %2250 }
 0xf00   :  { %v2260_v15 = vrot.slane %v2251_v33, 4 }
 0xf03   :  { %v2247_v17 = vpop.permute.xlu1 %2246  ;;  %v2234_v21 = vpop.permute.xlu0 %2233 }
 0xf04   :  { %v2253_v22 = vsel %vm1827_vm7, %v2221_v23, %v2247_v17  ;;  %v2255_v34 = vsel %vm1830_vm10, %v2247_v17, %v2251_v33  ;;  %v2268_v35 = vsel %vm197_vm4, %v2234_v21, %v2260_v15  ;;  %v7500_v33 = vld [vmem:[%s9896_s10] sm:$0xff]  }
 0xf05   :  { %7148 = vmatmul.mubr.msk.bf16.vlgmr.msra.gmra.mxu1 %vm565_vm12, %v2268_v35  ;;  %v2258_v36 = vrot.slane %v2253_v22, 4  ;;  %v2259_v38 = vrot.slane %v2255_v34, 4 }
 0xf06   :  { %6784 = vmatpush3.bf16.msra.mxu1 %v7484_v62 }
 0xf07   :  { %v2230_v39 = vpop.permute.xlu1 %2229  ;;  %6785 = vmatprep.subr.bf16.mxu1 %v7485_v63 }
 0xf08   :  { %v2236_v41 = vsel %vm1827_vm7, %v2215_v18, %v2230_v39  ;;  %v2238_v42 = vsel %vm1830_vm10, %v2230_v39, %v2234_v21  ;;  %v7497_v18 = vld [vmem:[%s9896_s10 + $0x48] sm:$0xff]  }
 0xf09   :  { %v2265_v44 = vsel %vm197_vm4, %v2238_v42, %v2259_v38  ;;  %v2262_v47 = vsel %vm197_vm4, %v2236_v41, %v2258_v36 }
 0xf0a   :  { %2411 = vmatprep.mubr.bf16.mxu0 %v2265_v44  ;;  %6786 = vmatpush3.bf16.msra.mxu1 %v7486_v0 }
 0xf0b   :  { %2412 = vmatmul.mubr.bf16.vlgmr.msra.gmra.mxu0 %v2262_v47  ;;  %6787 = vmatprep.subr.bf16.mxu1 %v7487_v2 }
 0xf0c   :  { %7155 = vmatprep.mubr.msk.bf16.mxu0 %vm7766_vm9, %v7765_v61  ;;  %7152 = vmatpush3.bf16.msra.mxu0 %v7493_v1 }
 0xf0d   :  { %7153 = vmatprep.subr.bf16.mxu0 %v7765_v61 }
 0xf0e   :  { %6788 = vmatpush3.bf16.msra.mxu1 %v7488_v3 }
 0xf0f   :  { %6789 = vmatprep.subr.bf16.mxu1 %v7489_v4 }
 0xf10   :  { %7154 = vmatpush3.bf16.msra.mxu0 %v7496_v16 }
 0xf11   :  { %6808 = vmatprep.subr.bf16.mxu0 %v7501_v40  ;;  %v7522_v40 = vld [vmem:[%s9899_s13] sm:$0xff]  }
 0xf12   :  { %6790 = vmatpush3.bf16.msra.mxu1 %v7490_v6 }
 0xf13   :  { %6791 = vmatprep.subr.bf16.mxu1 %v7491_v7 }
 0xf16   :  { %6792 = vmatpush3.bf16.msra.mxu1 %v7492_v9 }
 0xf17   :  { %6793 = vmatprep.subr.bf16.mxu1 %v7494_v11 }
 0xf1a   :  { %6794 = vmatpush3.bf16.msra.mxu1 %v7495_v12 }
 0xf1b   :  { %6795 = vmatprep.subr.bf16.mxu1 %v7497_v18 }
 0xf1e   :  { %6796 = vmatpush3.bf16.msra.mxu1 %v7498_v25  ;;  %v7508_v25 = vld [vmem:[%s9897_s11 + $0x20] sm:$0xff]  }
 0xf1f   :  { %6797 = vmatprep.subr.bf16.mxu1 %v7499_v29  ;;  %v7513_v29 = vld [vmem:[%s9897_s11 + $0x10] sm:$0xff]  }
 0xf22   :  { %6798 = vmatpush3.bf16.msra.mxu1 %v7500_v33  ;;  %v7514_v33 = vld [vmem:[%s9897_s11 + $0x80] sm:$0xff]  }
 0xf23   :  { %7159 = vmatprep.subr.bf16.mxu1 %v7765_v61 }
 0xfc5   :  { %v2454_v8 = vpop.f32.mrf.mxu1 }
 0xfc7   :  { %v7149_v10 = vpop.f32.mrf.mxu1 }
 0xfc9   :  { %v2457_v48 = vpop.f32.mrf.mxu1 }
 0xfcb   :  { %v6774_v49 = vpop.f32.mrf.mxu0  ;;  %v7150_v50 = vpop.f32.mrf.mxu1 }
 0xfcd   :  { %v6775_v51 = vpop.f32.mrf.mxu0 }
 0xfce   :  { %v6776_v52 = vadd.f32 %v6775_v51, %v6774_v49 }
 0xfcf   :  { %v6777_v53 = vpop.f32.mrf.mxu0 }
 0xfd0   :  { %v2455_v55 = vadd.f32 %v6776_v52, %v2454_v8 }
 0xfd1   :  { %v6778_v54 = vpop.f32.mrf.mxu0 }
 0xfd2   :  { %v6779_v56 = vadd.f32 %v6778_v54, %v6777_v53  ;;  %v2461_v58 = vmax.f32 %v2455_v55, 0.0 }
 0xfd4   :  { %v2458_v57 = vadd.f32 %v6779_v56, %v2457_v48 }
 0xfd6   :  { %v2462_v59 = vmax.f32 %v2458_v57, 0.0 }
 0xfd8   :  { %v2463_v60 = vpack.c.bf16 %v2462_v59, %v2461_v58 }
 0xfda   :  { %2467 = vrot.lane.b32.xlu0 %v2463_v60, %s7756_s24  ;;  %2465 = vrot.lane.b32.xlu1 %v2463_v60, %s7762_s27 }
0x104c   :  { %v2468_v13 = vpop.permute.xlu0 %2467  ;;  %v2466_v14 = vpop.permute.xlu1 %2465 }
0x104d   :  { %v2471_v23 = vsel %vm171_vm8, %v2466_v14, %v2468_v13 }
0x104e   :  { %v2472_v19 = vsel %vm676_vm2, %v2471_v23, %v2466_v14  ;;  %v7511_v23 = vld [vmem:[%s9897_s11 + $0x88] sm:$0xff]  }
0x104f   :  { %v2473_v20 = vshrl.u32 %v2472_v19, 16  ;;  %v2476_v24 = vshll.u32 %v2472_v19, 16  ;;  %v7505_v19 = vld [vmem:[%s9897_s11 + $0x68] sm:$0xff]  }
0x1051   :  { %v2475_v26 = vrot.slane %v2473_v20, 7  ;;  %v2482_v27 = vrot.slane %v2473_v20, 3  ;;  %v2483_v28 = vrot.slane %v2476_v24, 4  ;;  %v7506_v20 = vld [vmem:[%s9897_s11 + $0x28] sm:$0xff]  }
0x1053   :  { %v2478_v30 = vor.u32 %v2476_v24, %v2475_v26  ;;  %v2484_v32 = vor.u32 %v2483_v28, %v2482_v27  ;;  %v7507_v24 = vld [vmem:[%s9897_s11 + $0x60] sm:$0xff]   ;;  %v7509_v26 = vld [vmem:[%s9897_s11 + $0x58] sm:$0xff]   ;;  %v7512_v28 = vld [vmem:[%s9897_s11 + $0x50] sm:$0xff]  }
0x1054   :  { %v7510_v27 = vld [vmem:[%s9897_s11 + $0x18] sm:$0xff]  }
0x1055   :  { %v2480_v15 = vsel %vm7977_vm5, 0, %v2478_v30  ;;  %v2486_v17 = vsel %vm7977_vm5, 0, %v2484_v32 }
0x1056   :  { %v2481_v21 = vsel %vm7985_vm6, %v2480_v15, 0  ;;  %v2487_v22 = vsel %vm7985_vm6, %v2486_v17, 0  ;;  %v7515_v15 = vld [vmem:[%s9897_s11 + $0x48] sm:$0xff]  }
0x1057   :  { %v2515_v34 = vrot.slane %v2487_v22, 1  ;;  %v2508_v35 = vshll.u32 %v2487_v22, 16  ;;  %v2491_v36 = vshll.u32 %v2481_v21, 16  ;;  %v2506_v38 = vshrl.u32 %v2487_v22, 16 }
0x1058   :  { %v2498_v42 = vrot.slane %v2481_v21, 1  ;;  %v2489_v47 = vshrl.u32 %v2481_v21, 16 }
0x1059   :  { %2516 = vrot.lane.b32.xlu0 %v2515_v34, %s7767_s7  ;;  %v2510_v39 = vrot.slane %v2508_v35, 1  ;;  %v2493_v44 = vrot.slane %v2491_v36, 1  ;;  %v7516_v35 = vld [vmem:[%s9897_s11 + $0x8] sm:$0xff]  }
0x105b   :  { %v2511_v41 = vor.u32 %v2510_v39, %v2506_v38  ;;  %v2494_v8 = vor.u32 %v2493_v44, %v2489_v47  ;;  %v7519_v47 = vld [vmem:[%s9897_s11] sm:$0xff]  }
0x105d   :  { %2512 = vrot.lane.b32.xlu1 %v2511_v41, %s7760_s26  ;;  %2499 = vrot.lane.b32.xlu0 %v2498_v42, %s7767_s7  ;;  %v7518_v41 = vld [vmem:[%s9897_s11 + $0x40] sm:$0xff]  }
0x1061   :  { %2495 = vrot.lane.b32.xlu1 %v2494_v8, %s7760_s26 }
0x10cb   :  { %v2517_v10 = vpop.permute.xlu0 %2516 }
0x10cc   :  { %v2526_v48 = vrot.slane %v2517_v10, 4 }
0x10cf   :  { %v2513_v49 = vpop.permute.xlu1 %2512  ;;  %v2500_v50 = vpop.permute.xlu0 %2499 }
0x10d0   :  { %v2519_v51 = vsel %vm1827_vm7, %v2487_v22, %v2513_v49  ;;  %v2521_v52 = vsel %vm1830_vm10, %v2513_v49, %v2517_v10  ;;  %v2534_v53 = vsel %vm197_vm4, %v2500_v50, %v2526_v48 }
0x10d1   :  { %7156 = vmatmul.mubr.msk.bf16.vlgmr.msra.gmra.mxu0 %vm565_vm12, %v2534_v53  ;;  %v2524_v54 = vrot.slane %v2519_v51, 4  ;;  %v2525_v55 = vrot.slane %v2521_v52, 4 }
0x10d2   :  { %6809 = vmatpush3.bf16.msra.mxu0 %v7502_v43  ;;  %v7523_v43 = vld [vmem:[%s9898_s12 + $0xb8] sm:$0xff]  }
0x10d3   :  { %v2496_v56 = vpop.permute.xlu1 %2495 }
0x10d4   :  { %v2502_v57 = vsel %vm1827_vm7, %v2481_v21, %v2496_v56  ;;  %v2504_v58 = vsel %vm1830_vm10, %v2496_v56, %v2500_v50 }
0x10d5   :  { %v2531_v59 = vsel %vm197_vm4, %v2504_v58, %v2525_v55  ;;  %v2528_v60 = vsel %vm197_vm4, %v2502_v57, %v2524_v54 }
0x10d6   :  { %2677 = vmatprep.mubr.bf16.mxu1 %v2531_v59 }
0x10d7   :  { %2678 = vmatmul.mubr.bf16.vlgmr.msra.gmra.mxu1 %v2528_v60 }
0x10d8   :  { %7163 = vmatprep.mubr.msk.bf16.mxu1 %vm7766_vm9, %v7765_v61  ;;  %7160 = vmatpush3.bf16.msra.mxu1 %v7511_v23  ;;  %v7528_v23 = vld [vmem:[%s9898_s12 + $0x70] sm:$0xff]  }
0x10d9   :  { %7161 = vmatprep.subr.bf16.mxu1 %v7765_v61 }
0x10dc   :  { %7162 = vmatpush3.bf16.msra.mxu1 %v7514_v33 }
0x10dd   :  { %7167 = vmatprep.subr.bf16.mxu1 %v7765_v61 }
0x1191   :  { %v2720_v5 = vpop.f32.mrf.mxu0 }
0x1193   :  { %v7157_v62 = vpop.f32.mrf.mxu0 }
0x1194   :  { %v7517_v62 = vld [vmem:[%s9899_s13 + $0x18] sm:$0xff]  }
0x1195   :  { %v2723_v63 = vpop.f32.mrf.mxu0 }
0x1197   :  { %v6799_v0 = vpop.f32.mrf.mxu1  ;;  %v7158_v1 = vpop.f32.mrf.mxu0 }
0x1199   :  { %v6800_v2 = vpop.f32.mrf.mxu1 }
0x119a   :  { %v6801_v3 = vadd.f32 %v6800_v2, %v6799_v0 }
0x119b   :  { %v6802_v4 = vpop.f32.mrf.mxu1 }
0x119c   :  { %v2680_v6 = vadd.f32 %v6801_v3, %v2123_v45  ;;  %v7503_v45 = vld [vmem:[%s9897_s11 + $0x70] sm:$0xff]  }
0x119d   :  { %v6803_v7 = vpop.f32.mrf.mxu1  ;;  %6810 = vmatprep.subr.bf16.mxu0 %v7503_v45  ;;  %v7525_v45 = vld [vmem:[%s9898_s12 + $0x78] sm:$0xff]  }
0x119e   :  { %v6804_v9 = vadd.f32 %v6803_v7, %v6802_v4  ;;  %v2721_v11 = vadd.f32 %v2720_v5, %v2680_v6  ;;  %v7520_v4 = vld [vmem:[%s9899_s13 + $0x10] sm:$0xff]  }
0x11a0   :  { %v2683_v12 = vadd.f32 %v6804_v9, %v2124_v46  ;;  %v2727_v14 = vmax.f32 %v2721_v11, 0.0  ;;  %v7504_v46 = vld [vmem:[%s9897_s11 + $0x30] sm:$0xff]  }
0x11a1   :  { %6811 = vmatpush3.bf16.msra.mxu0 %v7504_v46  ;;  %v7526_v46 = vld [vmem:[%s9898_s12 + $0x38] sm:$0xff]  }
0x11a2   :  { %v2724_v13 = vadd.f32 %v2723_v63, %v2683_v12  ;;  %6812 = vmatprep.subr.bf16.mxu0 %v7505_v19  ;;  %v7529_v19 = vld [vmem:[%s9898_s12 + $0x30] sm:$0xff]  }
0x11a4   :  { %v2728_v16 = vmax.f32 %v2724_v13, 0.0 }
0x11a5   :  { %6813 = vmatpush3.bf16.msra.mxu0 %v7506_v20  ;;  %v7531_v20 = vld [vmem:[%s9898_s12 + $0x68] sm:$0xff]  }
0x11a6   :  { %v8763_v18 = vpack.c.bf16 %v2728_v16, %v2727_v14  ;;  %6814 = vmatprep.subr.bf16.mxu0 %v7507_v24  ;;  %v7521_v16 = vld [vmem:[%s9899_s13 + $0x8] sm:$0xff]  }
0x11a7   :  { %v7527_v24 = vld [vmem:[%s9898_s12 + $0xa8] sm:$0xff]  }
0x11a8   :  { %2825 = vrot.lane.b32.xlu0 %v8763_v18, %s7756_s24  ;;  %2823 = vrot.lane.b32.xlu1 %v8763_v18, %s7762_s27  ;;  %s7768_s27 = smov [#allocation2]  }
0x11a9   :  { %6815 = vmatpush3.bf16.msra.mxu0 %v7508_v25  ;;  %v7532_v25 = vld [vmem:[%s9898_s12 + $0x28] sm:$0xff]  }
0x11aa   :  { %6816 = vmatprep.subr.bf16.mxu0 %v7509_v26  ;;  %v7530_v26 = vld [vmem:[%s9898_s12 + $0xa0] sm:$0xff]  }
0x11ad   :  { %6817 = vmatpush3.bf16.msra.mxu0 %v7510_v27  ;;  %v7533_v27 = vld [vmem:[%s9898_s12 + $0x98] sm:$0xff]  }
0x11ae   :  { %6818 = vmatprep.subr.bf16.mxu0 %v7512_v28 }
0x11b1   :  { %6819 = vmatpush3.bf16.msra.mxu0 %v7513_v29 }
0x11b2   :  { %6820 = vmatprep.subr.bf16.mxu0 %v7515_v15  ;;  %v7534_v15 = vld [vmem:[%s9898_s12 + $0x60] sm:$0xff]  }
0x11b5   :  { %6821 = vmatpush3.bf16.msra.mxu0 %v7516_v35 }
0x11b6   :  { %6822 = vmatprep.subr.bf16.mxu0 %v7518_v41 }
0x11b9   :  { %6823 = vmatpush3.bf16.msra.mxu0 %v7519_v47 }
0x11ba   :  { %7179 = vmatprep.subr.bf16.mxu0 %v7765_v61 }
0x121a   :  { %v2826_v30 = vpop.permute.xlu0 %2825  ;;  %v2824_v32 = vpop.permute.xlu1 %2823 }
0x121b   :  { %v2829_v17 = vsel %vm171_vm8, %v2824_v32, %v2826_v30  ;;  %vm4273_vm8 = vcmask 1041408  }
0x121c   :  { %v2830_v21 = vsel %vm676_vm2, %v2829_v17, %v2824_v32 }
0x121d   :  { %v2831_v22 = vshrl.u32 %v2830_v21, 16  ;;  %v2834_v34 = vshll.u32 %v2830_v21, 16  ;;  %v7535_v21 = vld [vmem:[%s9898_s12 + $0x20] sm:$0xff]  }
0x121f   :  { %v2833_v36 = vrot.slane %v2831_v22, 7  ;;  %v2840_v38 = vrot.slane %v2831_v22, 3  ;;  %v2841_v39 = vrot.slane %v2834_v34, 4 }
0x1221   :  { %v2836_v42 = vor.u32 %v2834_v34, %v2833_v36  ;;  %v2842_v44 = vor.u32 %v2841_v39, %v2840_v38  ;;  %v7536_v34 = vld [vmem:[%s9898_s12 + $0x90] sm:$0xff]   ;;  %v7537_v36 = vld [vmem:[%s9898_s12 + $0x58] sm:$0xff]  }
0x1222   :  { %v7538_v39 = vld [vmem:[%s9898_s12 + $0x18] sm:$0xff]  }
0x1223   :  { %v2838_v8 = vsel %vm7977_vm5, 0, %v2836_v42  ;;  %v2844_v10 = vsel %vm7977_vm5, 0, %v2842_v44  ;;  %v7539_v44 = vld [vmem:[%s9898_s12 + $0x88] sm:$0xff]  }
0x1224   :  { %v2839_v48 = vsel %vm7985_vm6, %v2838_v8, 0  ;;  %v2845_v49 = vsel %vm7985_vm6, %v2844_v10, 0  ;;  %v7540_v8 = vld [vmem:[%s9898_s12 + $0x50] sm:$0xff]  }
0x1225   :  { %v2873_v50 = vrot.slane %v2845_v49, 1  ;;  %v2866_v51 = vshll.u32 %v2845_v49, 16  ;;  %v2849_v52 = vshll.u32 %v2839_v48, 16  ;;  %v2864_v53 = vshrl.u32 %v2845_v49, 16 }
0x1226   :  { %v2856_v56 = vrot.slane %v2839_v48, 1  ;;  %v2847_v58 = vshrl.u32 %v2839_v48, 16 }
0x1227   :  { %2874 = vrot.lane.b32.xlu0 %v2873_v50, %s7767_s7  ;;  %v2868_v54 = vrot.slane %v2866_v51, 1  ;;  %v2851_v57 = vrot.slane %v2849_v52, 1  ;;  %v7542_v51 = vld [vmem:[%s9898_s12 + $0x80] sm:$0xff]   ;;  %v7543_v52 = vld [vmem:[%s9898_s12 + $0x48] sm:$0xff]  }
0x1229   :  { %v2869_v55 = vor.u32 %v2868_v54, %v2864_v53  ;;  %v2852_v59 = vor.u32 %v2851_v57, %v2847_v58  ;;  %v7544_v54 = vld [vmem:[%s9898_s12 + $0x8] sm:$0xff]   ;;  %v7545_v57 = vld [vmem:[%s9898_s12 + $0x40] sm:$0xff]  }
0x122b   :  { %2870 = vrot.lane.b32.xlu1 %v2869_v55, %s7760_s26  ;;  %2857 = vrot.lane.b32.xlu0 %v2856_v56, %s7767_s7 }
0x122f   :  { %2853 = vrot.lane.b32.xlu1 %v2852_v59, %s7760_s26  ;;  %v7546_v59 = vld [vmem:[%s9898_s12] sm:$0xff]  }
0x1299   :  { %v2875_v60 = vpop.permute.xlu0 %2874 }
0x129a   :  { %v2884_v5 = vrot.slane %v2875_v60, 4 }
0x129d   :  { %v2871_v63 = vpop.permute.xlu1 %2870  ;;  %v2858_v0 = vpop.permute.xlu0 %2857 }
0x129e   :  { %v2877_v1 = vsel %vm1827_vm7, %v2845_v49, %v2871_v63  ;;  %v2879_v2 = vsel %vm1830_vm10, %v2871_v63, %v2875_v60  ;;  %v2892_v3 = vsel %vm197_vm4, %v2858_v0, %v2884_v5 }
0x129f   :  { %7164 = vmatmul.mubr.msk.bf16.vlgmr.msra.gmra.mxu1 %vm565_vm12, %v2892_v3  ;;  %v2882_v6 = vrot.slane %v2877_v1, 4  ;;  %v2883_v7 = vrot.slane %v2879_v2, 4 }
0x12a0   :  { %7168 = vmatpush3.bf16.msra.mxu1 %v7517_v62  ;;  %7175 = vmatprep.mubr.msk.bf16.mxu1 %vm7766_vm9, %v7765_v61 }
0x12a1   :  { %v2854_v9 = vpop.permute.xlu1 %2853  ;;  %7169 = vmatprep.subr.bf16.mxu1 %v7765_v61 }
0x12a2   :  { %v2860_v11 = vsel %vm1827_vm7, %v2839_v48, %v2854_v9  ;;  %v2862_v12 = vsel %vm1830_vm10, %v2854_v9, %v2858_v0  ;;  %v7541_v48 = vld [vmem:[%s9898_s12 + $0x10] sm:$0xff]  }
0x12a3   :  { %v2889_v13 = vsel %vm197_vm4, %v2862_v12, %v2883_v7  ;;  %v2886_v14 = vsel %vm197_vm4, %v2860_v11, %v2882_v6 }
0x12a4   :  { %7170 = vmatpush3.bf16.msra.mxu1 %v7520_v4  ;;  %3035 = vmatprep.mubr.bf16.mxu0 %v2889_v13 }
0x12a5   :  { %3036 = vmatmul.mubr.bf16.vlgmr.msra.gmra.mxu0 %v2886_v14  ;;  %7171 = vmatprep.subr.bf16.mxu1 %v7765_v61 }
0x12a6   :  { %7195 = vmatprep.mubr.msk.bf16.mxu0 %vm7766_vm9, %v7765_v61  ;;  %7180 = vmatpush3.bf16.msra.mxu0 %v7523_v43 }
0x12a7   :  { %7181 = vmatprep.subr.bf16.mxu0 %v7765_v61 }
0x12a8   :  { %7172 = vmatpush3.bf16.msra.mxu1 %v7521_v16 }
0x12a9   :  { %7173 = vmatprep.subr.bf16.mxu1 %v7765_v61 }
0x12ac   :  { %7174 = vmatpush3.bf16.msra.mxu1 %v7522_v40 }
0x12ad   :  { %6838 = vmatprep.subr.bf16.mxu1 %v7525_v45 }
0x12af   :  { %7176 = vmatmul.mubr.msk.bf16.vlgmr.msra.gmra.mxu1 %vm1830_vm10, %v8763_v18  ;;  %v7524_v18 = vld [vmem:[%s9898_s12 + $0xb0] sm:$0xff]   ;;  %s6282_s12 = sshll.u32 %s7768_s27, 4  ;;  %s6283_s12 = int_to_ptr.vmem [resolvable:$true] %s6282_s12 }
0x12b0   :  { %6839 = vmatpush3.bf16.msra.mxu1 %v7526_v46  ;;  %7182 = vmatpush3.bf16.msra.mxu0 %v7524_v18  ;;  %s7731_s3 = scalar_lea.vmem %s6283_s12, 32  ;;  %p7736_p1 = scmp.lt.s32.totalorder %s6283_s12, %s6283_s12 }
0x12b1   :  { %6840 = vmatprep.subr.bf16.mxu1 %v7528_v23  ;;  %7183 = vmatprep.subr.bf16.mxu0 %v7765_v61  ;;  %p7732_p0 = scmp.ne.s32.totalorder %s6283_s12, %s7731_s3  ;;  %p7737_p2 = scmp.lt.s32.totalorder %s7731_s3, %s7731_s3 }
0x12b3   :  { %p7738_p3 = por %p7737_p2, %p7736_p1 }
0x12b4   :  { %6841 = vmatpush3.bf16.msra.mxu1 %v7529_v19  ;;  %7184 = vmatpush3.bf16.msra.mxu0 %v7527_v24 }
0x12b5   :  { %6842 = vmatprep.subr.bf16.mxu1 %v7531_v20  ;;  %7185 = vmatprep.subr.bf16.mxu0 %v7765_v61  ;;  %p7739_p4 = pnand %p7738_p3, %p7732_p0 }
0x12b8   :  { %6843 = vmatpush3.bf16.msra.mxu1 %v7532_v25  ;;  %7186 = vmatpush3.bf16.msra.mxu0 %v7530_v26 }
0x12b9   :  { %7187 = vmatprep.subr.bf16.mxu0 %v7765_v61  ;;  %6844 = vmatprep.subr.bf16.mxu1 %v7534_v15  ;;  %v7548_v15 = vld [vmem:[%s9900_s14 + $0xb0] sm:$0xff]  }
0x12bc   :  { %7188 = vmatpush3.bf16.msra.mxu0 %v7533_v27  ;;  %6845 = vmatpush3.bf16.msra.mxu1 %v7535_v21  ;;  %v7555_v21 = vld [vmem:[%s9900_s14 + $0x68] sm:$0xff]  }
0x12bd   :  { %7189 = vmatprep.subr.bf16.mxu0 %v7765_v61  ;;  %6846 = vmatprep.subr.bf16.mxu1 %v7537_v36  ;;  %v7557_v36 = vld [vmem:[%s9900_s14 + $0x98] sm:$0xff]  }
0x12c0   :  { %7190 = vmatpush3.bf16.msra.mxu0 %v7536_v34  ;;  %6847 = vmatpush3.bf16.msra.mxu1 %v7538_v39  ;;  %v7556_v34 = vld [vmem:[%s9900_s14 + $0x28] sm:$0xff]  }
0x12c1   :  { %7191 = vmatprep.subr.bf16.mxu0 %v7765_v61  ;;  %6848 = vmatprep.subr.bf16.mxu1 %v7540_v8  ;;  %v7558_v8 = vld [vmem:[%s9900_s14 + $0x60] sm:$0xff]  }
0x12c4   :  { %7192 = vmatpush3.bf16.msra.mxu0 %v7539_v44  ;;  %6849 = vmatpush3.bf16.msra.mxu1 %v7541_v48 }
0x12c5   :  { %7193 = vmatprep.subr.bf16.mxu0 %v7765_v61  ;;  %6850 = vmatprep.subr.bf16.mxu1 %v7543_v52 }
0x12c8   :  { %7194 = vmatpush3.bf16.msra.mxu0 %v7542_v51  ;;  %6851 = vmatpush3.bf16.msra.mxu1 %v7544_v54  ;;  %v7560_v51 = vld [vmem:[%s9900_s14 + $0x90] sm:$0xff]   ;;  %v7561_v54 = vld [vmem:[%s9900_s14 + $0x58] sm:$0xff]  }
0x12c9   :  { %7199 = vmatprep.subr.bf16.mxu0 %v7765_v61  ;;  %6852 = vmatprep.subr.bf16.mxu1 %v7545_v57  ;;  %v7562_v57 = vld [vmem:[%s9900_s14 + $0x18] sm:$0xff]  }
0x12cc   :  { %6853 = vmatpush3.bf16.msra.mxu1 %v7546_v59 }
0x135f   :  { %v3078_v28 = vpop.f32.mrf.mxu1 }
0x1361   :  { %v7165_v29 = vpop.f32.mrf.mxu1 }
0x1362   :  { %v7547_v29 = vld [vmem:[%s9900_s14 + $0xb8] sm:$0xff]  }
0x1363   :  { %v3081_v30 = vpop.f32.mrf.mxu1 }
0x1365   :  { %v6824_v32 = vpop.f32.mrf.mxu0  ;;  %v7166_v33 = vpop.f32.mrf.mxu1 }
0x1366   :  { %v7552_v33 = vld [vmem:[%s9900_s14 + $0x70] sm:$0xff]  }
0x1367   :  { %v6825_v17 = vpop.f32.mrf.mxu0 }
0x1368   :  { %v6826_v22 = vadd.f32 %v6825_v17, %v6824_v32  ;;  %v7550_v32 = vld [vmem:[%s9900_s14 + $0x38] sm:$0xff]   ;;  %v7553_v17 = vld [vmem:[%s9900_s14 + $0x30] sm:$0xff]  }
0x1369   :  { %v6827_v35 = vpop.f32.mrf.mxu0 }
0x136a   :  { %v3079_v41 = vadd.f32 %v6826_v22, %v3078_v28  ;;  %v7551_v22 = vld [vmem:[%s9900_s14 + $0xa8] sm:$0xff]  }
0x136b   :  { %v6828_v38 = vpop.f32.mrf.mxu0 }
0x136c   :  { %v6829_v42 = vadd.f32 %v6828_v38, %v6827_v35  ;;  %v3085_v49 = vmax.f32 %v3079_v41, 0.0  ;;  %v7554_v35 = vld [vmem:[%s9900_s14 + $0xa0] sm:$0xff]  }
0x136e   :  { %v3082_v47 = vadd.f32 %v6829_v42, %v3081_v30  ;;  %v7549_v30 = vld [vmem:[%s9900_s14 + $0x78] sm:$0xff]  }
0x136f   :  { %v8929_v10 = vpop.f32.mrf.mxu1  ;;  %6869 = vmatprep.subr.bf16.mxu1 %v7549_v30 }
0x1370   :  { %v3086_v50 = vmax.f32 %v3082_v47, 0.0 }
0x1371   :  { %v7177_v53 = vpop.f32.mrf.mxu1 }
0x1372   :  { %v3087_v55 = vpack.c.bf16 %v3086_v50, %v3085_v49  ;;  %v7559_v49 = vld [vmem:[%s9900_s14 + $0x20] sm:$0xff]  }
0x1373   :  { %v8944_v56 = vpop.f32.mrf.mxu1 }
0x1374   :  { %3091 = vrot.lane.b32.xlu0 %v3087_v55, %s7764_s4  ;;  %3089 = vrot.lane.b32.xlu1 %v3087_v55, %s7760_s26 }
0x1375   :  { %v7178_v58 = vpop.f32.mrf.mxu1 }
0x1376   :  { %v7563_v58 = vld [vmem:[%s9900_s14 + $0x88] sm:$0xff]  }
0x13e6   :  { %v3092_v60 = vpop.permute.xlu0 %3091  ;;  %v3090_v5 = vpop.permute.xlu1 %3089 }
0x13e7   :  { %v3095_v62 = vsel %vm565_vm12, %v3090_v5, %v3092_v60  ;;  %v7564_v60 = vld [vmem:[%s9900_s14 + $0x50] sm:$0xff]  }
0x13e8   :  { %v3096_v63 = vsel %vm1827_vm7, %v3095_v62, %v3090_v5  ;;  %v7565_v62 = vld [vmem:[%s9900_s14 + $0x10] sm:$0xff]  }
0x13e9   :  { %v3097_v0 = vshrl.u32 %v3096_v63, 16  ;;  %v3100_v1 = vshll.u32 %v3096_v63, 16  ;;  %v7566_v63 = vld [vmem:[%s9900_s14 + $0x80] sm:$0xff]  }
0x13eb   :  { %v3099_v2 = vrot.slane %v3097_v0, 7  ;;  %v3106_v3 = vrot.slane %v3097_v0, 3  ;;  %v3107_v4 = vrot.slane %v3100_v1, 4 }
0x13ed   :  { %v3102_v6 = vor.u32 %v3100_v1, %v3099_v2  ;;  %v3108_v7 = vor.u32 %v3107_v4, %v3106_v3  ;;  %v7567_v1 = vld [vmem:[%s9900_s14 + $0x48] sm:$0xff]   ;;  %v7569_v4 = vld [vmem:[%s9900_s14 + $0x40] sm:$0xff]  }
0x13ee   :  { %v7568_v2 = vld [vmem:[%s9900_s14 + $0x8] sm:$0xff]  }
0x13ef   :  { %v3104_v9 = vsel %vm7977_vm5, 0, %v3102_v6  ;;  %v3110_v11 = vsel %vm7977_vm5, 0, %v3108_v7  ;;  %v7570_v6 = vld [vmem:[%s9900_s14] sm:$0xff]  }
0x13f0   :  { %v3105_v12 = vsel %vm7985_vm6, %v3104_v9, 0  ;;  %v3111_v13 = vsel %vm7985_vm6, %v3110_v11, 0 }
0x13f1   :  { %v3120_v14 = vrot.slane %v3105_v12, 1  ;;  %v6478_v16 = vrot.slane %v3111_v13, 5  ;;  %v3115_v40 = vshll.u32 %v3105_v12, 16  ;;  %v3124_v43 = vshll.u32 %v3111_v13, 16 }
0x13f2   :  { %v3122_v23 = vshrl.u32 %v3111_v13, 16  ;;  %v3113_v19 = vshrl.u32 %v3105_v12, 16  ;;  %v3130_v24 = vrot.slane %v3111_v13, 4 }
0x13f3   :  { %v3142_v45 = vsel %vm197_vm4, %v3120_v14, %v6478_v16  ;;  %v3117_v46 = vrot.slane %v3115_v40, 1  ;;  %v3126_v18 = vrot.slane %v3124_v43, 1 }
0x13f4   :  { %7196 = vmatmul.mubr.bf16.vlgmr.msra.gmra.mxu0 %v3142_v45  ;;  %v3134_v28 = vsel %vm197_vm4, %v3105_v12, %v3130_v24 }
0x13f5   :  { %7215 = vmatprep.mubr.msk.bf16.mxu0 %vm7766_vm9, %v7765_v61  ;;  %v3127_v20 = vor.u32 %v3126_v18, %v3122_v23  ;;  %v3118_v25 = vor.u32 %v3117_v46, %v3113_v19  ;;  %7200 = vmatpush3.bf16.msra.mxu0 %v7547_v29 }
0x13f6   :  { %7201 = vmatprep.subr.bf16.mxu0 %v7765_v61 }
0x13f7   :  { %v3131_v26 = vrot.slane %v3127_v20, 4 }
0x13f9   :  { %v3138_v27 = vsel %vm197_vm4, %v3118_v25, %v3131_v26  ;;  %7202 = vmatpush3.bf16.msra.mxu0 %v7548_v15 }
0x13fa   :  { %3388 = vmatprep.mubr.bf16.mxu1 %v3138_v27  ;;  %7203 = vmatprep.subr.bf16.mxu0 %v7765_v61 }
0x13fb   :  { %3389 = vmatmul.mubr.bf16.vlgmr.msra.gmra.mxu1 %v3134_v28 }
0x13fc   :  { %6870 = vmatpush3.bf16.msra.mxu1 %v7550_v32 }
0x13fd   :  { %6871 = vmatprep.subr.bf16.mxu1 %v7552_v33  ;;  %7204 = vmatpush3.bf16.msra.mxu0 %v7551_v22 }
0x13fe   :  { %7205 = vmatprep.subr.bf16.mxu0 %v7765_v61 }
0x1400   :  { %6872 = vmatpush3.bf16.msra.mxu1 %v7553_v17 }
0x1401   :  { %6873 = vmatprep.subr.bf16.mxu1 %v7555_v21  ;;  %7206 = vmatpush3.bf16.msra.mxu0 %v7554_v35 }
0x1402   :  { %7207 = vmatprep.subr.bf16.mxu0 %v7765_v61 }
0x1404   :  { %6874 = vmatpush3.bf16.msra.mxu1 %v7556_v34 }
0x1405   :  { %7208 = vmatpush3.bf16.msra.mxu0 %v7557_v36  ;;  %6875 = vmatprep.subr.bf16.mxu1 %v7558_v8  ;;  %v7571_v36 = vld [vmem:[%s9901_s15 + $0xb8] sm:$0xff]   ;;  %v7575_v8 = vld [vmem:[%s9901_s15 + $0xa8] sm:$0xff]  }
0x1406   :  { %7209 = vmatprep.subr.bf16.mxu0 %v7765_v61 }
0x1408   :  { %6876 = vmatpush3.bf16.msra.mxu1 %v7559_v49  ;;  %v7578_v49 = vld [vmem:[%s9901_s15 + $0xa0] sm:$0xff]  }
0x1409   :  { %7210 = vmatpush3.bf16.msra.mxu0 %v7560_v51  ;;  %6877 = vmatprep.subr.bf16.mxu1 %v7561_v54 }
0x140a   :  { %7211 = vmatprep.subr.bf16.mxu0 %v7765_v61 }
0x140c   :  { %6878 = vmatpush3.bf16.msra.mxu1 %v7562_v57  ;;  %v7582_v57 = vld [vmem:[%s9901_s15 + $0x60] sm:$0xff]  }
0x140d   :  { %7212 = vmatpush3.bf16.msra.mxu0 %v7563_v58  ;;  %6879 = vmatprep.subr.bf16.mxu1 %v7564_v60  ;;  %v7583_v58 = vld [vmem:[%s9901_s15 + $0x20] sm:$0xff]   ;;  %v7584_v60 = vld [vmem:[%s9901_s15 + $0x90] sm:$0xff]  }
0x140e   :  { %7213 = vmatprep.subr.bf16.mxu0 %v7765_v61 }
0x1410   :  { %6880 = vmatpush3.bf16.msra.mxu1 %v7565_v62 }
0x1411   :  { %7214 = vmatpush3.bf16.msra.mxu0 %v7566_v63  ;;  %6881 = vmatprep.subr.bf16.mxu1 %v7567_v1  ;;  %v7585_v1 = vld [vmem:[%s9901_s15 + $0x58] sm:$0xff]  }
0x1412   :  { %7219 = vmatprep.subr.bf16.mxu0 %v7765_v61 }
0x1414   :  { %6882 = vmatpush3.bf16.msra.mxu1 %v7568_v2  ;;  %v7586_v2 = vld [vmem:[%s9901_s15 + $0x18] sm:$0xff]  }
0x1415   :  { %6883 = vmatprep.subr.bf16.mxu1 %v7569_v4  ;;  %v7587_v4 = vld [vmem:[%s9901_s15 + $0x88] sm:$0xff]  }
0x1418   :  { %6884 = vmatpush3.bf16.msra.mxu1 %v7570_v6 }
0x14b4   :  { %v3431_v38 = vpop.f32.mrf.mxu0 }
0x14b6   :  { %v7197_v39 = vpop.f32.mrf.mxu0 }
0x14b7   :  { %v7574_v39 = vld [vmem:[%s9901_s15 + $0x38] sm:$0xff]  }
0x14b8   :  { %v3434_v41 = vpop.f32.mrf.mxu0 }
0x14ba   :  { %v7198_v42 = vpop.f32.mrf.mxu0 }
0x14bb   :  { %v6854_v44 = vpop.f32.mrf.mxu1  ;;  %v7572_v42 = vld [vmem:[%s9901_s15 + $0xb0] sm:$0xff]  }
0x14bd   :  { %v6855_v47 = vpop.f32.mrf.mxu1 }
0x14be   :  { %v6856_v48 = vadd.f32 %v6855_v47, %v6854_v44  ;;  %v7577_v44 = vld [vmem:[%s9901_s15 + $0x30] sm:$0xff]   ;;  %v7579_v47 = vld [vmem:[%s9901_s15 + $0x68] sm:$0xff]  }
0x14bf   :  { %v6857_v50 = vpop.f32.mrf.mxu1 }
0x14c0   :  { %v3391_v52 = vadd.f32 %v6856_v48, %v8929_v10  ;;  %v7580_v48 = vld [vmem:[%s9901_s15 + $0x28] sm:$0xff]  }
0x14c1   :  { %v6858_v53 = vpop.f32.mrf.mxu1 }
0x14c2   :  { %v6859_v55 = vadd.f32 %v6858_v53, %v6857_v50  ;;  %v9028_v10 = vadd.f32 %v3431_v38, %v3391_v52  ;;  %v7573_v38 = vld [vmem:[%s9901_s15 + $0x78] sm:$0xff]  }
0x14c3   :  { %6900 = vmatprep.subr.bf16.mxu1 %v7573_v38  ;;  %v7581_v50 = vld [vmem:[%s9901_s15 + $0x98] sm:$0xff]  }
0x14c4   :  { %v3394_v59 = vadd.f32 %v6859_v55, %v8944_v56  ;;  %v3438_v56 = vmax.f32 %v9028_v10, 0.0  ;;  %v7609_v10 = vld [vmem:[%s9902_s16 + $0x98] sm:$0xff]  }
0x14c6   :  { %v9034_v5 = vadd.f32 %v3434_v41, %v3394_v59  ;;  %v7576_v41 = vld [vmem:[%s9901_s15 + $0x70] sm:$0xff]  }
0x14c8   :  { %v3439_v0 = vmax.f32 %v9034_v5, 0.0 }
0x14ca   :  { %v3536_v3 = vpack.c.bf16 %v3439_v0, %v3438_v56 }
0x14cc   :  { %3540 = vrot.lane.b32.xlu0 %v3536_v3, %s7764_s4  ;;  %3538 = vrot.lane.b32.xlu1 %v3536_v3, %s7760_s26 }
0x153e   :  { %v3541_v7 = vpop.permute.xlu0 %3540  ;;  %v3539_v9 = vpop.permute.xlu1 %3538 }
0x153f   :  { %v3544_v11 = vsel %vm565_vm12, %v3539_v9, %v3541_v7 }
0x1540   :  { %v3545_v12 = vsel %vm1827_vm7, %v3544_v11, %v3539_v9  ;;  %v7588_v9 = vld [vmem:[%s9901_s15 + $0x50] sm:$0xff]  }
0x1541   :  { %v3546_v13 = vshrl.u32 %v3545_v12, 16  ;;  %v3549_v14 = vshll.u32 %v3545_v12, 16  ;;  %v7589_v12 = vld [vmem:[%s9901_s15 + $0x10] sm:$0xff]  }
0x1543   :  { %v3548_v16 = vrot.slane %v3546_v13, 7  ;;  %v3555_v40 = vrot.slane %v3546_v13, 3  ;;  %v3556_v43 = vrot.slane %v3549_v14, 4  ;;  %v7590_v13 = vld [vmem:[%s9901_s15 + $0x80] sm:$0xff]  }
0x1545   :  { %v3551_v45 = vor.u32 %v3549_v14, %v3548_v16  ;;  %v3557_v46 = vor.u32 %v3556_v43, %v3555_v40  ;;  %v7591_v40 = vld [vmem:[%s9901_s15 + $0x48] sm:$0xff]  }
0x1546   :  { %v7592_v43 = vld [vmem:[%s9901_s15 + $0x8] sm:$0xff]  }
0x1547   :  { %v3553_v23 = vsel %vm7977_vm5, 0, %v3551_v45  ;;  %v3559_v18 = vsel %vm7977_vm5, 0, %v3557_v46  ;;  %v7593_v46 = vld [vmem:[%s9901_s15 + $0x40] sm:$0xff]  }
0x1548   :  { %v3554_v19 = vsel %vm7985_vm6, %v3553_v23, 0  ;;  %v3560_v20 = vsel %vm7985_vm6, %v3559_v18, 0  ;;  %v7594_v23 = vld [vmem:[%s9901_s15] sm:$0xff]  }
0x1549   :  { %v3569_v24 = vrot.slane %v3554_v19, 1  ;;  %v6508_v25 = vrot.slane %v3560_v20, 5  ;;  %v3564_v26 = vshll.u32 %v3554_v19, 16  ;;  %v3573_v27 = vshll.u32 %v3560_v20, 16 }
0x154a   :  { %v3571_v30 = vshrl.u32 %v3560_v20, 16  ;;  %v3562_v33 = vshrl.u32 %v3554_v19, 16  ;;  %v3579_v17 = vrot.slane %v3560_v20, 4 }
0x154b   :  { %v3591_v28 = vsel %vm197_vm4, %v3569_v24, %v6508_v25  ;;  %v3566_v29 = vrot.slane %v3564_v26, 1  ;;  %v3575_v32 = vrot.slane %v3573_v27, 1 }
0x154c   :  { %7216 = vmatmul.mubr.bf16.vlgmr.msra.gmra.mxu0 %v3591_v28  ;;  %v3583_v35 = vsel %vm197_vm4, %v3554_v19, %v3579_v17 }
0x154d   :  { %7235 = vmatprep.mubr.msk.bf16.mxu0 %vm7766_vm9, %v7765_v61  ;;  %v3576_v15 = vor.u32 %v3575_v32, %v3571_v30  ;;  %v3567_v21 = vor.u32 %v3566_v29, %v3562_v33  ;;  %7220 = vmatpush3.bf16.msra.mxu0 %v7571_v36 }
0x154e   :  { %7221 = vmatprep.subr.bf16.mxu0 %v7765_v61 }
0x154f   :  { %v3580_v22 = vrot.slane %v3576_v15, 4 }
0x1551   :  { %v3587_v34 = vsel %vm197_vm4, %v3567_v21, %v3580_v22  ;;  %7222 = vmatpush3.bf16.msra.mxu0 %v7572_v42 }
0x1552   :  { %3769 = vmatprep.mubr.bf16.mxu1 %v3587_v34  ;;  %7223 = vmatprep.subr.bf16.mxu0 %v7765_v61 }
0x1553   :  { %3770 = vmatmul.mubr.bf16.vlgmr.msra.gmra.mxu1 %v3583_v35 }
0x1554   :  { %6901 = vmatpush3.bf16.msra.mxu1 %v7574_v39 }
0x1555   :  { %6902 = vmatprep.subr.bf16.mxu1 %v7576_v41  ;;  %7224 = vmatpush3.bf16.msra.mxu0 %v7575_v8 }
0x1556   :  { %7225 = vmatprep.subr.bf16.mxu0 %v7765_v61 }
0x1558   :  { %6903 = vmatpush3.bf16.msra.mxu1 %v7577_v44 }
0x1559   :  { %6904 = vmatprep.subr.bf16.mxu1 %v7579_v47  ;;  %7226 = vmatpush3.bf16.msra.mxu0 %v7578_v49 }
0x155a   :  { %7227 = vmatprep.subr.bf16.mxu0 %v7765_v61 }
0x155c   :  { %6905 = vmatpush3.bf16.msra.mxu1 %v7580_v48 }
0x155d   :  { %7228 = vmatpush3.bf16.msra.mxu0 %v7581_v50  ;;  %6906 = vmatprep.subr.bf16.mxu1 %v7582_v57  ;;  %v7600_v57 = vld [vmem:[%s9902_s16 + $0xb0] sm:$0xff]  }
0x155e   :  { %7229 = vmatprep.subr.bf16.mxu0 %v7765_v61 }
0x1560   :  { %6907 = vmatpush3.bf16.msra.mxu1 %v7583_v58  ;;  %v7599_v58 = vld [vmem:[%s9902_s16 + $0x30] sm:$0xff]  }
0x1561   :  { %7230 = vmatpush3.bf16.msra.mxu0 %v7584_v60  ;;  %6908 = vmatprep.subr.bf16.mxu1 %v7585_v1  ;;  %v7603_v60 = vld [vmem:[%s9902_s16 + $0xa8] sm:$0xff]  }
0x1562   :  { %7231 = vmatprep.subr.bf16.mxu0 %v7765_v61 }
0x1564   :  { %6909 = vmatpush3.bf16.msra.mxu1 %v7586_v2 }
0x1565   :  { %7232 = vmatpush3.bf16.msra.mxu0 %v7587_v4  ;;  %6910 = vmatprep.subr.bf16.mxu1 %v7588_v9  ;;  %v7605_v9 = vld [vmem:[%s9902_s16 + $0x20] sm:$0xff]  }
0x1566   :  { %7233 = vmatprep.subr.bf16.mxu0 %v7765_v61 }
0x1568   :  { %6911 = vmatpush3.bf16.msra.mxu1 %v7589_v12  ;;  %v7606_v12 = vld [vmem:[%s9902_s16 + $0xa0] sm:$0xff]  }
0x1569   :  { %7234 = vmatpush3.bf16.msra.mxu0 %v7590_v13  ;;  %6912 = vmatprep.subr.bf16.mxu1 %v7591_v40 }
0x156a   :  { %7239 = vmatprep.subr.bf16.mxu0 %v7765_v61 }
0x156c   :  { %6913 = vmatpush3.bf16.msra.mxu1 %v7592_v43  ;;  %v7608_v43 = vld [vmem:[%s9902_s16 + $0x18] sm:$0xff]  }
0x156d   :  { %6914 = vmatprep.subr.bf16.mxu1 %v7593_v46 }
0x1570   :  { %6915 = vmatpush3.bf16.msra.mxu1 %v7594_v23 }
0x160c   :  { %v3812_v51 = vpop.f32.mrf.mxu0 }
0x160e   :  { %v7217_v52 = vpop.f32.mrf.mxu0 }
0x160f   :  { %v7595_v52 = vld [vmem:[%s9902_s16 + $0x78] sm:$0xff]  }
0x1610   :  { %v3815_v53 = vpop.f32.mrf.mxu0  ;;  %6931 = vmatprep.subr.bf16.mxu1 %v7595_v52 }
0x1612   :  { %v7218_v54 = vpop.f32.mrf.mxu0 }
0x1613   :  { %v6885_v55 = vpop.f32.mrf.mxu1  ;;  %v7597_v54 = vld [vmem:[%s9902_s16 + $0xb8] sm:$0xff]  }
0x1615   :  { %v6886_v59 = vpop.f32.mrf.mxu1 }
0x1616   :  { %v6887_v62 = vadd.f32 %v6886_v59, %v6885_v55  ;;  %v7598_v55 = vld [vmem:[%s9902_s16 + $0x70] sm:$0xff]   ;;  %v7601_v59 = vld [vmem:[%s9902_s16 + $0x68] sm:$0xff]  }
0x1617   :  { %v6888_v63 = vpop.f32.mrf.mxu1 }
0x1618   :  { %v3813_v6 = vadd.f32 %v6887_v62, %v3812_v51  ;;  %v7602_v62 = vld [vmem:[%s9902_s16 + $0x28] sm:$0xff]  }
0x1619   :  { %v6889_v3 = vpop.f32.mrf.mxu1 }
0x161a   :  { %v6890_v7 = vadd.f32 %v6889_v3, %v6888_v63  ;;  %v3819_v14 = vmax.f32 %v3813_v6, 0.0  ;;  %v7604_v63 = vld [vmem:[%s9902_s16 + $0x60] sm:$0xff]  }
0x161c   :  { %v3816_v11 = vadd.f32 %v6890_v7, %v3815_v53  ;;  %v7596_v53 = vld [vmem:[%s9902_s16 + $0x38] sm:$0xff]  }
0x161e   :  { %v3820_v16 = vmax.f32 %v3816_v11, 0.0 }
0x1620   :  { %v3821_v45 = vpack.c.bf16 %v3820_v16, %v3819_v14  ;;  %v7607_v16 = vld [vmem:[%s9902_s16 + $0x58] sm:$0xff]  }
0x1622   :  { %3825 = vrot.lane.b32.xlu0 %v3821_v45, %s7764_s4  ;;  %3823 = vrot.lane.b32.xlu1 %v3821_v45, %s7760_s26 }
0x1694   :  { %v3826_v18 = vpop.permute.xlu0 %3825  ;;  %v3824_v19 = vpop.permute.xlu1 %3823 }
0x1695   :  { %v3829_v20 = vsel %vm565_vm12, %v3824_v19, %v3826_v18  ;;  %v7610_v18 = vld [vmem:[%s9902_s16 + $0x50] sm:$0xff]  }
0x1696   :  { %v3830_v24 = vsel %vm1827_vm7, %v3829_v20, %v3824_v19  ;;  %v7611_v19 = vld [vmem:[%s9902_s16 + $0x10] sm:$0xff]  }
0x1697   :  { %v3831_v25 = vshrl.u32 %v3830_v24, 16  ;;  %v3834_v26 = vshll.u32 %v3830_v24, 16 }
0x1699   :  { %v3833_v27 = vrot.slane %v3831_v25, 7  ;;  %v3840_v28 = vrot.slane %v3831_v25, 3  ;;  %v3841_v29 = vrot.slane %v3834_v26, 4  ;;  %v7612_v25 = vld [vmem:[%s9902_s16 + $0x90] sm:$0xff]  }
0x169b   :  { %v3836_v30 = vor.u32 %v3834_v26, %v3833_v27  ;;  %v3842_v32 = vor.u32 %v3841_v29, %v3840_v28  ;;  %v7614_v27 = vld [vmem:[%s9902_s16 + $0x8] sm:$0xff]   ;;  %v7616_v29 = vld [vmem:[%s9902_s16 + $0x40] sm:$0xff]  }
0x169c   :  { %v7615_v28 = vld [vmem:[%s9902_s16 + $0x88] sm:$0xff]  }
0x169d   :  { %v3838_v33 = vsel %vm7977_vm5, 0, %v3836_v30  ;;  %v3844_v15 = vsel %vm7977_vm5, 0, %v3842_v32 }
0x169e   :  { %v3839_v17 = vsel %vm7985_vm6, %v3838_v33, 0  ;;  %v3845_v21 = vsel %vm7985_vm6, %v3844_v15, 0 }
0x169f   :  { %v3854_v22 = vrot.slane %v3839_v17, 1  ;;  %v6533_v34 = vrot.slane %v3845_v21, 5  ;;  %v3849_v35 = vshll.u32 %v3839_v17, 16  ;;  %v3858_v36 = vshll.u32 %v3845_v21, 16 }
0x16a0   :  { %v3856_v41 = vshrl.u32 %v3845_v21, 16  ;;  %v3847_v44 = vshrl.u32 %v3839_v17, 16  ;;  %v3864_v8 = vrot.slane %v3845_v21, 4 }
0x16a1   :  { %v3876_v38 = vsel %vm197_vm4, %v3854_v22, %v6533_v34  ;;  %v3851_v39 = vrot.slane %v3849_v35, 1  ;;  %v3860_v42 = vrot.slane %v3858_v36, 1  ;;  %v7618_v34 = vld [vmem:[%s9902_s16 + $0x80] sm:$0xff]  }
0x16a2   :  { %7236 = vmatmul.mubr.bf16.vlgmr.msra.gmra.mxu0 %v3876_v38  ;;  %v3868_v51 = vsel %vm197_vm4, %v3839_v17, %v3864_v8  ;;  %v7617_v17 = vld [vmem:[%s9902_s16] sm:$0xff]  }
0x16a3   :  { %7255 = vmatprep.mubr.msk.bf16.mxu0 %vm7766_vm9, %v7765_v61  ;;  %v3861_v47 = vor.u32 %v3860_v42, %v3856_v41  ;;  %v3852_v48 = vor.u32 %v3851_v39, %v3847_v44  ;;  %7240 = vmatpush3.bf16.msra.mxu0 %v7597_v54 }
0x16a4   :  { %7241 = vmatprep.subr.bf16.mxu0 %v7765_v61 }
0x16a5   :  { %v3865_v49 = vrot.slane %v3861_v47, 4 }
0x16a7   :  { %v3872_v50 = vsel %vm197_vm4, %v3852_v48, %v3865_v49  ;;  %7242 = vmatpush3.bf16.msra.mxu0 %v7600_v57 }
0x16a8   :  { %4054 = vmatprep.mubr.bf16.mxu1 %v3872_v50  ;;  %7243 = vmatprep.subr.bf16.mxu0 %v7765_v61 }
0x16a9   :  { %4055 = vmatmul.mubr.bf16.vlgmr.msra.gmra.mxu1 %v3868_v51 }
0x16aa   :  { %6932 = vmatpush3.bf16.msra.mxu1 %v7596_v53 }
0x16ab   :  { %6933 = vmatprep.subr.bf16.mxu1 %v7598_v55  ;;  %7244 = vmatpush3.bf16.msra.mxu0 %v7603_v60 }
0x16ac   :  { %7245 = vmatprep.subr.bf16.mxu0 %v7765_v61 }
0x16ae   :  { %6934 = vmatpush3.bf16.msra.mxu1 %v7599_v58 }
0x16af   :  { %6935 = vmatprep.subr.bf16.mxu1 %v7601_v59  ;;  %7246 = vmatpush3.bf16.msra.mxu0 %v7606_v12 }
0x16b0   :  { %7247 = vmatprep.subr.bf16.mxu0 %v7765_v61 }
0x16b2   :  { %6936 = vmatpush3.bf16.msra.mxu1 %v7602_v62 }
0x16b3   :  { %6937 = vmatprep.subr.bf16.mxu1 %v7604_v63  ;;  %7248 = vmatpush3.bf16.msra.mxu0 %v7609_v10 }
0x16b4   :  { %7249 = vmatprep.subr.bf16.mxu0 %v7765_v61 }
0x16b6   :  { %6938 = vmatpush3.bf16.msra.mxu1 %v7605_v9 }
0x16b7   :  { %6939 = vmatprep.subr.bf16.mxu1 %v7607_v16  ;;  %7250 = vmatpush3.bf16.msra.mxu0 %v7612_v25 }
0x16b8   :  { %7251 = vmatprep.subr.bf16.mxu0 %v7765_v61 }
0x16ba   :  { %6940 = vmatpush3.bf16.msra.mxu1 %v7608_v43 }
0x16bb   :  { %6941 = vmatprep.subr.bf16.mxu1 %v7610_v18  ;;  %7252 = vmatpush3.bf16.msra.mxu0 %v7615_v28 }
0x16bc   :  { %7253 = vmatprep.subr.bf16.mxu0 %v7765_v61 }
0x16be   :  { %6942 = vmatpush3.bf16.msra.mxu1 %v7611_v19 }
0x16bf   :  { %7254 = vmatpush3.bf16.msra.mxu0 %v7618_v34 }
0x1762   :  { %v4097_v1 = vpop.f32.mrf.mxu0 }
0x1764   :  { %v7237_v2 = vpop.f32.mrf.mxu0 }
0x1766   :  { %v4100_v3 = vpop.f32.mrf.mxu0 }
0x1768   :  { %v7238_v4 = vpop.f32.mrf.mxu0 }
0x1769   :  { %v6916_v6 = vpop.f32.mrf.mxu1 }
0x176b   :  { %v6917_v7 = vpop.f32.mrf.mxu1 }
0x176c   :  { %v6918_v11 = vadd.f32 %v6917_v7, %v6916_v6 }
0x176d   :  { %v6919_v13 = vpop.f32.mrf.mxu1 }
0x176e   :  { %v4057_v14 = vadd.f32 %v6918_v11, %v3438_v56 }
0x176f   :  { %v6920_v40 = vpop.f32.mrf.mxu1 }
0x1770   :  { %v4098_v45 = vadd.f32 %v4097_v1, %v4057_v14  ;;  %v6921_v46 = vadd.f32 %v6920_v40, %v6919_v13  ;;  %v7631_v13 = vld [vmem:[%s9903_s17 + $0x28] sm:$0xff]  }
0x1772   :  { %v4104_v56 = vmax.f32 %v4098_v45, 0.0  ;;  %v4060_v23 = vadd.f32 %v6921_v46, %v3439_v0  ;;  %v7613_v0 = vld [vmem:[%s9902_s16 + $0x48] sm:$0xff]  }
0x1773   :  { %6943 = vmatprep.subr.bf16.mxu1 %v7613_v0 }
0x1774   :  { %v4693_v20 = vrot.slane %v4104_v56, 1  ;;  %v4101_v24 = vadd.f32 %v4100_v3, %v4060_v23  ;;  %v4695_v26 = vrot.slane %v4104_v56, 2  ;;  %6944 = vmatpush3.bf16.msra.mxu1 %v7614_v27  ;;  %v4697_v38 = vrot.slane %v4104_v56, 3 }
0x1775   :  { %6945 = vmatprep.subr.bf16.mxu1 %v7616_v29  ;;  %v7619_v29 = vld [vmem:[%s9904_s18 + $0x18] sm:$0xff]  }
0x1776   :  { %v4105_v5 = vmax.f32 %v4101_v24, 0.0  ;;  %v4699_v30 = vsel %vm141_vm0, %v4104_v56, %v4693_v20 }
0x1777   :  { %v4700_v35 = vsel %vm4273_vm8, %v4699_v30, %v4695_v26 }
0x1778   :  { %v4704_v32 = vrot.slane %v4105_v5, 1  ;;  %v4706_v33 = vrot.slane %v4105_v5, 2  ;;  %v4234_v15 = vpack.c.bf16 %v4105_v5, %v4104_v56  ;;  %v4708_v21 = vrot.slane %v4105_v5, 3  ;;  %6946 = vmatpush3.bf16.msra.mxu1 %v7617_v17 }
0x1779   :  { %7259 = vmatprep.subr.bf16.mxu1 %v7765_v61  ;;  %v4702_v42 = vsel %vm4601_vm11, %v4700_v35, %v4697_v38 }
0x177a   :  { %v4710_v22 = vsel %vm141_vm0, %v4105_v5, %v4704_v32  ;;  %4238 = vrot.lane.b32.xlu0 %v4234_v15, %s7764_s4  ;;  %4236 = vrot.lane.b32.xlu1 %v4234_v15, %s7760_s26 }
0x177b   :  { %v4711_v36 = vsel %vm4273_vm8, %v4710_v22, %v4706_v33 }
0x177c   :  { %v4712_v39 = vsel %vm4601_vm11, %v4711_v36, %v4708_v21  ;;  %v7620_v36 = vld [vmem:[%s9904_s18 + $0x10] sm:$0xff]  }
0x177d   :  { %v4714_v41 = vrot.slane %v4712_v39, 4  ;;  %v7621_v39 = vld [vmem:[%s9904_s18 + $0x8] sm:$0xff]  }
0x177f   :  { %v9269_v44 = vsel %vm197_vm4, %v4702_v42, %v4714_v41  ;;  %vm4274_vm4 = vsmask.f32 1280  ;;  %v7622_v41 = vld [vmem:[%s9904_s18] sm:$0xff]  }
0x1780   :  { %v4717_v42 = vpack.c.bf16 %v9269_v44, %v9269_v44 }
0x17ec   :  { %v4239_v47 = vpop.permute.xlu0 %4238  ;;  %v4237_v8 = vpop.permute.xlu1 %4236 }
0x17ed   :  { %v4242_v48 = vsel %vm565_vm12, %v4237_v8, %v4239_v47  ;;  %vm9284_vm12 = vmand %vm4273_vm8, %vm4274_vm4 }
0x17ee   :  { %v4243_v49 = vsel %vm1827_vm7, %v4242_v48, %v4237_v8 }
0x17ef   :  { %v4244_v50 = vshrl.u32 %v4243_v49, 16  ;;  %v4247_v51 = vshll.u32 %v4243_v49, 16 }
0x17f1   :  { %v4246_v52 = vrot.slane %v4244_v50, 7  ;;  %v4253_v53 = vrot.slane %v4244_v50, 3  ;;  %v4254_v54 = vrot.slane %v4247_v51, 4 }
0x17f3   :  { %v4249_v55 = vor.u32 %v4247_v51, %v4246_v52  ;;  %v4255_v57 = vor.u32 %v4254_v54, %v4253_v53 }
0x17f5   :  { %v4251_v58 = vsel %vm7977_vm5, 0, %v4249_v55  ;;  %v4257_v59 = vsel %vm7977_vm5, 0, %v4255_v57 }
0x17f6   :  { %v4252_v60 = vsel %vm7985_vm6, %v4251_v58, 0  ;;  %v4258_v62 = vsel %vm7985_vm6, %v4257_v59, 0  ;;  %vm4602_vm6 = vsmask.f32 2304 }
0x17f7   :  { %v4260_v63 = vshll.u32 %v4252_v60, 16  ;;  %v4299_v1 = vshll.u32 %v4258_v62, 16  ;;  %v4265_v2 = vrot.slane %v4252_v60, 1  ;;  %v4277_v3 = vshrl.u32 %v4252_v60, 16  ;;  %vm9428_vm13 = vmand %vm4601_vm11, %vm4602_vm6 }
0x17f8   :  { %v4304_v4 = vrot.slane %v4258_v62, 1  ;;  %v4313_v6 = vshrl.u32 %v4258_v62, 16  ;;  %v4318_v40 = vrot.slane %v4258_v62, 2  ;;  %v4282_v46 = vrot.slane %v4252_v60, 2 }
0x17f9   :  { %v4281_v7 = vrot.slane %v4277_v3, 1  ;;  %v4284_v9 = vsel %vm7977_vm5, %v4277_v3, %v4265_v2  ;;  %v4262_v11 = vrot.slane %v4260_v63, 1  ;;  %v4266_v12 = vrot.slane %v4260_v63, 2  ;;  %v7628_v3 = vld [vmem:[%s9903_s17 + $0xb8] sm:$0xff]  }
0x17fa   :  { %v4317_v37 = vrot.slane %v4313_v6, 1  ;;  %v4320_v14 = vsel %vm7977_vm5, %v4313_v6, %v4304_v4  ;;  %v4301_v16 = vrot.slane %v4299_v1, 1  ;;  %v4305_v45 = vrot.slane %v4299_v1, 2  ;;  %v7627_v6 = vld [vmem:[%s9903_s17 + $0x30] sm:$0xff]  }
0x17fb   :  { %v4268_v43 = vsel %vm7977_vm5, %v4252_v60, %v4262_v11  ;;  %v4287_v10 = vsel %vm141_vm0, %v4284_v9, %v4281_v7  ;;  %v4292_v24 = vsel %vm7977_vm5, %v4265_v2, %v4266_v12  ;;  %v4326_v27 = vrot.slane %v4299_v1, 3  ;;  %v7623_v60 = vld [vmem:[%s9903_s17 + $0x78] sm:$0xff]   ;;  %v7629_v9 = vld [vmem:[%s9903_s17 + $0x68] sm:$0xff]   ;;  %v7632_v11 = vld [vmem:[%s9903_s17 + $0xb0] sm:$0xff]  }
0x17fc   :  { %v4323_v56 = vsel %vm141_vm0, %v4320_v14, %v4317_v37  ;;  %v4307_v23 = vsel %vm7977_vm5, %v4258_v62, %v4301_v16  ;;  %v4271_v19 = vsel %vm141_vm0, %v4268_v43, %v4265_v2  ;;  %v4289_v0 = vsel %vm9284_vm12, %v4287_v10, %v4282_v46  ;;  %v7624_v62 = vld [vmem:[%s9903_s17 + $0x38] sm:$0xff]   ;;  %6967 = vmatprep.subr.bf16.mxu0 %v7623_v60  ;;  %v7633_v37 = vld [vmem:[%s9903_s17 + $0x60] sm:$0xff]   ;;  %v7636_v14 = vld [vmem:[%s9903_s17 + $0xa8] sm:$0xff]  }
0x17fd   :  { %v4325_v18 = vsel %vm9284_vm12, %v4323_v56, %v4318_v40  ;;  %v4310_v20 = vsel %vm141_vm0, %v4307_v23, %v4304_v4  ;;  %v4328_v28 = vsel %vm7977_vm5, %v4304_v4, %v4305_v45  ;;  %v4276_v32 = vsel %vm9284_vm12, %v4271_v19, %v4266_v12  ;;  %v7626_v1 = vld [vmem:[%s9903_s17 + $0xf8] sm:$0xff]   ;;  %v7630_v4 = vld [vmem:[%s9903_s17 + $0xf0] sm:$0xff]   ;;  %v7634_v12 = vld [vmem:[%s9903_s17 + $0xe8] sm:$0xff]  }
0x17fe   :  { %v4338_v25 = vrot.slane %v4325_v18, 6  ;;  %v4312_v5 = vsel %vm9284_vm12, %v4310_v20, %v4305_v45  ;;  %v4295_v33 = vsel %vm141_vm0, %v4292_v24, %v4282_v46  ;;  %v4331_v15 = vsel %vm141_vm0, %v4328_v28, %v4318_v40  ;;  %v7638_v16 = vld [vmem:[%s9903_s17 + $0xe0] sm:$0xff]   ;;  %v7637_v43 = vld [vmem:[%s9903_s17 + $0x58] sm:$0xff]   ;;  %v7641_v56 = vld [vmem:[%s9903_s17 + $0x50] sm:$0xff]  }
0x17ff   :  { %v4337_v26 = vrot.slane %v4312_v5, 6  ;;  %v4290_v21 = vrot.slane %v4260_v63, 3  ;;  %v4333_v22 = vsel %vm9284_vm12, %v4331_v15, %v4326_v27  ;;  %v7625_v63 = vld [vmem:[%s9903_s17 + $0x70] sm:$0xff]   ;;  %v7635_v40 = vld [vmem:[%s9903_s17 + $0x20] sm:$0xff]   ;;  %v7642_v46 = vld [vmem:[%s9903_s17 + $0xd8] sm:$0xff]  }
0x1800   :  { %v4347_v30 = vsel %vm4273_vm8, %v4289_v0, %v4338_v25  ;;  %v4339_v34 = vrot.slane %v4333_v22, 6  ;;  %v7640_v45 = vld [vmem:[%s9903_s17 + $0xa0] sm:$0xff]   ;;  %v7639_v10 = vld [vmem:[%s9903_s17 + $0x18] sm:$0xff]   ;;  %v7646_v18 = vld [vmem:[%s9903_s17 + $0xd0] sm:$0xff]  }
0x1801   :  { %4529 = vmatprep.mubr.bf16.mxu1 %v4347_v30  ;;  %v4343_v17 = vsel %vm4273_vm8, %v4276_v32, %v4337_v26  ;;  %v4297_v35 = vsel %vm9284_vm12, %v4295_v33, %v4290_v21  ;;  %v7644_v23 = vld [vmem:[%s9903_s17 + $0x98] sm:$0xff]   ;;  %v7643_v19 = vld [vmem:[%s9903_s17 + $0x10] sm:$0xff]   ;;  %v7645_v20 = vld [vmem:[%s9903_s17 + $0x48] sm:$0xff]  }
0x1802   :  { %4530 = vmatmul.mubr.bf16.vlgmr.msra.gmra.mxu1 %v4343_v17  ;;  %v4351_v38 = vsel %vm4273_vm8, %v4297_v35, %v4339_v34  ;;  %v7648_v24 = vld [vmem:[%s9903_s17 + $0x90] sm:$0xff]   ;;  %v7647_v25 = vld [vmem:[%s9903_s17 + $0x8] sm:$0xff]  }
0x1803   :  { %7260 = vmatpush3.bf16.msra.mxu1 %v7619_v29  ;;  %7267 = vmatprep.mubr.msk.bf16.mxu1 %vm7766_vm9, %v7765_v61 }
0x1804   :  { %7261 = vmatprep.subr.bf16.mxu1 %v7765_v61  ;;  %7256 = vmatmul.mubr.bf16.vlgmr.msra.gmra.mxu0 %v4351_v38  ;;  %v7649_v38 = vld [vmem:[%s9903_s17 + $0x40] sm:$0xff]  }
0x1805   :  { %6968 = vmatpush3.bf16.msra.mxu0 %v7624_v62 }
0x1806   :  { %6969 = vmatprep.subr.bf16.mxu0 %v7625_v63 }
0x1807   :  { %7262 = vmatpush3.bf16.msra.mxu1 %v7620_v36 }
0x1808   :  { %7263 = vmatprep.subr.bf16.mxu1 %v7765_v61 }
0x1809   :  { %6970 = vmatpush3.bf16.msra.mxu0 %v7627_v6 }
0x180a   :  { %6971 = vmatprep.subr.bf16.mxu0 %v7629_v9 }
0x180b   :  { %7264 = vmatpush3.bf16.msra.mxu1 %v7621_v39  ;;  %v7650_v39 = vld [vmem:[%s9903_s17 + $0xc8] sm:$0xff]  }
0x180c   :  { %7265 = vmatprep.subr.bf16.mxu1 %v7765_v61 }
0x180d   :  { %6972 = vmatpush3.bf16.msra.mxu0 %v7631_v13 }
0x180e   :  { %6973 = vmatprep.subr.bf16.mxu0 %v7633_v37 }
0x180f   :  { %7266 = vmatpush3.bf16.msra.mxu1 %v7622_v41  ;;  %v7651_v41 = vld [vmem:[%s9903_s17] sm:$0xff]  }
0x1810   :  { %6989 = vmatprep.subr.bf16.mxu1 %v7626_v1 }
0x1811   :  { %6974 = vmatpush3.bf16.msra.mxu0 %v7635_v40 }
0x1812   :  { %7268 = vmatmul.mubr.msk.bf16.vlgmr.msra.gmra.mxu1 %vm1830_vm10, %v4717_v42  ;;  %6975 = vmatprep.subr.bf16.mxu0 %v7637_v43 }
0x1813   :  { %6990 = vmatpush3.bf16.msra.mxu1 %v7628_v3 }
0x1814   :  { %6991 = vmatprep.subr.bf16.mxu1 %v7630_v4 }
0x1815   :  { %6976 = vmatpush3.bf16.msra.mxu0 %v7639_v10 }
0x1816   :  { %6977 = vmatprep.subr.bf16.mxu0 %v7641_v56 }
0x1817   :  { %6992 = vmatpush3.bf16.msra.mxu1 %v7632_v11 }
0x1818   :  { %6993 = vmatprep.subr.bf16.mxu1 %v7634_v12 }
0x1819   :  { %6978 = vmatpush3.bf16.msra.mxu0 %v7643_v19  ;;  %v7655_v19 = vld [vmem:[%s9903_s17 + $0x118] sm:$0xff]  }
0x181a   :  { %6979 = vmatprep.subr.bf16.mxu0 %v7645_v20 }
0x181b   :  { %6994 = vmatpush3.bf16.msra.mxu1 %v7636_v14 }
0x181c   :  { %6995 = vmatprep.subr.bf16.mxu1 %v7638_v16 }
0x181d   :  { %6980 = vmatpush3.bf16.msra.mxu0 %v7647_v25 }
0x181e   :  { %6981 = vmatprep.subr.bf16.mxu0 %v7649_v38 }
0x181f   :  { %6996 = vmatpush3.bf16.msra.mxu1 %v7640_v45 }
0x1820   :  { %6997 = vmatprep.subr.bf16.mxu1 %v7642_v46 }
0x1821   :  { %6982 = vmatpush3.bf16.msra.mxu0 %v7651_v41 }
0x1822   :  { %7271 = vmatprep.subr.bf16.mxu0 %v7765_v61 }
0x1823   :  { %6998 = vmatpush3.bf16.msra.mxu1 %v7644_v23 }
0x1824   :  { %6999 = vmatprep.subr.bf16.mxu1 %v7646_v18 }
0x1827   :  { %7000 = vmatpush3.bf16.msra.mxu1 %v7648_v24 }
0x1828   :  { %7001 = vmatprep.subr.bf16.mxu1 %v7650_v39 }
0x18c2   :  { %v6947_v47 = vpop.f32.mrf.mxu1 }
0x18c4   :  { %v6948_v8 = vpop.f32.mrf.mxu1  ;;  %v4571_v48 = vpop.f32.mrf.mxu0 }
0x18c5   :  { %v6949_v49 = vadd.f32 %v6948_v8, %v6947_v47  ;;  %v7652_v47 = vld [vmem:[%s9903_s17 + $0x88] sm:$0xff]  }
0x18c6   :  { %v6950_v50 = vpop.f32.mrf.mxu1  ;;  %v7257_v52 = vpop.f32.mrf.mxu0  ;;  %7002 = vmatpush3.bf16.msra.mxu1 %v7652_v47 }
0x18c7   :  { %v4572_v51 = vadd.f32 %v6949_v49, %v4571_v48 }
0x18c8   :  { %v6951_v53 = vpop.f32.mrf.mxu1  ;;  %v4574_v55 = vpop.f32.mrf.mxu0 }
0x18c9   :  { %v4577_v54 = vmax.f32 %v4572_v51, 0.0  ;;  %v7653_v53 = vld [vmem:[%s9903_s17 + $0xc0] sm:$0xff]  }
0x18ca   :  { %v7258_v58 = vpop.f32.mrf.mxu0  ;;  %7003 = vmatprep.subr.bf16.mxu1 %v7653_v53 }
0x18cb   :  { %v9339_v57 = vpack.c.bf16 %v4577_v54, %v4577_v54  ;;  %v7654_v54 = vld [vmem:[%s9903_s17 + $0x80] sm:$0xff]  }
0x18cc   :  { %7004 = vmatpush3.bf16.msra.mxu1 %v7654_v54 }
0x18cd   :  { %4580 = vrot.lane.b32.xlu1 %v9339_v57, %s7767_s7  ;;  %v4591_v5 = vshrl.u32 %v9339_v57, 16  ;;  %v4594_v0 = vshll.u32 %v9339_v57, 16 }
0x18cf   :  { %v4609_v26 = vrot.slane %v4591_v5, 1  ;;  %v4610_v27 = vrot.slane %v4594_v0, 2  ;;  %v4593_v28 = vrot.slane %v4591_v5, 7 }
0x18d1   :  { %v4611_v29 = vor.u32 %v4610_v27, %v4609_v26  ;;  %v4596_v33 = vor.u32 %v4594_v0, %v4593_v28  ;;  %v7656_v27 = vld [vmem:[%s9903_s17 + $0x110] sm:$0xff]  }
0x18d2   :  { %v9343_v59 = vpop.f32.mrf.mxu1 }
0x18d3   :  { %v4615_v22 = vsel %vm7977_vm5, 0, %v4611_v29  ;;  %v4600_v42 = vsel %vm7977_vm5, 0, %v4596_v33  ;;  %v7657_v29 = vld [vmem:[%s9903_s17 + $0x108] sm:$0xff]  }
0x18d4   :  { %v7269_v44 = vpop.f32.mrf.mxu1  ;;  %v9450_v49 = vsel %vm9428_vm13, %v4615_v22, 0  ;;  %v9458_v52 = vsel %vm9428_vm13, %v4600_v42, 0 }
0x18d5   :  { %v4654_v62 = vshll.u32 %v9450_v49, 16  ;;  %v4628_v1 = vshll.u32 %v9458_v52, 16  ;;  %v4652_v16 = vshrl.u32 %v9450_v49, 16  ;;  %v4626_v40 = vshrl.u32 %v9458_v52, 16 }
0x18d6   :  { %v4782_v2 = vpop.f32.mrf.mxu1  ;;  %v6583_v33 = vrot.slane %v9450_v49, 7 }
0x18d7   :  { %v4656_v13 = vrot.slane %v4654_v62, 1  ;;  %v4630_v14 = vrot.slane %v4628_v1, 1  ;;  %v7666_v62 = vld [vmem:[%s9905_s19 + $0xf0] sm:$0xff]   ;;  %v7665_v1 = vld [vmem:[%s9905_s19 + $0x68] sm:$0xff]  }
0x18d8   :  { %v7270_v7 = vpop.f32.mrf.mxu1 }
0x18d9   :  { %v4657_v43 = vor.u32 %v4656_v13, %v4652_v16  ;;  %v4631_v45 = vor.u32 %v4630_v14, %v4626_v40  ;;  %v7676_v13 = vld [vmem:[%s9905_s19 + $0xa0] sm:$0xff]   ;;  %v7675_v14 = vld [vmem:[%s9905_s19 + $0x18] sm:$0xff]   ;;  %v7677_v16 = vld [vmem:[%s9905_s19 + $0x50] sm:$0xff]  }
0x18da   :  { %v7680_v40 = vld [vmem:[%s9905_s19 + $0x98] sm:$0xff]  }
0x193f   :  { %v4581_v30 = vpop.permute.xlu1 %4580 }
0x1940   :  { %v4584_v32 = vsel %vm1830_vm10, %v9339_v57, %v4581_v30  ;;  %v7658_v30 = vld [vmem:[%s9903_s17 + $0x100] sm:$0xff]  }
0x1941   :  { %v4585_v15 = vshrl.u32 %v4584_v32, 16  ;;  %v4588_v17 = vshll.u32 %v4584_v32, 16  ;;  %v4641_v32 = vrot.slane %v9458_v52, 1 }
0x1943   :  { %v4587_v34 = vrot.slane %v4585_v15, 7  ;;  %v4606_v35 = vrot.slane %v4585_v15, 1  ;;  %v4607_v36 = vrot.slane %v4588_v17, 2  ;;  %v4691_v15 = vsel %vm4273_vm8, %v4641_v32, %v6583_v33 }
0x1945   :  { %v4590_v8 = vor.u32 %v4588_v17, %v4587_v34  ;;  %v4608_v48 = vor.u32 %v4607_v36, %v4606_v35 }
0x1947   :  { %v4599_v50 = vsel %vm7977_vm5, 0, %v4590_v8  ;;  %v4614_v51 = vsel %vm7977_vm5, 0, %v4608_v48 }
0x1948   :  { %v4604_v55 = vsel %vm9428_vm13, %v4599_v50, 0  ;;  %v4616_v57 = vsel %vm9428_vm13, %v4614_v51, 0 }
0x1949   :  { %v4640_v58 = vrot.slane %v4604_v55, 1  ;;  %v6582_v44 = vrot.slane %v4616_v57, 7  ;;  %v4647_v60 = vshll.u32 %v4616_v57, 16  ;;  %v4621_v63 = vshll.u32 %v4604_v55, 16 }
0x194a   :  { %v4670_v2 = vrot.slane %v4616_v57, 6  ;;  %v4645_v4 = vshrl.u32 %v4616_v57, 16  ;;  %v4619_v7 = vshrl.u32 %v4604_v55, 16  ;;  %v7660_v57 = vld [vmem:[%s9905_s19 + $0x38] sm:$0xff]  }
0x194b   :  { %v4687_v3 = vsel %vm4273_vm8, %v4640_v58, %v6582_v44  ;;  %v4649_v6 = vrot.slane %v4647_v60, 1  ;;  %v4623_v9 = vrot.slane %v4621_v63, 1  ;;  %v7661_v58 = vld [vmem:[%s9905_s19 + $0x70] sm:$0xff]   ;;  %v7662_v44 = vld [vmem:[%s9905_s19 + $0xf8] sm:$0xff]  }
0x194c   :  { %5075 = vmatprep.mubr.bf16.mxu1 %v4687_v3  ;;  %v4676_v11 = vsel %vm4273_vm8, %v4604_v55, %v4670_v2  ;;  %v7664_v60 = vld [vmem:[%s9905_s19 + $0xb8] sm:$0xff]   ;;  %v7663_v63 = vld [vmem:[%s9905_s19 + $0x30] sm:$0xff]   ;;  %v7670_v3 = vld [vmem:[%s9905_s19 + $0xe8] sm:$0xff]  }
0x194d   :  { %v4650_v12 = vor.u32 %v4649_v6, %v4645_v4  ;;  %v4624_v37 = vor.u32 %v4623_v9, %v4619_v7  ;;  %v7668_v2 = vld [vmem:[%s9905_s19 + $0xb0] sm:$0xff]   ;;  %v7667_v4 = vld [vmem:[%s9905_s19 + $0x28] sm:$0xff]   ;;  %v7669_v6 = vld [vmem:[%s9905_s19 + $0x60] sm:$0xff]  }
0x194e   :  { %v7672_v7 = vld [vmem:[%s9905_s19 + $0xa8] sm:$0xff]   ;;  %v7674_v9 = vld [vmem:[%s9905_s19 + $0xe0] sm:$0xff]  }
0x194f   :  { %4658 = vrot.lane.b32.xlu0 %v4650_v12, %s7767_s7  ;;  %4632 = vrot.lane.b32.xlu1 %v4624_v37, %s7767_s7  ;;  %v7673_v12 = vld [vmem:[%s9905_s19 + $0x58] sm:$0xff]  }
0x1950   :  { %v7678_v37 = vld [vmem:[%s9905_s19 + $0xd8] sm:$0xff]  }
0x1953   :  { %4660 = vrot.lane.b32.xlu0 %v4657_v43, %s7767_s7  ;;  %4634 = vrot.lane.b32.xlu1 %v4631_v45, %s7767_s7  ;;  %v7682_v43 = vld [vmem:[%s9905_s19 + $0xd0] sm:$0xff]  }
0x1954   :  { %v7679_v45 = vld [vmem:[%s9905_s19 + $0x10] sm:$0xff]  }
0x19c1   :  { %v4659_v46 = vpop.permute.xlu0 %4658  ;;  %v4633_v56 = vpop.permute.xlu1 %4632 }
0x19c2   :  { %v4668_v10 = vsel %vm1830_vm10, %v9450_v49, %v4659_v46  ;;  %v4643_v18 = vsel %vm1830_vm10, %v9458_v52, %v4633_v56 }
0x19c3   :  { %v4671_v23 = vrot.slane %v4668_v10, 6  ;;  %v7684_v10 = vld [vmem:[%s9905_s19 + $0x90] sm:$0xff]  }
0x19c5   :  { %v4661_v20 = vpop.permute.xlu0 %4660  ;;  %v4679_v24 = vsel %vm4273_vm8, %v4643_v18, %v4671_v23  ;;  %v4635_v5 = vpop.permute.xlu1 %4634 }
0x19c6   :  { %v4662_v25 = vsel %vm1830_vm10, %v4659_v46, %v4661_v20  ;;  %5035 = vmatprep.mubr.bf16.mxu0 %v4679_v24  ;;  %v4637_v26 = vsel %vm1830_vm10, %v4633_v56, %v4635_v5  ;;  %v7681_v46 = vld [vmem:[%s9905_s19 + $0x48] sm:$0xff]  }
0x19c7   :  { %v4672_v0 = vrot.slane %v4662_v25, 6  ;;  %5036 = vmatmul.mubr.bf16.vlgmr.msra.gmra.mxu0 %v4676_v11  ;;  %v7671_v11 = vld [vmem:[%s9905_s19 + $0x20] sm:$0xff]   ;;  %v7683_v56 = vld [vmem:[%s9905_s19 + $0x8] sm:$0xff]  }
0x19c8   :  { %7272 = vmatpush3.bf16.msra.mxu0 %v7655_v19  ;;  %7279 = vmatprep.mubr.msk.bf16.mxu0 %vm7766_vm9, %v7765_v61 }
0x19c9   :  { %v4683_v28 = vsel %vm4273_vm8, %v4637_v26, %v4672_v0  ;;  %7273 = vmatprep.subr.bf16.mxu0 %v7765_v61 }
0x19ca   :  { %5076 = vmatmul.mubr.bf16.vlgmr.msra.gmra.mxu1 %v4683_v28 }
0x19cc   :  { %7274 = vmatpush3.bf16.msra.mxu0 %v7656_v27 }
0x19cd   :  { %7275 = vmatprep.subr.bf16.mxu0 %v7765_v61 }
0x19d0   :  { %7276 = vmatpush3.bf16.msra.mxu0 %v7657_v29 }
0x19d1   :  { %7277 = vmatprep.subr.bf16.mxu0 %v7765_v61 }
0x19d4   :  { %7278 = vmatpush3.bf16.msra.mxu0 %v7658_v30 }
0x19d5   :  { %7038 = vmatprep.subr.bf16.mxu0 %v7662_v44 }
0x19d7   :  { %7280 = vmatmul.mubr.msk.bf16.vlgmr.msra.gmra.mxu0 %vm1830_vm10, %v4691_v15  ;;  %v7685_v15 = vld [vmem:[%s9905_s19 + $0x40] sm:$0xff]  }
0x19d8   :  { %7039 = vmatpush3.bf16.msra.mxu0 %v7664_v60 }
0x19d9   :  { %7040 = vmatprep.subr.bf16.mxu0 %v7666_v62 }
0x19dc   :  { %7041 = vmatpush3.bf16.msra.mxu0 %v7668_v2 }
0x19dd   :  { %7042 = vmatprep.subr.bf16.mxu0 %v7670_v3 }
0x19e0   :  { %7043 = vmatpush3.bf16.msra.mxu0 %v7672_v7 }
0x19e1   :  { %7044 = vmatprep.subr.bf16.mxu0 %v7674_v9 }
0x19e4   :  { %7045 = vmatpush3.bf16.msra.mxu0 %v7676_v13 }
0x19e5   :  { %7046 = vmatprep.subr.bf16.mxu0 %v7678_v37 }
0x19e8   :  { %7047 = vmatpush3.bf16.msra.mxu0 %v7680_v40 }
0x19e9   :  { %7048 = vmatprep.subr.bf16.mxu0 %v7682_v43 }
0x19ec   :  { %7049 = vmatpush3.bf16.msra.mxu0 %v7684_v10 }
0x1a87   :  { %v6983_v17 = vpop.f32.mrf.mxu0 }
0x1a89   :  { %v6984_v22 = vpop.f32.mrf.mxu0 }
0x1a8a   :  { %v7005_v34 = vpop.f32.mrf.mxu1  ;;  %v6985_v39 = vadd.f32 %v6984_v22, %v6983_v17  ;;  %v7686_v17 = vld [vmem:[%s9905_s19 + $0xc8] sm:$0xff]   ;;  %v7687_v22 = vld [vmem:[%s9905_s19] sm:$0xff]  }
0x1a8b   :  { %v6986_v35 = vpop.f32.mrf.mxu0  ;;  %7050 = vmatprep.subr.bf16.mxu0 %v7686_v17 }
0x1a8c   :  { %v7006_v36 = vpop.f32.mrf.mxu1  ;;  %v5038_v47 = vadd.f32 %v6985_v39, %v9343_v59  ;;  %v7659_v59 = vld [vmem:[%s9905_s19 + $0x78] sm:$0xff]   ;;  %v7688_v35 = vld [vmem:[%s9905_s19 + $0x88] sm:$0xff]  }
0x1a8d   :  { %v6987_v38 = vpop.f32.mrf.mxu0  ;;  %v7007_v8 = vadd.f32 %v7006_v36, %v7005_v34  ;;  %7016 = vmatprep.subr.bf16.mxu1 %v7659_v59  ;;  %7051 = vmatpush3.bf16.msra.mxu0 %v7688_v35 }
0x1a8e   :  { %v7008_v41 = vpop.f32.mrf.mxu1  ;;  %7017 = vmatpush3.bf16.msra.mxu1 %v7660_v57 }
0x1a8f   :  { %v5078_v48 = vadd.f32 %v7007_v8, %v5038_v47  ;;  %7018 = vmatprep.subr.bf16.mxu1 %v7661_v58  ;;  %v7689_v8 = vld [vmem:[%s9905_s19 + $0xc0] sm:$0xff]  }
0x1a90   :  { %v7009_v42 = vpop.f32.mrf.mxu1  ;;  %7052 = vmatprep.subr.bf16.mxu0 %v7689_v8 }
0x1a92   :  { %7019 = vmatpush3.bf16.msra.mxu1 %v7663_v63 }
0x1a93   :  { %7020 = vmatprep.subr.bf16.mxu1 %v7665_v1 }
0x1a96   :  { %7021 = vmatpush3.bf16.msra.mxu1 %v7667_v4 }
0x1a97   :  { %v5117_v50 = vpop.f32.mrf.mxu0  ;;  %7022 = vmatprep.subr.bf16.mxu1 %v7669_v6 }
0x1a98   :  { %v5118_v49 = vadd.f32 %v5117_v50, %v5078_v48  ;;  %v7690_v48 = vld [vmem:[%s9905_s19 + $0x80] sm:$0xff]  }
0x1a99   :  { %v7281_v51 = vpop.f32.mrf.mxu0  ;;  %7053 = vmatpush3.bf16.msra.mxu0 %v7690_v48 }
0x1a9a   :  { %v9511_v52 = vmax.f32 %v5118_v49, 0.0  ;;  %7023 = vmatpush3.bf16.msra.mxu1 %v7671_v11 }
0x1a9b   :  { %v5120_v53 = vpop.f32.mrf.mxu0  ;;  %7024 = vmatprep.subr.bf16.mxu1 %v7673_v12 }
0x1a9c   :  { %v9515_v54 = vpack.c.bf16 %v9511_v52, %v9511_v52 }
0x1a9d   :  { %v7282_v55 = vpop.f32.mrf.mxu0 }
0x1a9e   :  { %5270 = vrot.lane.b32.xlu0 %v9515_v54, %s7767_s7  ;;  %7025 = vmatpush3.bf16.msra.mxu1 %v7675_v14  ;;  %v5281_v23 = vshrl.u32 %v9515_v54, 16  ;;  %v5284_v18 = vshll.u32 %v9515_v54, 16 }
0x1a9f   :  { %7026 = vmatprep.subr.bf16.mxu1 %v7677_v16 }
0x1aa0   :  { %v5296_v19 = vrot.slane %v5281_v23, 1  ;;  %v5297_v20 = vrot.slane %v5284_v18, 2  ;;  %v5283_v24 = vrot.slane %v5281_v23, 7 }
0x1aa2   :  { %7027 = vmatpush3.bf16.msra.mxu1 %v7679_v45  ;;  %v5298_v25 = vor.u32 %v5297_v20, %v5296_v19  ;;  %v5286_v26 = vor.u32 %v5284_v18, %v5283_v24  ;;  %v7691_v45 = vld [vmem:[%s9905_s19 + $0x118] sm:$0xff]   ;;  %v7692_v20 = vld [vmem:[%s9905_s19 + $0x110] sm:$0xff]  }
0x1aa3   :  { %7028 = vmatprep.subr.bf16.mxu1 %v7681_v46 }
0x1aa4   :  { %v5302_v29 = vsel %vm7977_vm5, 0, %v5298_v25  ;;  %v5290_v34 = vsel %vm7977_vm5, 0, %v5286_v26  ;;  %v7693_v25 = vld [vmem:[%s9905_s19 + $0x108] sm:$0xff]  }
0x1aa5   :  { %v9619_v39 = vsel %vm9428_vm13, %v5302_v29, 0  ;;  %v9627_v47 = vsel %vm9428_vm13, %v5290_v34, 0 }
0x1aa6   :  { %7029 = vmatpush3.bf16.msra.mxu1 %v7683_v56  ;;  %v5340_v55 = vshll.u32 %v9619_v39, 16  ;;  %v5315_v57 = vshll.u32 %v9627_v47, 16  ;;  %v5338_v9 = vshrl.u32 %v9619_v39, 16  ;;  %v5313_v11 = vshrl.u32 %v9627_v47, 16 }
0x1aa7   :  { %7030 = vmatprep.subr.bf16.mxu1 %v7685_v15  ;;  %v6627_v26 = vrot.slane %v9619_v39, 7 }
0x1aa8   :  { %v5342_v4 = vrot.slane %v5340_v55, 1  ;;  %v5317_v7 = vrot.slane %v5315_v57, 1  ;;  %v7702_v55 = vld [vmem:[%s9906_s20 + $0xf0] sm:$0xff]   ;;  %v7701_v57 = vld [vmem:[%s9906_s20 + $0x68] sm:$0xff]  }
0x1aaa   :  { %7031 = vmatpush3.bf16.msra.mxu1 %v7687_v22  ;;  %v5343_v12 = vor.u32 %v5342_v4, %v5338_v9  ;;  %v5318_v13 = vor.u32 %v5317_v7, %v5313_v11  ;;  %v7712_v4 = vld [vmem:[%s9906_s20 + $0xa0] sm:$0xff]   ;;  %v7711_v7 = vld [vmem:[%s9906_s20 + $0x18] sm:$0xff]   ;;  %v7713_v9 = vld [vmem:[%s9906_s20 + $0x50] sm:$0xff]  }
0x1aab   :  { %7283 = vmatprep.subr.bf16.mxu1 %v7765_v61  ;;  %v7716_v11 = vld [vmem:[%s9906_s20 + $0x98] sm:$0xff]  }
0x1b10   :  { %v5271_v5 = vpop.permute.xlu0 %5270 }
0x1b11   :  { %v5274_v0 = vsel %vm1830_vm10, %v9515_v54, %v5271_v5  ;;  %v7694_v5 = vld [vmem:[%s9905_s19 + $0x100] sm:$0xff]  }
0x1b12   :  { %v5275_v27 = vshrl.u32 %v5274_v0, 16  ;;  %v5278_v28 = vshll.u32 %v5274_v0, 16  ;;  %v5327_v0 = vrot.slane %v9627_v47, 1 }
0x1b14   :  { %v5277_v30 = vrot.slane %v5275_v27, 7  ;;  %v5293_v32 = vrot.slane %v5275_v27, 1  ;;  %v5294_v33 = vrot.slane %v5278_v28, 2  ;;  %v5377_v27 = vsel %vm4273_vm8, %v5327_v0, %v6627_v26 }
0x1b16   :  { %v5280_v36 = vor.u32 %v5278_v28, %v5277_v30  ;;  %v5295_v38 = vor.u32 %v5294_v33, %v5293_v32 }
0x1b18   :  { %v5289_v41 = vsel %vm7977_vm5, 0, %v5280_v36  ;;  %v5301_v42 = vsel %vm7977_vm5, 0, %v5295_v38 }
0x1b19   :  { %v5291_v50 = vsel %vm9428_vm13, %v5289_v41, 0  ;;  %v5303_v49 = vsel %vm9428_vm13, %v5301_v42, 0 }
0x1b1a   :  { %v5326_v51 = vrot.slane %v5291_v50, 1  ;;  %v6626_v53 = vrot.slane %v5303_v49, 7  ;;  %v5333_v54 = vshll.u32 %v5303_v49, 16  ;;  %v5308_v59 = vshll.u32 %v5291_v50, 16 }
0x1b1b   :  { %v5356_v58 = vrot.slane %v5303_v49, 6  ;;  %v5331_v60 = vshrl.u32 %v5303_v49, 16  ;;  %v5306_v63 = vshrl.u32 %v5291_v50, 16  ;;  %v7696_v49 = vld [vmem:[%s9906_s20 + $0x38] sm:$0xff]  }
0x1b1c   :  { %v5373_v44 = vsel %vm4273_vm8, %v5326_v51, %v6626_v53  ;;  %v5335_v62 = vrot.slane %v5333_v54, 1  ;;  %v5310_v1 = vrot.slane %v5308_v59, 1  ;;  %v7697_v51 = vld [vmem:[%s9906_s20 + $0x70] sm:$0xff]   ;;  %v7698_v53 = vld [vmem:[%s9906_s20 + $0xf8] sm:$0xff]  }
0x1b1d   :  { %5668 = vmatprep.mubr.bf16.mxu0 %v5373_v44  ;;  %v5362_v2 = vsel %vm4273_vm8, %v5291_v50, %v5356_v58  ;;  %v7695_v50 = vld [vmem:[%s9906_s20 + $0x78] sm:$0xff]   ;;  %v7699_v59 = vld [vmem:[%s9906_s20 + $0x30] sm:$0xff]   ;;  %v7706_v44 = vld [vmem:[%s9906_s20 + $0xe8] sm:$0xff]  }
0x1b1e   :  { %v5336_v3 = vor.u32 %v5335_v62, %v5331_v60  ;;  %v5311_v6 = vor.u32 %v5310_v1, %v5306_v63  ;;  %7065 = vmatprep.subr.bf16.mxu0 %v7695_v50  ;;  %v7700_v54 = vld [vmem:[%s9906_s20 + $0xb8] sm:$0xff]   ;;  %v7704_v58 = vld [vmem:[%s9906_s20 + $0xb0] sm:$0xff]   ;;  %v7703_v60 = vld [vmem:[%s9906_s20 + $0x28] sm:$0xff]  }
0x1b1f   :  { %v7705_v62 = vld [vmem:[%s9906_s20 + $0x60] sm:$0xff]   ;;  %v7708_v63 = vld [vmem:[%s9906_s20 + $0xa8] sm:$0xff]  }
0x1b20   :  { %5344 = vrot.lane.b32.xlu1 %v5336_v3, %s7767_s7  ;;  %5319 = vrot.lane.b32.xlu0 %v5311_v6, %s7767_s7  ;;  %v7710_v1 = vld [vmem:[%s9906_s20 + $0xe0] sm:$0xff]   ;;  %v7709_v3 = vld [vmem:[%s9906_s20 + $0x58] sm:$0xff]  }
0x1b21   :  { %v7714_v6 = vld [vmem:[%s9906_s20 + $0xd8] sm:$0xff]  }
0x1b24   :  { %5346 = vrot.lane.b32.xlu1 %v5343_v12, %s7767_s7  ;;  %5321 = vrot.lane.b32.xlu0 %v5318_v13, %s7767_s7  ;;  %v7718_v12 = vld [vmem:[%s9906_s20 + $0xd0] sm:$0xff]  }
0x1b25   :  { %v7715_v13 = vld [vmem:[%s9906_s20 + $0x10] sm:$0xff]  }
0x1b92   :  { %v5345_v37 = vpop.permute.xlu1 %5344  ;;  %v5320_v16 = vpop.permute.xlu0 %5319 }
0x1b93   :  { %v5354_v14 = vsel %vm1830_vm10, %v9619_v39, %v5345_v37  ;;  %v5329_v43 = vsel %vm1830_vm10, %v9627_v47, %v5320_v16 }
0x1b94   :  { %v5357_v40 = vrot.slane %v5354_v14, 6  ;;  %v7720_v14 = vld [vmem:[%s9906_s20 + $0x90] sm:$0xff]  }
0x1b96   :  { %v5347_v46 = vpop.permute.xlu1 %5346  ;;  %v5365_v10 = vsel %vm4273_vm8, %v5329_v43, %v5357_v40  ;;  %v5322_v23 = vpop.permute.xlu0 %5321 }
0x1b97   :  { %v5348_v56 = vsel %vm1830_vm10, %v5345_v37, %v5347_v46  ;;  %5628 = vmatprep.mubr.bf16.mxu1 %v5365_v10  ;;  %v5323_v19 = vsel %vm1830_vm10, %v5320_v16, %v5322_v23  ;;  %v7717_v37 = vld [vmem:[%s9906_s20 + $0x48] sm:$0xff]  }
0x1b98   :  { %v5358_v18 = vrot.slane %v5348_v56, 6  ;;  %5629 = vmatmul.mubr.bf16.vlgmr.msra.gmra.mxu1 %v5362_v2  ;;  %v7707_v2 = vld [vmem:[%s9906_s20 + $0x20] sm:$0xff]   ;;  %v7719_v16 = vld [vmem:[%s9906_s20 + $0x8] sm:$0xff]  }
0x1b99   :  { %7284 = vmatpush3.bf16.msra.mxu1 %v7691_v45  ;;  %7291 = vmatprep.mubr.msk.bf16.mxu1 %vm7766_vm9, %v7765_v61 }
0x1b9a   :  { %v5369_v24 = vsel %vm4273_vm8, %v5323_v19, %v5358_v18  ;;  %7285 = vmatprep.subr.bf16.mxu1 %v7765_v61 }
0x1b9b   :  { %5669 = vmatmul.mubr.bf16.vlgmr.msra.gmra.mxu0 %v5369_v24 }
0x1b9c   :  { %7066 = vmatpush3.bf16.msra.mxu0 %v7696_v49 }
0x1b9d   :  { %7286 = vmatpush3.bf16.msra.mxu1 %v7692_v20  ;;  %7067 = vmatprep.subr.bf16.mxu0 %v7697_v51 }
0x1b9e   :  { %7287 = vmatprep.subr.bf16.mxu1 %v7765_v61 }
0x1ba0   :  { %7068 = vmatpush3.bf16.msra.mxu0 %v7699_v59 }
0x1ba1   :  { %7288 = vmatpush3.bf16.msra.mxu1 %v7693_v25  ;;  %7069 = vmatprep.subr.bf16.mxu0 %v7701_v57  ;;  %v7721_v25 = vld [vmem:[%s9906_s20 + $0x40] sm:$0xff]  }
0x1ba2   :  { %7289 = vmatprep.subr.bf16.mxu1 %v7765_v61 }
0x1ba4   :  { %7070 = vmatpush3.bf16.msra.mxu0 %v7703_v60 }
0x1ba5   :  { %7290 = vmatpush3.bf16.msra.mxu1 %v7694_v5  ;;  %7071 = vmatprep.subr.bf16.mxu0 %v7705_v62  ;;  %v7722_v5 = vld [vmem:[%s9906_s20 + $0xc8] sm:$0xff]  }
0x1ba6   :  { %7087 = vmatprep.subr.bf16.mxu1 %v7698_v53 }
0x1ba8   :  { %7292 = vmatmul.mubr.msk.bf16.vlgmr.msra.gmra.mxu1 %vm1830_vm10, %v5377_v27  ;;  %7072 = vmatpush3.bf16.msra.mxu0 %v7707_v2 }
0x1ba9   :  { %7088 = vmatpush3.bf16.msra.mxu1 %v7700_v54  ;;  %7073 = vmatprep.subr.bf16.mxu0 %v7709_v3 }
0x1baa   :  { %7089 = vmatprep.subr.bf16.mxu1 %v7702_v55 }
0x1bac   :  { %7074 = vmatpush3.bf16.msra.mxu0 %v7711_v7 }
0x1bad   :  { %7090 = vmatpush3.bf16.msra.mxu1 %v7704_v58  ;;  %7075 = vmatprep.subr.bf16.mxu0 %v7713_v9 }
0x1bae   :  { %7091 = vmatprep.subr.bf16.mxu1 %v7706_v44 }
0x1bb0   :  { %7076 = vmatpush3.bf16.msra.mxu0 %v7715_v13 }
0x1bb1   :  { %7092 = vmatpush3.bf16.msra.mxu1 %v7708_v63  ;;  %7077 = vmatprep.subr.bf16.mxu0 %v7717_v37 }
0x1bb2   :  { %7093 = vmatprep.subr.bf16.mxu1 %v7710_v1 }
0x1bb4   :  { %7078 = vmatpush3.bf16.msra.mxu0 %v7719_v16 }
0x1bb5   :  { %7094 = vmatpush3.bf16.msra.mxu1 %v7712_v4  ;;  %7079 = vmatprep.subr.bf16.mxu0 %v7721_v25  ;;  %v6170_v25 = vld [vmem:[%s9907_s21 + $0x20] sm:$0xff] }
0x1bb6   :  { %7095 = vmatprep.subr.bf16.mxu1 %v7714_v6 }
0x1bb9   :  { %7096 = vmatpush3.bf16.msra.mxu1 %v7716_v11  ;;  %v7727_v11 = vld [vmem:[%s9906_s20 + $0x118] sm:$0xff]  }
0x1bba   :  { %7097 = vmatprep.subr.bf16.mxu1 %v7718_v12 }
0x1bbd   :  { %7098 = vmatpush3.bf16.msra.mxu1 %v7720_v14 }
0x1bbe   :  { %7099 = vmatprep.subr.bf16.mxu1 %v7722_v5  ;;  %v6169_v5 = vld [vmem:[%s9907_s21 + $0x18] sm:$0xff] }
0x1c58   :  { %v7032_v28 = vpop.f32.mrf.mxu1 }
0x1c5a   :  { %v7033_v29 = vpop.f32.mrf.mxu1 }
0x1c5b   :  { %v7054_v30 = vpop.f32.mrf.mxu0  ;;  %v7034_v35 = vadd.f32 %v7033_v29, %v7032_v28  ;;  %v7723_v29 = vld [vmem:[%s9906_s20] sm:$0xff]  }
0x1c5c   :  { %v7035_v32 = vpop.f32.mrf.mxu1  ;;  %7080 = vmatpush3.bf16.msra.mxu0 %v7723_v29 }
0x1c5d   :  { %v7055_v33 = vpop.f32.mrf.mxu0  ;;  %7295 = vmatprep.subr.bf16.mxu0 %v7765_v61 }
0x1c5e   :  { %v7036_v15 = vpop.f32.mrf.mxu1  ;;  %v7056_v34 = vadd.f32 %v7055_v33, %v7054_v30  ;;  %v7724_v30 = vld [vmem:[%s9906_s20 + $0x88] sm:$0xff]  }
0x1c5f   :  { %v7057_v17 = vpop.f32.mrf.mxu0  ;;  %7100 = vmatpush3.bf16.msra.mxu1 %v7724_v30 }
0x1c60   :  { %v5671_v36 = vadd.f32 %v7056_v34, %v7034_v35 }
0x1c61   :  { %v7058_v22 = vpop.f32.mrf.mxu0 }
0x1c62   :  { %v7725_v22 = vld [vmem:[%s9906_s20 + $0xc0] sm:$0xff]  }
0x1c63   :  { %7101 = vmatprep.subr.bf16.mxu1 %v7725_v22 }
0x1c68   :  { %v5710_v38 = vpop.f32.mrf.mxu1 }
0x1c69   :  { %v5711_v41 = vadd.f32 %v5710_v38, %v5671_v36  ;;  %v7726_v38 = vld [vmem:[%s9906_s20 + $0x80] sm:$0xff]  }
0x1c6a   :  { %v7293_v42 = vpop.f32.mrf.mxu1  ;;  %7102 = vmatpush3.bf16.msra.mxu1 %v7726_v38 }
0x1c6b   :  { %v5716_v39 = vmax.f32 %v5711_v41, 0.0  ;;  %7307 = vmatprep.subr.mxu1 %v7765_v61 }
0x1c6c   :  { %v5713_v47 = vpop.f32.mrf.mxu1 }
0x1c6d   :  { %v9679_v8 = vpack.c.bf16 %v5716_v39, %v5716_v39 }
0x1c6e   :  { %v7294_v48 = vpop.f32.mrf.mxu1 }
0x1c6f   :  { %5719 = vrot.lane.b32.xlu1 %v9679_v8, %s7767_s7  ;;  %v5730_v40 = vshrl.u32 %v9679_v8, 16  ;;  %v5733_v43 = vshll.u32 %v9679_v8, 16 }
0x1c71   :  { %v5745_v45 = vrot.slane %v5730_v40, 1  ;;  %v5746_v46 = vrot.slane %v5733_v43, 2  ;;  %v5732_v10 = vrot.slane %v5730_v40, 7 }
0x1c73   :  { %v5747_v56 = vor.u32 %v5746_v46, %v5745_v45  ;;  %v5735_v18 = vor.u32 %v5733_v43, %v5732_v10  ;;  %v7728_v43 = vld [vmem:[%s9906_s20 + $0x110] sm:$0xff]   ;;  %v7729_v46 = vld [vmem:[%s9906_s20 + $0x108] sm:$0xff]   ;;  %v7730_v10 = vld [vmem:[%s9906_s20 + $0x100] sm:$0xff]  }
0x1c75   :  { %v5751_v28 = vsel %vm7977_vm5, 0, %v5747_v56  ;;  %v5739_v32 = vsel %vm7977_vm5, 0, %v5735_v18 }
0x1c76   :  { %v9783_v17 = vsel %vm9428_vm13, %v5751_v28, 0  ;;  %v9795_v36 = vsel %vm9428_vm13, %v5739_v32, 0 }
0x1c77   :  { %v5789_v31 = vshll.u32 %v9783_v17, 16  ;;  %v5764_v50 = vshll.u32 %v9795_v36, 16  ;;  %v5787_v62 = vshrl.u32 %v9783_v17, 16  ;;  %v5762_v63 = vshrl.u32 %v9795_v36, 16 }
0x1c78   :  { %v5776_v56 = vrot.slane %v9795_v36, 1 }
0x1c79   :  { %v5791_v58 = vrot.slane %v5789_v31, 1  ;;  %v5766_v60 = vrot.slane %v5764_v50, 1 }
0x1c7b   :  { %v5792_v1 = vor.u32 %v5791_v58, %v5787_v62  ;;  %v5767_v2 = vor.u32 %v5766_v60, %v5762_v63 }
0x1ce1   :  { %v5720_v23 = vpop.permute.xlu1 %5719 }
0x1ce2   :  { %v5723_v19 = vsel %vm1830_vm10, %v9679_v8, %v5720_v23  ;;  %v6666_v23 = vrot.slane %v9783_v17, 7 }
0x1ce3   :  { %v5724_v20 = vshrl.u32 %v5723_v19, 16  ;;  %v5727_v24 = vshll.u32 %v5723_v19, 16  ;;  %v6173_v19 = vld [vmem:[%s9907_s21 + $0x38] sm:$0xff] }
0x1ce4   :  { %v5826_v18 = vsel %vm4273_vm8, %v5776_v56, %v6666_v23 }
0x1ce5   :  { %v5726_v0 = vrot.slane %v5724_v20, 7  ;;  %v5742_v26 = vrot.slane %v5724_v20, 1  ;;  %v5743_v27 = vrot.slane %v5727_v24, 2  ;;  %v6172_v20 = vld [vmem:[%s9907_s21 + $0x30] sm:$0xff] }
0x1ce7   :  { %v5729_v33 = vor.u32 %v5727_v24, %v5726_v0  ;;  %v5744_v15 = vor.u32 %v5743_v27, %v5742_v26  ;;  %v6171_v24 = vld [vmem:[%s9907_s21 + $0x28] sm:$0xff]  ;;  %v6168_v0 = vld [vmem:[%s9907_s21 + $0x10] sm:$0xff]  ;;  %v6166_v27 = vld [vmem:[%s9907_s21] sm:$0xff] }
0x1ce8   :  { %v6167_v26 = vld [vmem:[%s9907_s21 + $0x8] sm:$0xff] }
0x1ce9   :  { %v5738_v34 = vsel %vm7977_vm5, 0, %v5729_v33  ;;  %v5750_v35 = vsel %vm7977_vm5, 0, %v5744_v15  ;;  %vm6175_vm5 = vcmask 519168  }
0x1cea   :  { %v5740_v41 = vsel %vm9428_vm13, %v5738_v34, 0  ;;  %v5752_v42 = vsel %vm9428_vm13, %v5750_v35, 0 }
0x1ceb   :  { %v5775_v39 = vrot.slane %v5740_v41, 1  ;;  %v6665_v47 = vrot.slane %v5752_v42, 7  ;;  %v5782_v8 = vshll.u32 %v5752_v42, 16  ;;  %v5757_v48 = vshll.u32 %v5740_v41, 16 }
0x1cec   :  { %v5805_v49 = vrot.slane %v5752_v42, 6  ;;  %v5780_v53 = vshrl.u32 %v5752_v42, 16  ;;  %v5755_v21 = vshrl.u32 %v5740_v41, 16 }
0x1ced   :  { %v5822_v51 = vsel %vm4273_vm8, %v5775_v39, %v6665_v47  ;;  %v5784_v54 = vrot.slane %v5782_v8, 1  ;;  %v5759_v55 = vrot.slane %v5757_v48, 1 }
0x1cee   :  { %6117 = vmatprep.mubr.bf16.mxu1 %v5822_v51  ;;  %v5811_v59 = vsel %vm4273_vm8, %v5740_v41, %v5805_v49 }
0x1cef   :  { %v5785_v57 = vor.u32 %v5784_v54, %v5780_v53  ;;  %v5760_v44 = vor.u32 %v5759_v55, %v5755_v21 }
0x1cf1   :  { %5793 = vrot.lane.b32.xlu0 %v5785_v57, %s7767_s7  ;;  %5768 = vrot.lane.b32.xlu1 %v5760_v44, %s7767_s7 }
0x1cf5   :  { %5795 = vrot.lane.b32.xlu0 %v5792_v1, %s7767_s7  ;;  %5770 = vrot.lane.b32.xlu1 %v5767_v2, %s7767_s7  ;;  %v6704_v1 = vld [vmem:[%s9908_s22] ss:$0 sm:$0xff] }
0x1d63   :  { %v5794_v3 = vpop.permute.xlu0 %5793  ;;  %v5769_v6 = vpop.permute.xlu1 %5768 }
0x1d64   :  { %v5803_v4 = vsel %vm1830_vm10, %v9783_v17, %v5794_v3  ;;  %v5778_v9 = vsel %vm1830_vm10, %v9795_v36, %v5769_v6 }
0x1d65   :  { %v5806_v7 = vrot.slane %v5803_v4, 6 }
0x1d67   :  { %v5796_v12 = vpop.permute.xlu0 %5795  ;;  %v5814_v13 = vsel %vm4273_vm8, %v5778_v9, %v5806_v7  ;;  %v5771_v14 = vpop.permute.xlu1 %5770 }
0x1d68   :  { %v5797_v37 = vsel %vm1830_vm10, %v5794_v3, %v5796_v12  ;;  %6077 = vmatprep.mubr.bf16.mxu0 %v5814_v13  ;;  %v5772_v40 = vsel %vm1830_vm10, %v5769_v6, %v5771_v14 }
0x1d69   :  { %v5807_v16 = vrot.slane %v5797_v37, 6  ;;  %6078 = vmatmul.mubr.bf16.vlgmr.msra.gmra.mxu0 %v5811_v59 }
0x1d6a   :  { %7296 = vmatpush3.bf16.msra.mxu0 %v7727_v11  ;;  %7303 = vmatprep.mubr.msk.bf16.mxu0 %vm7766_vm9, %v7765_v61 }
0x1d6b   :  { %v5818_v45 = vsel %vm4273_vm8, %v5772_v40, %v5807_v16  ;;  %7297 = vmatprep.subr.bf16.mxu0 %v7765_v61 }
0x1d6c   :  { %6118 = vmatmul.mubr.bf16.vlgmr.msra.gmra.mxu1 %v5818_v45 }
0x1d6d   :  { %7323 = vmatprep.mubr.msk.f32.mxu1 %vm7766_vm9, %v7765_v61  ;;  %7308 = vmatpush3.msra.mxu1 %v6173_v19 }
0x1d6e   :  { %7298 = vmatpush3.bf16.msra.mxu0 %v7728_v43  ;;  %7309 = vmatprep.subr.mxu1 %v7765_v61 }
0x1d6f   :  { %7299 = vmatprep.subr.bf16.mxu0 %v7765_v61  ;;  %7310 = vmatpush3.msra.mxu1 %v6172_v20 }
0x1d70   :  { %7311 = vmatprep.subr.mxu1 %v7765_v61 }
0x1d71   :  { %7312 = vmatpush3.msra.mxu1 %v6171_v24 }
0x1d72   :  { %7300 = vmatpush3.bf16.msra.mxu0 %v7729_v46  ;;  %7313 = vmatprep.subr.mxu1 %v7765_v61 }
0x1d73   :  { %7301 = vmatprep.subr.bf16.mxu0 %v7765_v61  ;;  %7314 = vmatpush3.msra.mxu1 %v6170_v25 }
0x1d74   :  { %7315 = vmatprep.subr.mxu1 %v7765_v61 }
0x1d75   :  { %7316 = vmatpush3.msra.mxu1 %v6169_v5 }
0x1d76   :  { %7302 = vmatpush3.bf16.msra.mxu0 %v7730_v10  ;;  %7317 = vmatprep.subr.mxu1 %v7765_v61 }
0x1d77   :  { %7318 = vmatpush3.msra.mxu1 %v6168_v0 }
0x1d78   :  { %7319 = vmatprep.subr.mxu1 %v7765_v61 }
0x1d79   :  { %7304 = vmatmul.mubr.msk.bf16.vlgmr.msra.gmra.mxu0 %vm1830_vm10, %v5826_v18  ;;  %7320 = vmatpush3.msra.mxu1 %v6167_v26 }
0x1d7a   :  { %7321 = vmatprep.subr.mxu1 %v7765_v61 }
0x1d7b   :  { %7322 = vmatpush3.msra.mxu1 %v6166_v27 }
0x1e29   :  { %v7081_v28 = vpop.f32.mrf.mxu0 }
0x1e2b   :  { %v7082_v29 = vpop.f32.mrf.mxu0 }
0x1e2c   :  { %v7103_v30 = vpop.f32.mrf.mxu1  ;;  %v7083_v17 = vadd.f32 %v7082_v29, %v7081_v28 }
0x1e2d   :  { %v7084_v32 = vpop.f32.mrf.mxu0 }
0x1e2e   :  { %v7104_v33 = vpop.f32.mrf.mxu1  ;;  %v6080_v35 = vadd.f32 %v7083_v17, %v9511_v52 }
0x1e2f   :  { %v7085_v15 = vpop.f32.mrf.mxu0  ;;  %v7105_v36 = vadd.f32 %v7104_v33, %v7103_v30 }
0x1e30   :  { %v7106_v22 = vpop.f32.mrf.mxu1 }
0x1e31   :  { %v6120_v38 = vadd.f32 %v7105_v36, %v6080_v35 }
0x1e32   :  { %v7107_v34 = vpop.f32.mrf.mxu1 }
0x1e39   :  { %v6159_v41 = vpop.f32.mrf.mxu0 }
0x1e3a   :  { %v6160_v42 = vadd.f32 %v6159_v41, %v6120_v38 }
0x1e3b   :  { %v7305_v39 = vpop.f32.mrf.mxu0 }
0x1e3c   :  { %v6165_v47 = vmax.f32 %v6160_v42, 0.0 }
0x1e3d   :  { %v6162_v61 = vpop.f32.mrf.mxu0 }
0x1e3e   :  { %v6176_v8 = vsel %vm6175_vm5, %v6165_v47, 0.0  ;;  %v6184_v31 = vrot.slane %v6165_v47, 4 }
0x1e3f   :  { %v6177_v48 = vrot.slane %v6176_v8, 4  ;;  %v7306_v50 = vpop.f32.mrf.mxu0 }
0x1e40   :  { %v6186_v49 = vsel %vm6175_vm5, %v6184_v31, 0.0 }
0x1e41   :  { %v6178_v51 = vadd.f32 %v6177_v48, %v6176_v8  ;;  %v6187_v53 = vrot.slane %v6186_v49, 4 }
0x1e43   :  { %v6179_v54 = vrot.slane %v6178_v51, 2  ;;  %v6188_v21 = vadd.f32 %v6187_v53, %v6186_v49 }
0x1e45   :  { %v6180_v55 = vadd.f32 %v6179_v54, %v6178_v51  ;;  %v6189_v59 = vrot.slane %v6188_v21, 2 }
0x1e47   :  { %v6181_v52 = vrot.slane %v6180_v55, 1  ;;  %v6190_v57 = vadd.f32 %v6189_v59, %v6188_v21 }
0x1e49   :  { %v6191_v58 = vrot.slane %v6190_v57, 1  ;;  %v6182_v44 = vadd.f32 %v6181_v52, %v6180_v55 }
0x1e4b   :  { %v6192_v60 = vadd.f32 %v6191_v58, %v6190_v57 }
0x1e4d   :  { %v6193_v62 = vsel %vm141_vm0, %v6182_v44, %v6192_v60 }
0x1e4e   :  { %v6194_v63 = vmul.f32 0.25, %v6193_v62 }
0x1e50   :  { %7324 = vmatmul.mubr.msk.f32.vlgmr.msra.gmra.mxu1 %vm1830_vm10, %v6194_v63 }
0x1f10   :  { %v6270_v2 = vpop.f32.mrf.mxu1 }
0x1f11   :  { %v6271_v3 = vadd.f32 %v6704_v1, %v6270_v2 }
0x1f12   :  { %v7325_v4 = vpop.f32.mrf.mxu1 }
0x1f13   :  { %6275 = vst.msk [vmem:[#allocation2] sm:$0x3] %vm6274_vm14, %v6271_v3 }
0x1f14   :  { %7742 = shalt.err (!%p7739_p4)
}
0x1f15   :  { %6285 = dma.vmem_to_hbm [thread:$0]  %s6283_s12, 32, %s9909_s23, [#allocation3]  }
0x1f16   :  { %7751 = dma.done.wait [#allocation3], 32  }
0x1f17   :  { %7752 = vsyncadd [#allocation3], 4294967264 }
0x1f18   :  { %6289 = vsyncpa [#allocation3], 1 }

</bundles_post_ra>
